<compile_context>
chip_gen: v7x
topology: tpu7x:2x2x1
jax: 0.10.0
libtpu: 0.0.40
codegen_flags: <defaults>
</compile_context>

<pallas_src>
import functools

import jax
import jax.numpy as jnp
import numpy as np
from jax.experimental import pallas as pl
from jax.experimental.pallas import tpu as pltpu

# ----------------------------- model constants ------------------------------
EMBED = 1280                 # self.embedding_shape
H1, H2, H3 = 512, 256, 128   # l1 / l2 / l3 widths
OUT_SHAPE = 2                # hyperparameters_dictionary['out_shape']
LORA_RANK = 8                # hyperparameters_dictionary['lora_rank']
LORA_SCALING_RANK = 1        # hyperparameters_dictionary['lora_scaling_rank']
LORA_INIT_SCALE = 0.01       # hyperparameters_dictionary['lora_init_scale']
VOCAB = 33                   # ESM-2 tokenizer size
SEQ_TILE = 256               # seq tile: peak VMEM ~10 MB (< v5e 16 MiB scoped default)


def _round_up(x, m):
    return ((x + m - 1) // m) * m


def _full_spec(shape):
    # whole array resident in VMEM (used only by the tiny head kernel)
    return pl.BlockSpec(shape, lambda: (0,) * len(shape))


# ------------- fused LoRALinear + mean-pool (tiled kernel) -------------------
def _lora_pool_kernel(x_ref, wt_ref, mla_ref, mlb_ref, lat_ref, lbt_ref,
                      bias_ref, o_ref, *, inv_seq_len):
    s = pl.program_id(1)

    @pl.when(s == 0)
    def _init():
        o_ref[...] = jnp.zeros_like(o_ref)

    # masked embedding tile (mask already folded in by the wrapper)
    xm = x_ref[0].astype(jnp.float32)                                # (TS, E)

    # ---- main path: W*(mlb@mla)/sr applied to x == mlb_row * ((x*mla) @ W^T)
    #      (no 1280x1280 fused-weight temporary, bf16 MXU, f32 accumulate)
    xs = (xm * mla_ref[...]).astype(jnp.bfloat16)                    # (TS, E)
    y = jnp.dot(xs, wt_ref[...], preferred_element_type=jnp.float32)  # (TS, E)
    y = y * mlb_ref[...]                                             # /sr folded into mlb_row

    # ---- low-rank path: ((x @ la^T) @ lb^T) / rank   (/rank folded into lbt)
    u = jnp.dot(xm, lat_ref[...], preferred_element_type=jnp.float32)     # (TS, r)
    y = y + jnp.dot(u, lbt_ref[...], preferred_element_type=jnp.float32)  # (TS, E)

    # ---- fused mean pool over the sequence (bias added once, at the end)
    o_ref[0] += jnp.sum(y, axis=0, keepdims=True) * inv_seq_len

    @pl.when(s == pl.num_programs(1) - 1)
    def _finish():
        o_ref[0] += bias_ref[...]


def lora_encoder_pool(emb_bf16, wt_bf16, mla, mlb_row, lat, lbt, bias_row,
                      seq_len, ts):
    """(B, S_pad, E) masked-embed -> pooled (B, E) == mean_s(LoRALinear(x))."""
    bsz, s_pad, _ = emb_bf16.shape
    kernel = functools.partial(_lora_pool_kernel, inv_seq_len=1.0 / float(seq_len))
    pooled3 = pl.pallas_call(
        kernel,
        out_shape=jax.ShapeDtypeStruct((bsz, 1, EMBED), jnp.float32),
        grid_spec=pltpu.PrefetchScalarGridSpec(
            num_scalar_prefetch=0,
            grid=(bsz, s_pad // ts),
            in_specs=[
                pl.BlockSpec((1, ts, EMBED), lambda b, s: (b, s, 0)),   # x tile
                pl.BlockSpec((EMBED, EMBED), lambda b, s: (0, 0)),      # W^T (bf16)
                pl.BlockSpec((1, EMBED), lambda b, s: (0, 0)),          # mla row
                pl.BlockSpec((1, EMBED), lambda b, s: (0, 0)),          # mlb row (/sr)
                pl.BlockSpec((EMBED, LORA_RANK), lambda b, s: (0, 0)),  # la^T
                pl.BlockSpec((LORA_RANK, EMBED), lambda b, s: (0, 0)),  # lb^T (/rank)
                pl.BlockSpec((1, EMBED), lambda b, s: (0, 0)),          # bias row
            ],
            out_specs=pl.BlockSpec((1, 1, EMBED), lambda b, s: (b, 0, 0)),
        ),
        compiler_params=pltpu.CompilerParams(
            dimension_semantics=("parallel", "arbitrary"),
            vmem_limit_bytes=64 << 20),
    )(emb_bf16, wt_bf16, mla, mlb_row, lat, lbt, bias_row)
    return pooled3.reshape(bsz, EMBED)


# ----------------------- MLP head (pooled -> logits) -------------------------
def _head_kernel(p_ref, w1_ref, b1_ref, w2_ref, b2_ref, w3_ref, b3_ref,
                 wc_ref, bc_ref, o_ref):
    def lin(z, w_ref, b_ref):
        # weights pre-transposed to (in, out) -> plain dot
        return jnp.dot(z, w_ref[...], preferred_element_type=jnp.float32) + b_ref[...]

    # dropout_layer in eval mode == identity.
    # TODO(synk): training-mode dropout (pltpu.prng_*) not implemented.
    z = jnp.maximum(lin(p_ref[...], w1_ref, b1_ref), 0.0)   # l1 + relu
    z = jnp.maximum(lin(z, w2_ref, b2_ref), 0.0)            # l2 + relu
    z = jnp.maximum(lin(z, w3_ref, b3_ref), 0.0)            # l3 + relu
    o_ref[...] = lin(z, wc_ref, bc_ref)                     # classification


def classification_head(pooled, head_params):
    bsz = pooled.shape[0]
    args = [pooled]
    specs = [_full_spec(pooled.shape)]
    for w, b in head_params:
        wt = w.T                       # (in, out)
        b2 = b.reshape(1, -1)
        args += [wt, b2]
        specs += [_full_spec(wt.shape), _full_spec(b2.shape)]
    out_f = head_params[-1][0].shape[0]
    return pl.pallas_call(
        _head_kernel,
        out_shape=jax.ShapeDtypeStruct((bsz, out_f), jnp.float32),
        in_specs=specs,
        out_specs=_full_spec((bsz, out_f)),
    )(*args)


# ------------------------------ parameter init -------------------------------
def init_params(key):
    ks = jax.random.split(key, 16)

    def xavier(k, out_f, in_f):
        bound = float(np.sqrt(6.0 / (in_f + out_f)))
        return jax.random.uniform(k, (out_f, in_f), jnp.float32, -bound, bound)

    params = {}
    # stand-in encoder: token embedding + one LoRALinear(EMBED -> EMBED)
    params["embedding"] = jax.random.normal(ks[0], (VOCAB, EMBED), jnp.float32)
    lw = jax.random.normal(ks[1], (EMBED, EMBED), jnp.float32) * 0.02
    lb_bias = jnp.zeros((EMBED,), jnp.float32)
    lora_a = jax.random.normal(ks[2], (LORA_RANK, EMBED), jnp.float32) * LORA_INIT_SCALE
    lora_b = jnp.zeros((EMBED, LORA_RANK), jnp.float32)
    multi_lora_a = (jnp.ones((LORA_SCALING_RANK, EMBED), jnp.float32)
                    + jax.random.normal(ks[3], (LORA_SCALING_RANK, EMBED),
                                        jnp.float32) * LORA_INIT_SCALE)
    multi_lora_b = jnp.ones((EMBED, LORA_SCALING_RANK), jnp.float32)
    params["lora"] = (lw, lb_bias, lora_a, lora_b, multi_lora_a, multi_lora_b)

    # classification head: xavier_uniform weights, bias filled with 0.01
    params["head"] = [
        (xavier(ks[4], H1, EMBED), jnp.full((H1,), 0.01, jnp.float32)),
        (xavier(ks[5], H2, H1),    jnp.full((H2,), 0.01, jnp.float32)),
        (xavier(ks[6], H3, H2),    jnp.full((H3,), 0.01, jnp.float32)),
        (xavier(ks[7], OUT_SHAPE, H3), jnp.full((OUT_SHAPE,), 0.01, jnp.float32)),
    ]
    return params


# ------------------------------- full forward --------------------------------
def per_sequence_classification_lora_kcne1(ids, mask, params):
    # TODO(synk): pretrained facebook/esm2_t33_650M_UR50D encoder is not
    # reproducible in-script; replaced by a deterministic embedding + one
    # Pallas LoRALinear layer producing the last_hidden_state of dim EMBED.
    assert LORA_SCALING_RANK == 1  # column/row-scaling identity needs sr == 1
    bsz, seq = ids.shape
    emb = jnp.take(params["embedding"], ids, axis=0)             # (B, S, E) f32
    # mask multiply folded here (one fused XLA elementwise op); kernel never
    # sees a lane-width-1 tensor.
    emb = emb * mask.astype(jnp.float32)[..., None]

    ts = min(SEQ_TILE, _round_up(seq, 8))
    s_pad = _round_up(seq, ts)
    emb_bf = emb.astype(jnp.bfloat16)                            # halve x DMA bytes
    if s_pad != seq:
        emb_bf = jnp.pad(emb_bf, ((0, 0), (0, s_pad - seq), (0, 0)))

    lw, lbias, la, lb, mla, mlb = params["lora"]
    wt = lw.T.astype(jnp.bfloat16)                               # (in, out), bf16
    mlb_row = (mlb / LORA_SCALING_RANK).T                        # (1, E)
    lat = la.T                                                   # (E, r)
    lbt = (lb / LORA_RANK).T                                     # (r, E)
    bias_row = lbias.reshape(1, EMBED)

    pooled = lora_encoder_pool(emb_bf, wt, mla, mlb_row, lat, lbt, bias_row,
                               seq, ts)                          # (B, E)
    return classification_head(pooled, params["head"])           # (B, OUT_SHAPE)


# ------------------------------ pure-JAX references --------------------------
def _head_ref(z, head_params):
    for i, (w, b) in enumerate(head_params):
        z = z @ w.T + b
        if i < 3:
            z = jnp.maximum(z, 0.0)
    return z


def _reference_kernel_precision(ids, mask, params):
    """Mirrors the kernel's exact math / cast points (bf16 main matmul)."""
    bsz, seq = ids.shape
    emb = jnp.take(params["embedding"], ids, axis=0)
    emb = emb * mask.astype(jnp.float32)[..., None]
    xm = emb.astype(jnp.bfloat16).astype(jnp.float32)
    lw, lbias, la, lb, mla, mlb = params["lora"]
    xs = (xm * mla.reshape(1, 1, EMBED)).astype(jnp.bfloat16)
    wt = lw.T.astype(jnp.bfloat16)
    y = jnp.einsum("bse,ef->bsf", xs, wt, preferred_element_type=jnp.float32)
    y = y * (mlb / LORA_SCALING_RANK).reshape(1, 1, EMBED)
    u = jnp.einsum("bse,er->bsr", xm, la.T, preferred_element_type=jnp.float32)
    y = y + jnp.einsum("bsr,re->bse", u, (lb / LORA_RANK).T,
                       preferred_element_type=jnp.float32)
    pooled = jnp.sum(y, axis=1) / seq + lbias.reshape(1, EMBED)
    return _head_ref(pooled, params["head"])


def _reference_f32(ids, mask, params):
    """Original PyTorch-formula reference, full f32 (semantic check)."""
    emb = jnp.take(params["embedding"], ids, axis=0)
    emb = emb * mask[..., None].astype(emb.dtype)
    lw, lbias, la, lb, mla, mlb = params["lora"]
    w_eff = lw * (mlb @ mla) / LORA_SCALING_RANK + (lb @ la) / LORA_RANK
    h = emb @ w_eff.T + lbias
    z = jnp.mean(h, axis=1)
    return _head_ref(z, params["head"])


if __name__ == "__main__":
    key = jax.random.PRNGKey(0)
    pk, ik = jax.random.split(key)
    params = init_params(pk)

    B, S = 2, 8
    ids = jax.random.randint(ik, (B, S), 0, VOCAB, dtype=jnp.int32)
    mask = jnp.ones((B, S), jnp.int32)

    out = per_sequence_classification_lora_kcne1(ids, mask, params)
    out = jax.block_until_ready(out)

    # tight check against a reference that matches the kernel's precision
    ref_k = _reference_kernel_precision(ids, mask, params)
    np.testing.assert_allclose(np.asarray(out), np.asarray(ref_k),
                               rtol=2e-3, atol=2e-3)
    # looser check against the original full-f32 module formula
    ref_f = _reference_f32(ids, mask, params)
    np.testing.assert_allclose(np.asarray(out), np.asarray(ref_f),
                               rtol=3e-2, atol=3e-2)

    assert out.shape == (B, OUT_SHAPE) and out.dtype == jnp.float32
    print("KERNEL_OK")
</pallas_src>

<mosaic_0001>
module attributes {stable_mosaic.version = 11 : i64} {
  func.func @_lora_pool_kernel(%arg0: i32, %arg1: i32, %arg2: memref<1x8x1280xbf16, #tpu.memory_space<vmem>>, %arg3: memref<1280x1280xbf16, #tpu.memory_space<vmem>>, %arg4: memref<1x1280xf32, #tpu.memory_space<vmem>>, %arg5: memref<1x1280xf32, #tpu.memory_space<vmem>>, %arg6: memref<1280x8xf32, #tpu.memory_space<vmem>>, %arg7: memref<8x1280xf32, #tpu.memory_space<vmem>>, %arg8: memref<1x1280xf32, #tpu.memory_space<vmem>>, %arg9: memref<1x1x1280xf32, #tpu.memory_space<vmem>>) attributes {dimension_semantics = [#tpu.dimension_semantics<parallel>, #tpu.dimension_semantics<arbitrary>], iteration_bounds = array<i64: 2, 1>, scalar_prefetch = 0 : i64, scratch_operands = 0 : i64, tpu.core_type = #tpu.core_type<tc>, window_params = [{transform_indices = @transform_0, window_bounds = array<i64: 1, 8, 1280>}, {pipeline_mode = #tpu.pipeline_mode<synchronous>, transform_indices = @transform_1, window_bounds = array<i64: 1280, 1280>}, {pipeline_mode = #tpu.pipeline_mode<synchronous>, transform_indices = @transform_2, window_bounds = array<i64: 1, 1280>}, {pipeline_mode = #tpu.pipeline_mode<synchronous>, transform_indices = @transform_3, window_bounds = array<i64: 1, 1280>}, {pipeline_mode = #tpu.pipeline_mode<synchronous>, transform_indices = @transform_4, window_bounds = array<i64: 1280, 8>}, {pipeline_mode = #tpu.pipeline_mode<synchronous>, transform_indices = @transform_5, window_bounds = array<i64: 8, 1280>}, {pipeline_mode = #tpu.pipeline_mode<synchronous>, transform_indices = @transform_6, window_bounds = array<i64: 1, 1280>}, {transform_indices = @transform_7, window_bounds = array<i64: 1, 1, 1280>}]} {
    %c0_i32 = arith.constant 0 : i32
    %0 = arith.cmpi eq, %arg1, %c0_i32 : i32
    %1 = arith.extui %0 : i1 to i32
    %c0_i32_0 = arith.constant 0 : i32
    %2 = arith.cmpi ne, %1, %c0_i32_0 : i32
    scf.if %2 {
      %cst_25 = arith.constant 0.000000e+00 : f32
      %33 = vector.broadcast %cst_25 : f32 to vector<1x1x1280xf32>
      %c0_26 = arith.constant 0 : index
      %c0_27 = arith.constant 0 : index
      %c0_28 = arith.constant 0 : index
      %34 = vector.load %arg9[%c0_26, %c0_27, %c0_28] : memref<1x1x1280xf32, #tpu.memory_space<vmem>>, vector<1x1x1280xf32>
      tpu.vector_store %arg9[%c0_26, %c0_27, %c0_28], %33 {strides = array<i32>} : memref<1x1x1280xf32, #tpu.memory_space<vmem>>, vector<1x1x1280xf32>,
    } else {
    }
    %c0 = arith.constant 0 : index
    %c0_1 = arith.constant 0 : index
    %c0_2 = arith.constant 0 : index
    %3 = vector.load %arg2[%c0, %c0_1, %c0_2] : memref<1x8x1280xbf16, #tpu.memory_space<vmem>>, vector<1x8x1280xbf16>
    %4 = vector.shape_cast %3 : vector<1x8x1280xbf16> to vector<8x1280xbf16>
    %5 = arith.extf %4 : vector<8x1280xbf16> to vector<8x1280xf32>
    %c0_3 = arith.constant 0 : index
    %c0_4 = arith.constant 0 : index
    %6 = vector.load %arg4[%c0_3, %c0_4] : memref<1x1280xf32, #tpu.memory_space<vmem>>, vector<1x1280xf32>
    %7 = vector.broadcast %6 : vector<1x1280xf32> to vector<8x1280xf32>
    %8 = arith.mulf %5, %7 : vector<8x1280xf32>
    %9 = arith.truncf %8 : vector<8x1280xf32> to vector<8x1280xbf16>
    %c0_5 = arith.constant 0 : index
    %c0_6 = arith.constant 0 : index
    %10 = vector.load %arg3[%c0_5, %c0_6] : memref<1280x1280xbf16, #tpu.memory_space<vmem>>, vector<1280x1280xbf16>
    %cst = arith.constant dense<0.000000e+00> : vector<8x1280xf32>
    %11 = tpu.matmul %9, %10, %cst {dimension_numbers = #tpu.dot_dimension_numbers<[1], [0], [0], [1], [0, 0, 1, 1], [], []>} : vector<8x1280xbf16>, vector<1280x1280xbf16>, vector<8x1280xf32> -> vector<8x1280xf32>
    %c0_7 = arith.constant 0 : index
    %c0_8 = arith.constant 0 : index
    %12 = vector.load %arg5[%c0_7, %c0_8] : memref<1x1280xf32, #tpu.memory_space<vmem>>, vector<1x1280xf32>
    %13 = vector.broadcast %12 : vector<1x1280xf32> to vector<8x1280xf32>
    %14 = arith.mulf %11, %13 : vector<8x1280xf32>
    %c0_9 = arith.constant 0 : index
    %c0_10 = arith.constant 0 : index
    %15 = vector.load %arg6[%c0_9, %c0_10] : memref<1280x8xf32, #tpu.memory_space<vmem>>, vector<1280x8xf32>
    %cst_11 = arith.constant dense<0.000000e+00> : vector<8x8xf32>
    %16 = tpu.matmul %5, %15, %cst_11 {dimension_numbers = #tpu.dot_dimension_numbers<[1], [0], [0], [1], [0, 0, 1, 1], [], []>} : vector<8x1280xf32>, vector<1280x8xf32>, vector<8x8xf32> -> vector<8x8xf32>
    %c0_12 = arith.constant 0 : index
    %c0_13 = arith.constant 0 : index
    %17 = vector.load %arg7[%c0_12, %c0_13] : memref<8x1280xf32, #tpu.memory_space<vmem>>, vector<8x1280xf32>
    %cst_14 = arith.constant dense<0.000000e+00> : vector<8x1280xf32>
    %18 = tpu.matmul %16, %17, %cst_14 {dimension_numbers = #tpu.dot_dimension_numbers<[1], [0], [0], [1], [0, 0, 1, 1], [], []>} : vector<8x8xf32>, vector<8x1280xf32>, vector<8x1280xf32> -> vector<8x1280xf32>
    %19 = arith.addf %14, %18 : vector<8x1280xf32>
    %c0_15 = arith.constant 0 : index
    %c0_16 = arith.constant 0 : index
    %c0_17 = arith.constant 0 : index
    %20 = vector.load %arg9[%c0_15, %c0_16, %c0_17] : memref<1x1x1280xf32, #tpu.memory_space<vmem>>, vector<1x1x1280xf32>
    %21 = vector.shape_cast %20 : vector<1x1x1280xf32> to vector<1x1280xf32>
    %cst_18 = arith.constant dense<0.000000e+00> : vector<1280xf32>
    %22 = vector.multi_reduction <add>, %19, %cst_18 [0] : vector<8x1280xf32> to vector<1280xf32>
    %23 = vector.shape_cast %22 : vector<1280xf32> to vector<1x1280xf32>
    %cst_19 = arith.constant 1.250000e-01 : f32
    %24 = vector.broadcast %cst_19 : f32 to vector<1x1280xf32>
    %25 = arith.mulf %23, %24 : vector<1x1280xf32>
    %26 = arith.addf %21, %25 : vector<1x1280xf32>
    %c0_20 = arith.constant 0 : index
    %c0_21 = arith.constant 0 : index
    %c0_22 = arith.constant 0 : index
    %27 = vector.load %arg9[%c0_20, %c0_21, %c0_22] : memref<1x1x1280xf32, #tpu.memory_space<vmem>>, vector<1x1x1280xf32>
    %28 = vector.shape_cast %27 : vector<1x1x1280xf32> to vector<1x1280xf32>
    %29 = vector.shape_cast %26 : vector<1x1280xf32> to vector<1x1x1280xf32>
    tpu.vector_store %arg9[%c0_20, %c0_21, %c0_22], %29 {strides = array<i32>} : memref<1x1x1280xf32, #tpu.memory_space<vmem>>, vector<1x1x1280xf32>,
    %c0_i32_23 = arith.constant 0 : i32
    %30 = arith.cmpi eq, %arg1, %c0_i32_23 : i32
    %31 = arith.extui %30 : i1 to i32
    %c0_i32_24 = arith.constant 0 : i32
    %32 = arith.cmpi ne, %31, %c0_i32_24 : i32
    scf.if %32 {
      %c0_25 = arith.constant 0 : index
      %c0_26 = arith.constant 0 : index
      %c0_27 = arith.constant 0 : index
      %33 = vector.load %arg9[%c0_25, %c0_26, %c0_27] : memref<1x1x1280xf32, #tpu.memory_space<vmem>>, vector<1x1x1280xf32>
      %34 = vector.shape_cast %33 : vector<1x1x1280xf32> to vector<1x1280xf32>
      %c0_28 = arith.constant 0 : index
      %c0_29 = arith.constant 0 : index
      %35 = vector.load %arg8[%c0_28, %c0_29] : memref<1x1280xf32, #tpu.memory_space<vmem>>, vector<1x1280xf32>
      %36 = arith.addf %34, %35 : vector<1x1280xf32>
      %c0_30 = arith.constant 0 : index
      %c0_31 = arith.constant 0 : index
      %c0_32 = arith.constant 0 : index
      %37 = vector.load %arg9[%c0_30, %c0_31, %c0_32] : memref<1x1x1280xf32, #tpu.memory_space<vmem>>, vector<1x1x1280xf32>
      %38 = vector.shape_cast %37 : vector<1x1x1280xf32> to vector<1x1280xf32>
      %39 = vector.shape_cast %36 : vector<1x1280xf32> to vector<1x1x1280xf32>
      tpu.vector_store %arg9[%c0_30, %c0_31, %c0_32], %39 {strides = array<i32>} : memref<1x1x1280xf32, #tpu.memory_space<vmem>>, vector<1x1x1280xf32>,
    } else {
    }
    return
  }
  func.func @transform_0(%arg0: i32, %arg1: i32) -> (i32, i32, i32) {
    %c0_i32 = arith.constant 0 : i32
    %c0_i32_0 = arith.constant 0 : i32
    return %arg0, %arg1, %c0_i32 : i32, i32, i32
  }
  func.func @transform_1(%arg0: i32, %arg1: i32) -> (i32, i32) {
    %c0_i32 = arith.constant 0 : i32
    %c0_i32_0 = arith.constant 0 : i32
    %c0_i32_1 = arith.constant 0 : i32
    return %c0_i32, %c0_i32_0 : i32, i32
  }
  func.func @transform_2(%arg0: i32, %arg1: i32) -> (i32, i32) {
    %c0_i32 = arith.constant 0 : i32
    %c0_i32_0 = arith.constant 0 : i32
    %c0_i32_1 = arith.constant 0 : i32
    return %c0_i32, %c0_i32_0 : i32, i32
  }
  func.func @transform_3(%arg0: i32, %arg1: i32) -> (i32, i32) {
    %c0_i32 = arith.constant 0 : i32
    %c0_i32_0 = arith.constant 0 : i32
    %c0_i32_1 = arith.constant 0 : i32
    return %c0_i32, %c0_i32_0 : i32, i32
  }
  func.func @transform_4(%arg0: i32, %arg1: i32) -> (i32, i32) {
    %c0_i32 = arith.constant 0 : i32
    %c0_i32_0 = arith.constant 0 : i32
    %c0_i32_1 = arith.constant 0 : i32
    return %c0_i32, %c0_i32_0 : i32, i32
  }
  func.func @transform_5(%arg0: i32, %arg1: i32) -> (i32, i32) {
    %c0_i32 = arith.constant 0 : i32
    %c0_i32_0 = arith.constant 0 : i32
    %c0_i32_1 = arith.constant 0 : i32
    return %c0_i32, %c0_i32_0 : i32, i32
  }
  func.func @transform_6(%arg0: i32, %arg1: i32) -> (i32, i32) {
    %c0_i32 = arith.constant 0 : i32
    %c0_i32_0 = arith.constant 0 : i32
    %c0_i32_1 = arith.constant 0 : i32
    return %c0_i32, %c0_i32_0 : i32, i32
  }
  func.func @transform_7(%arg0: i32, %arg1: i32) -> (i32, i32, i32) {
    %c0_i32 = arith.constant 0 : i32
    %c0_i32_0 = arith.constant 0 : i32
    %c0_i32_1 = arith.constant 0 : i32
    return %arg0, %c0_i32, %c0_i32_0 : i32, i32, i32
  }
}

</mosaic_0001>

<bundles_post_ra>
// kernel: tpu_custom_call.1
= control target key start
LH: loop header
LB: loop body
LE: loop exit
PB: predicated region body
PF: predicated region fallthrough
CT: control target
= control target key end

     0   :  { %s11098_s0 = inlined_call_operand.hbm [shape: bf16[2,8,1280], index: 0, kind: input, shape index: {}]   ;;  %s11099_s1 = inlined_call_operand.hbm [shape: bf16[1280,1280], index: 1, kind: input, shape index: {}]   ;;  %s11100_s2 = inlined_call_operand.hbm [shape: f32[1,1280], index: 2, kind: input, shape index: {}]   ;;  %s11101_s3 = inlined_call_operand.hbm [shape: f32[1,1280], index: 3, kind: input, shape index: {}]   ;;  %s11102_s4 = inlined_call_operand.hbm [shape: f32[1280,8], index: 4, kind: input, shape index: {}]   ;;  %s11103_s5 = inlined_call_operand.hbm [shape: f32[8,1280], index: 5, kind: input, shape index: {}]   ;;  %s11104_s6 = inlined_call_operand.hbm [shape: f32[1,1280], index: 6, kind: input, shape index: {}]   ;;  %s11105_s7 = inlined_call_operand.hbm [shape: f32[2,1,1280], index: 7, kind: output, shape index: {}]  }
   0x1   :  { %11112 = sst [smem:[#allocation20_spill]] %s11099_s1 }
   0x2   :  { %11113 = sst [smem:[#allocation21_spill]] %s11100_s2 }
   0x3   :  { %11114 = sst [smem:[#allocation22_spill]] %s11105_s7 }
   0x4   :  { %12 = vsyncpa [#allocation3], 0 }
   0x5   :  { %14 = vsyncpa [#allocation3 + $0x1], 0 }
   0x6   :  { %15 = vsyncpa [#allocation6], 0 }
   0x7   :  { %16 = vsyncpa [#allocation9], 0 }
   0x8   :  { %17 = vsyncpa [#allocation12], 0 }
   0x9   :  { %18 = vsyncpa [#allocation4], 0 }
   0xa   :  { %20 = vsyncpa [#allocation4 + $0x1], 0  ;;  %s10509_s24 = smov 0   ;;  %s10511_s25 = smov 0  }
   0xb   :  { %s10513_s26 = smov 0   ;;  %s10515_s27 = smov 0  }
   0xc   :  { %s10517_s28 = smov 0   ;;  %s10519_s29 = smov 0  }
   0xd LB: > { %s11106_s30 = sadd.s32 4294967295, %s10453_s29   ;;  %p7589_p0 = scmp.ge.s32.totalorder %s10453_s29, 1  ;;  %s10453_s29 = sphi %s10519_s29, %s26_s29   ;;  %s10449_s28 = sphi %s10517_s28, %s11140_s28   ;;  %s10445_s27 = sphi %s10515_s27, %s11139_s27   ;;  %s10441_s26 = sphi %s10513_s26, %s11138_s26   ;;  %s10437_s25 = sphi %s10511_s25, %s11137_s25   ;;  %s10433_s24 = sphi %s10509_s24, %s11136_s24  }
   0xe   : > { %p10543_p1 = scmp.eq.s32.totalorder %s11106_s30, 0  ;;  %p223_p2 = scmp.lt.s32.totalorder %s10453_s29, 3 }
   0xf   : > { %s10455_s10 = smov [#allocation5]   ;;  %s10456_s13 = smov [#allocation8]  }
  0x10   : > { %s11115_s8 = scalar_select %p10543_p1, 1, 0 }
  0x11   : > { %p10548_p3 = pnand %p7589_p0, %p223_p2  ;;  %s235_s11 = sshll.u32 %s10455_s10, 4  ;;  %s10552_s11 = int_to_ptr.vmem [resolvable:$true] %s235_s11 }
  0x12   : > { %s260_s14 = sshll.u32 %s10456_s13, 4  ;;  %s10457_s15 = smov [#allocation11]   ;;  %s10563_s14 = int_to_ptr.vmem [resolvable:$true] %s260_s14 }
  0x13   : > { %s11116_s9 = scalar_select %p10548_p3, 1, 0 }
  0x14   : > { %p8859_p4 = pneg %p10548_p3  ;;  %s10565_s16 = sshll.u32 %s10457_s15, 4  ;;  %s285_s16 = int_to_ptr.vmem [resolvable:$true] %s10565_s16 }
  0x15   : > { %s11118_s1 = sld [smem:[#allocation20_spill]] }
  0x16   : > { %p10559_p6 = pnand %p8859_p4, %p10543_p1 }
  0x18   : > { %p10575_p8 = pneg %p10559_p6 }
  0x1b   : > { %s10161_s19 = scalar_lea.hbm %s11118_s1, 102400 }
  0x1c   : > { %p10162_p7 = scmp.ne.s32.totalorder %s11118_s1, %s10161_s19  ;;  %p10168_p11 = scmp.lt.u32.totalorder %s10161_s19, %s11118_s1 }
  0x1e   : > { %p10164_p9 = pnand %p10575_p8, %p10162_p7 }
  0x20   : > { %p10165_p10 = pneg %p10164_p9 }
  0x22   : > { %p10170_p12 = pnand %p10168_p11, %p10165_p10 }
  0x24   : > { %10173 = shalt.err (!%p10170_p12)
}
  0x25   : > { %s10174_s13 = scalar_lea.vmem %s10552_s11, 102400  ;;  %p10182_p4 = scmp.lt.s32.totalorder %s10552_s11, %s10552_s11 }
  0x26   : > { %p10175_p13 = scmp.ne.s32.totalorder %s10552_s11, %s10174_s13  ;;  %p10183_p5 = scmp.lt.s32.totalorder %s10174_s13, %s10174_s13 }
  0x28   : > { %p10177_p0 = pnand %p10175_p13, %p10575_p8  ;;  %p10184_p7 = por %p10183_p5, %p10182_p4 }
  0x2a   : > { %p10178_p2 = pneg %p10177_p0 }
  0x2c   : > { %p10185_p9 = pnand %p10184_p7, %p10178_p2 }
  0x2e   : > { %10188 = shalt.err (!%p10185_p9)
}
  0x2f   : > { %s10458_s15 = smov 640   ;;  %s10459_s17 = smov 40  }
  0x30   : > { %8862 = dma.hbm_to_vmem [thread:$0]  (!%p10559_p6), %s11118_s1, 102400, %s10552_s11, [#allocation6], %s10458_s15, %s10458_s15, %s10459_s17  }
  0x31   : > { %s10189_s23 = scalar_lea.hbm %s11101_s3, 160 }
  0x32   : > { %p10190_p5 = scmp.ne.s32.totalorder %s11101_s3, %s10189_s23  ;;  %p10196_p12 = scmp.lt.u32.totalorder %s10189_s23, %s11101_s3 }
  0x34   : > { %p10192_p10 = pnand %p10190_p5, %p10575_p8 }
  0x36   : > { %p10193_p11 = pneg %p10192_p10 }
  0x38   : > { %p10198_p13 = pnand %p10196_p12, %p10193_p11 }
  0x3a   : > { %10201 = shalt.err (!%p10198_p13)
}
  0x3b   : > { %s10202_s11 = scalar_lea.vmem %s10563_s14, 160  ;;  %p10210_p7 = scmp.lt.s32.totalorder %s10563_s14, %s10563_s14 }
  0x3c   : > { %p10203_p0 = scmp.ne.s32.totalorder %s10563_s14, %s10202_s11  ;;  %p10211_p9 = scmp.lt.s32.totalorder %s10202_s11, %s10202_s11 }
  0x3e   : > { %p10205_p2 = pnand %p10203_p0, %p10575_p8  ;;  %p10212_p5 = por %p10211_p9, %p10210_p7 }
  0x40   : > { %p10206_p4 = pneg %p10205_p2 }
  0x42   : > { %p10213_p10 = pnand %p10212_p5, %p10206_p4 }
  0x44   : > { %10216 = shalt.err (!%p10213_p10)
}
  0x45   : > { %8868 = dma.hbm_to_vmem [thread:$0]  (!%p10559_p6), %s11101_s3, 160, %s10563_s14, [#allocation9]  }
  0x46   : > { %s10217_s18 = scalar_lea.hbm %s11103_s5, 1280 }
  0x47   : > { %p10218_p11 = scmp.ne.s32.totalorder %s11103_s5, %s10217_s18  ;;  %p10224_p0 = scmp.lt.u32.totalorder %s10217_s18, %s11103_s5 }
  0x49   : > { %p10220_p12 = pnand %p10218_p11, %p10575_p8 }
  0x4b   : > { %p10221_p13 = pneg %p10220_p12 }
  0x4d   : > { %p10226_p2 = pnand %p10224_p0, %p10221_p13 }
  0x4f   : > { %10229 = shalt.err (!%p10226_p2)
}
  0x50   : > { %s10230_s10 = scalar_lea.vmem %s285_s16, 1280  ;;  %p10238_p5 = scmp.lt.s32.totalorder %s285_s16, %s285_s16 }
  0x51   : > { %p10231_p4 = scmp.ne.s32.totalorder %s285_s16, %s10230_s10  ;;  %p10239_p10 = scmp.lt.s32.totalorder %s10230_s10, %s10230_s10 }
  0x53   : > { %p10233_p7 = pnand %p10231_p4, %p10575_p8  ;;  %p10240_p3 = por %p10239_p10, %p10238_p5 }
  0x55   : > { %p10234_p9 = pneg %p10233_p7 }
  0x57   : > { %p10241_p1 = pnand %p10240_p3, %p10234_p9 }
  0x59   : > { %10244 = shalt.err (!%p10241_p1)
}
  0x5a   : > { %8874 = dma.hbm_to_vmem [thread:$0]  (!%p10559_p6), %s11103_s5, 1280, %s285_s16, [#allocation12]  }
  0x5b   : > { %s10460_s11 = smov [#allocation7]   ;;  %s10461_s30 = smov [#allocation10]  }
  0x5c   : > { %s249_s7 = sshll.u32 %s10460_s11, 4  ;;  %s270_s15 = sshll.u32 %s10461_s30, 4  ;;  %s250_s7 = int_to_ptr.vmem [resolvable:$true] %s249_s7  ;;  %s271_s15 = int_to_ptr.vmem [resolvable:$true] %s270_s15 }
  0x5d   : > { %s11120_s2 = sld [smem:[#allocation21_spill]] }
  0x63   : > { %s10245_s19 = scalar_lea.hbm %s11120_s2, 160 }
  0x64   : > { %p10246_p1 = scmp.ne.s32.totalorder %s11120_s2, %s10245_s19  ;;  %p10252_p12 = scmp.lt.u32.totalorder %s10245_s19, %s11120_s2 }
  0x66   : > { %p10248_p3 = pnand %p10246_p1, %p10575_p8 }
  0x68   : > { %p10249_p11 = pneg %p10248_p3 }
  0x6a   : > { %p10254_p13 = pnand %p10252_p12, %p10249_p11 }
  0x6c   : > { %10257 = shalt.err (!%p10254_p13)
}
  0x6d   : > { %s10258_s16 = scalar_lea.vmem %s250_s7, 160  ;;  %p10266_p7 = scmp.lt.s32.totalorder %s250_s7, %s250_s7 }
  0x6e   : > { %p10259_p0 = scmp.ne.s32.totalorder %s250_s7, %s10258_s16  ;;  %p10267_p9 = scmp.lt.s32.totalorder %s10258_s16, %s10258_s16 }
  0x70   : > { %p10261_p2 = pnand %p10259_p0, %p10575_p8  ;;  %p10268_p5 = por %p10267_p9, %p10266_p7 }
  0x72   : > { %p10262_p4 = pneg %p10261_p2 }
  0x74   : > { %p10269_p10 = pnand %p10268_p5, %p10262_p4 }
  0x76   : > { %10272 = shalt.err (!%p10269_p10)
}
  0x77   : > { %8865 = dma.hbm_to_vmem [thread:$0]  (!%p10559_p6), %s11120_s2, 160, %s250_s7, [#allocation6]  }
  0x78   : > { %s10273_s17 = scalar_lea.hbm %s11102_s4, 20480 }
  0x79   : > { %p10274_p1 = scmp.ne.s32.totalorder %s11102_s4, %s10273_s17  ;;  %p10280_p12 = scmp.lt.u32.totalorder %s10273_s17, %s11102_s4 }
  0x7b   : > { %p10276_p3 = pnand %p10274_p1, %p10575_p8 }
  0x7d   : > { %p10277_p11 = pneg %p10276_p3 }
  0x7f   : > { %p10282_p13 = pnand %p10280_p12, %p10277_p11 }
  0x81   : > { %10285 = shalt.err (!%p10282_p13)
}
  0x82   : > { %s10286_s23 = scalar_lea.vmem %s271_s15, 20480  ;;  %p10294_p7 = scmp.lt.s32.totalorder %s271_s15, %s271_s15 }
  0x83   : > { %p10287_p0 = scmp.ne.s32.totalorder %s271_s15, %s10286_s23  ;;  %p10295_p9 = scmp.lt.s32.totalorder %s10286_s23, %s10286_s23 }
  0x85   : > { %p10289_p2 = pnand %p10287_p0, %p10575_p8  ;;  %p10296_p5 = por %p10295_p9, %p10294_p7 }
  0x87   : > { %p10290_p4 = pneg %p10289_p2 }
  0x89   : > { %p10297_p10 = pnand %p10296_p5, %p10290_p4 }
  0x8b   : > { %10300 = shalt.err (!%p10297_p10)
}
  0x8c   : > { %s10462_s7 = smov 128   ;;  %s10463_s10 = smov 8  }
  0x8d   : > { %8871 = dma.hbm_to_vmem [thread:$0]  (!%p10559_p6), %s11102_s4, 20480, %s271_s15, [#allocation9], %s10462_s7, %s10462_s7, %s10463_s10  }
  0x8e   : > { %s10464_s13 = smov [#allocation13]   ;;  %s10301_s18 = scalar_lea.hbm %s11104_s6, 160 }
  0x8f   : > { %s295_s11 = sshll.u32 %s10464_s13, 4  ;;  %p10302_p1 = scmp.ne.s32.totalorder %s11104_s6, %s10301_s18  ;;  %s296_s11 = int_to_ptr.vmem [resolvable:$true] %s295_s11 }
  0x90   : > { %p10308_p12 = scmp.lt.u32.totalorder %s10301_s18, %s11104_s6 }
  0x91   : > { %p10304_p3 = pnand %p10302_p1, %p10575_p8 }
  0x93   : > { %p10305_p11 = pneg %p10304_p3 }
  0x95   : > { %p10310_p13 = pnand %p10308_p12, %p10305_p11 }
  0x97   : > { %10313 = shalt.err (!%p10310_p13)
}
  0x98   : > { %s10314_s15 = scalar_lea.vmem %s296_s11, 160  ;;  %p10322_p7 = scmp.lt.s32.totalorder %s296_s11, %s296_s11 }
  0x99   : > { %p10315_p0 = scmp.ne.s32.totalorder %s296_s11, %s10314_s15  ;;  %p10323_p9 = scmp.lt.s32.totalorder %s10314_s15, %s10314_s15 }
  0x9b   : > { %p10317_p2 = pnand %p10315_p0, %p10575_p8  ;;  %p10324_p5 = por %p10323_p9, %p10322_p7 }
  0x9d   : > { %p10318_p4 = pneg %p10317_p2 }
  0x9f   : > { %p10325_p10 = pnand %p10324_p5, %p10318_p4 }
  0xa1   : > { %10328 = shalt.err (!%p10325_p10)
}
  0xa2   : > { %8877 = dma.hbm_to_vmem [thread:$0]  (!%p10559_p6), %s11104_s6, 160, %s296_s11, [#allocation12]  }
  0xa3   : > { %s7588_s22 = sadd.s32 4294967294, %s10453_s29   ;;  %s38_s16 = sadd.s32 1, %s10449_s28 }
  0xa4   : > { %p40_p8 = scmp.ge.s32.totalorder %s38_s16, 2  ;;  %s47_s12 = sadd.s32 1, %s10441_s26 }
  0xa5   : > { %p54_p1 = scmp.ne.s32.totalorder %s10441_s26, %s10437_s25  ;;  %p55_p3 = scmp.eq.s32.totalorder %s10453_s29, 0 }
  0xa6   : > { %s11142_s16 = smov (%p40_p8, %s38_s16), 0  ;;  %p60_p12 = scmp.ne.s32.totalorder %s10437_s25, %s10433_s24 }
  0xa7   : > { %p10700_p11 = por %p55_p3, %p54_p1  ;;  %s42_s13 = ssub.s32 %s10449_s28, %s11142_s16 }
  0xa8   : > { %s11122_s11 = sadd.s32 4294967295, %s10453_s29   ;;  %p45_p13 = scmp.eq.s32.totalorder %s42_s13, 0 }
  0xa9   : > { %p210_p6 = scmp.eq.s32.totalorder %s11122_s11, 1  ;;  %p11123_p0 = scmp.ne.s32.totalorder %s11115_s8, 0 }
  0xaa   : > { %p216_p7 = scmp.eq.s32.totalorder %s7588_s22, 1  ;;  %p8892_p5 = scmp.lt.s32.totalorder %s10453_s29, 2 }
  0xab   : > { %p10712_p2 = por %p11123_p0, %p60_p12  ;;  %p10716_p4 = por %p210_p6, %p54_p1 }
  0xac   : > { %s10721_s18 = scalar_select %p45_p13, %s10441_s26, %s47_s12  }
  0xad   : > { %s11125_s17 = scalar_select %p10716_p4, 1, 0 }
  0xae   : > { %p10723_p9 = por %p216_p7, %p60_p12  ;;  %s306_s20 = sand.u32 1, %s10441_s26  }
  0xaf   : > { %s8827_s21 = smul.u32 640, %s10449_s28  ;;  %p10732_p10 = pnand %p8892_p5, %p10700_p11 }
  0xb0   : > { %s11126_s19 = scalar_select %p10723_p9, 1, 0 }
  0xb1   : > { %s8826_s23 = smul.u32 40, %s306_s20  ;;  %s10739_s22 = scalar_lea.hbm %s11098_s0, %s8827_s21 }
  0xb2   : > { %s307_s14 = scalar_lea.sflag [#allocation3], %s306_s20  ;;  %s10329_s11 = scalar_lea.hbm %s10739_s22, 640 }
  0xb3   : > { %s310_s12 = scalar_lea.vmem [#allocation2], %s8826_s23  ;;  %p10330_p8 = scmp.ne.s32.totalorder %s10739_s22, %s10329_s11 }
  0xb4   : > { %s320_s13 = sshll.u32 %s310_s12, 4  ;;  %p10331_p1 = pneg %p10732_p10  ;;  %s10741_s13 = int_to_ptr.vmem [resolvable:$true] %s320_s13 }
  0xb5   : > { %s10334_s10 = scalar_lea.hbm %s11098_s0, 1280  ;;  %p10335_p12 = scmp.lt.u32.totalorder %s10739_s22, %s11098_s0 }
  0xb6   : > { %p10332_p3 = pnand %p10331_p1, %p10330_p8  ;;  %p10336_p6 = scmp.lt.u32.totalorder %s10334_s10, %s10329_s11 }
  0xb7   : > { %p10338_p0 = scmp.lt.u32.totalorder %s10329_s11, %s10739_s22 }
  0xb8   : > { %p10333_p11 = pneg %p10332_p3  ;;  %p10337_p13 = por %p10336_p6, %p10335_p12 }
  0xba   : > { %p10339_p7 = por %p10338_p0, %p10337_p13 }
  0xbc   : > { %p10340_p5 = pnand %p10339_p7, %p10333_p11 }
  0xbe   : > { %10343 = shalt.err (!%p10340_p5)
}
  0xbf   : > { %s10344_s20 = scalar_lea.vmem %s10741_s13, 640  ;;  %s10465_s23 = smov [#allocation2]  }
  0xc0   : > { %p10345_p8 = scmp.ne.s32.totalorder %s10741_s13, %s10344_s20  ;;  %s10349_s12 = sshll.u32 %s10465_s23, 4  ;;  %s10350_s12 = int_to_ptr.vmem [resolvable:$false] %s10349_s12 }
  0xc1   : > { %s10351_s1 = scalar_lea.vmem %s10350_s12, 1280  ;;  %p10352_p4 = scmp.lt.s32.totalorder %s10741_s13, %s10350_s12 }
  0xc2   : > { %p10347_p3 = pnand %p10345_p8, %p10331_p1  ;;  %p10353_p12 = scmp.lt.s32.totalorder %s10351_s1, %s10344_s20 }
  0xc4   : > { %p10348_p9 = pneg %p10347_p3  ;;  %p10354_p6 = por %p10353_p12, %p10352_p4 }
  0xc6   : > { %p10355_p13 = pnand %p10354_p6, %p10348_p9 }
  0xc8   : > { %10358 = shalt.err (!%p10355_p13)
}
  0xc9   : > { %8881 = dma.hbm_to_vmem [thread:$0]  (!%p10732_p10), %s10739_s22, 640, %s10741_s13, %s307_s14  }
  0xca   : > { %p11128_p11 = scmp.ne.s32.totalorder %s11116_s9, 0 }
  0xcb   : > { %s10771_s2 = sand.u32 (!%p11128_p11), 1, %s10437_s25  }
  0xcc   : > { %329 = sbr.rel (%p11128_p11) target bundleno = 1580 (0x62c), region = 48  ;;  %s332_s7 = scalar_lea.sflag (!%p11128_p11), [#allocation3], %s10771_s2 }
  0xcd   : > { %s8828_s11 = smul.u32 (!%p11128_p11), 40, %s10771_s2 }
  0xcf   : > { %s10775_s21 = scalar_lea.vmem (!%p11128_p11), [#allocation2], %s8828_s11 }
  0xd3   : > { %10412 = dma.done.wait (%p10712_p2), %s332_s7, 640  }
  0xd4   : > { %10414 = vsyncadd (%p10712_p2), %s332_s7, 4294966656  ;;  %p11129_p4 = scmp.ne.s32.totalorder %s11115_s8, 0 }
  0xd6   : > { %10416 = dma.done.wait (%p11129_p4), [#allocation6], 102560  }
  0xd7   : > { %10418 = vsyncadd (%p11129_p4), [#allocation6], 4294864736 }
  0xd8   : > { %10420 = dma.done.wait (%p11129_p4), [#allocation9], 20640  }
  0xd9   : > { %10422 = vsyncadd (%p11129_p4), [#allocation9], 4294946656 }
  0xda   : > { %10424 = dma.done.wait (%p11129_p4), [#allocation12], 1440  }
  0xdb   : > { %10426 = vsyncadd (%p11129_p4), [#allocation12], 4294965856  ;;  %v8960_v0 = vld [vmem:[#allocation5 + $0x4] ss:$40 sps:$4 sm:$0xff]   ;;  %v8964_v2 = vld [vmem:[#allocation5] ss:$40 sps:$4 sm:$0xff]   ;;  %v395_v37 = vlaneseq }
  0xdc   : > { %v8962_v1 = vld [vmem:[#allocation5 + $0x504] ss:$40 sps:$4 sm:$0xff]   ;;  %5289 = vmatprep.subr.bf16.mxu1 %v8960_v0  ;;  %v8965_v3 = vld [vmem:[#allocation5 + $0x500] ss:$40 sps:$4 sm:$0xff]   ;;  %v8966_v4 = vld [vmem:[#allocation5 + $0x54] ss:$40 sps:$4 sm:$0xff]  }
  0xdd   : > { %5330 = vmatprep.subr.bf16.mxu0 %v8962_v1  ;;  %5290 = vmatpush1.bf16.msra.mxu1 %v8964_v2  ;;  %v8968_v5 = vld [vmem:[#allocation5 + $0x554] ss:$40 sps:$4 sm:$0xff]   ;;  %v8970_v6 = vld [vmem:[#allocation5 + $0x50] ss:$40 sps:$4 sm:$0xff]   ;;  %v8972_v8 = vld [vmem:[#allocation5 + $0xa4] ss:$40 sps:$4 sm:$0xff]  }
  0xde   : > { %5331 = vmatpush1.bf16.msra.mxu0 %v8965_v3  ;;  %5291 = vmatprep.subr.bf16.mxu1 %v8966_v4  ;;  %v8971_v7 = vld [vmem:[#allocation5 + $0x550] ss:$40 sps:$4 sm:$0xff]   ;;  %v8974_v9 = vld [vmem:[#allocation5 + $0x5a4] ss:$40 sps:$4 sm:$0xff]   ;;  %v8976_v10 = vld [vmem:[#allocation5 + $0xa0] ss:$40 sps:$4 sm:$0xff]  }
  0xdf   : > { %5332 = vmatprep.subr.bf16.mxu0 %v8968_v5  ;;  %v8977_v11 = vld [vmem:[#allocation5 + $0x5a0] ss:$40 sps:$4 sm:$0xff]   ;;  %v8978_v12 = vld [vmem:[#allocation5 + $0xf4] ss:$40 sps:$4 sm:$0xff]   ;;  %v8982_v14 = vld [vmem:[#allocation5 + $0xf0] ss:$40 sps:$4 sm:$0xff]  }
  0xe0   : > { %v8980_v13 = vld [vmem:[#allocation5 + $0x5f4] ss:$40 sps:$4 sm:$0xff]   ;;  %v8983_v15 = vld [vmem:[#allocation5 + $0x5f0] ss:$40 sps:$4 sm:$0xff]   ;;  %v8984_v16 = vld [vmem:[#allocation5 + $0x144] ss:$40 sps:$4 sm:$0xff]  }
  0xe1   : > { %5292 = vmatpush1.bf16.msra.mxu1 %v8970_v6  ;;  %v8986_v17 = vld [vmem:[#allocation5 + $0x644] ss:$40 sps:$4 sm:$0xff]   ;;  %v8988_v18 = vld [vmem:[#allocation5 + $0x140] ss:$40 sps:$4 sm:$0xff]   ;;  %v8990_v20 = vld [vmem:[#allocation5 + $0x194] ss:$40 sps:$4 sm:$0xff]  }
  0xe2   : > { %5333 = vmatpush1.bf16.msra.mxu0 %v8971_v7  ;;  %5293 = vmatprep.subr.bf16.mxu1 %v8972_v8  ;;  %v8989_v19 = vld [vmem:[#allocation5 + $0x640] ss:$40 sps:$4 sm:$0xff]   ;;  %v8992_v21 = vld [vmem:[#allocation5 + $0x694] ss:$40 sps:$4 sm:$0xff]   ;;  %v8994_v22 = vld [vmem:[#allocation5 + $0x190] ss:$40 sps:$4 sm:$0xff]  }
  0xe3   : > { %5334 = vmatprep.subr.bf16.mxu0 %v8974_v9  ;;  %v8995_v23 = vld [vmem:[#allocation5 + $0x690] ss:$40 sps:$4 sm:$0xff]   ;;  %v8996_v24 = vld [vmem:[#allocation5 + $0x1e4] ss:$40 sps:$4 sm:$0xff]   ;;  %v9000_v26 = vld [vmem:[#allocation5 + $0x1e0] ss:$40 sps:$4 sm:$0xff]  }
  0xe4   : > { %v8998_v25 = vld [vmem:[#allocation5 + $0x6e4] ss:$40 sps:$4 sm:$0xff]   ;;  %v9001_v27 = vld [vmem:[#allocation5 + $0x6e0] ss:$40 sps:$4 sm:$0xff]   ;;  %v9002_v28 = vld [vmem:[#allocation5 + $0x234] ss:$40 sps:$4 sm:$0xff]  }
  0xe5   : > { %5294 = vmatpush1.bf16.msra.mxu1 %v8976_v10  ;;  %v9004_v29 = vld [vmem:[#allocation5 + $0x734] ss:$40 sps:$4 sm:$0xff]   ;;  %v9006_v30 = vld [vmem:[#allocation5 + $0x230] ss:$40 sps:$4 sm:$0xff]   ;;  %v9008_v32 = vld [vmem:[#allocation5 + $0x284] ss:$40 sps:$4 sm:$0xff]  }
  0xe6   : > { %5335 = vmatpush1.bf16.msra.mxu0 %v8977_v11  ;;  %5295 = vmatprep.subr.bf16.mxu1 %v8978_v12  ;;  %v9007_v31 = vld [vmem:[#allocation5 + $0x730] ss:$40 sps:$4 sm:$0xff]   ;;  %v9010_v33 = vld [vmem:[#allocation5 + $0x784] ss:$40 sps:$4 sm:$0xff]   ;;  %v9012_v34 = vld [vmem:[#allocation5 + $0x280] ss:$40 sps:$4 sm:$0xff]  }
  0xe7   : > { %5336 = vmatprep.subr.bf16.mxu0 %v8980_v13  ;;  %v9013_v35 = vld [vmem:[#allocation5 + $0x780] ss:$40 sps:$4 sm:$0xff]   ;;  %v9014_v36 = vld [vmem:[#allocation5 + $0x2d4] ss:$40 sps:$4 sm:$0xff]   ;;  %v9018_v39 = vld [vmem:[#allocation5 + $0x2d0] ss:$40 sps:$4 sm:$0xff]  }
  0xe8   : > { %v9016_v38 = vld [vmem:[#allocation5 + $0x7d4] ss:$40 sps:$4 sm:$0xff]   ;;  %v9019_v40 = vld [vmem:[#allocation5 + $0x7d0] ss:$40 sps:$4 sm:$0xff]   ;;  %v9020_v41 = vld [vmem:[#allocation5 + $0x324] ss:$40 sps:$4 sm:$0xff]  }
  0xe9   : > { %5296 = vmatpush1.bf16.msra.mxu1 %v8982_v14  ;;  %v10794_v42 = vshrl.u32 %v395_v37, 7  ;;  %v9022_v43 = vld [vmem:[#allocation5 + $0x824] ss:$40 sps:$4 sm:$0xff]   ;;  %v9024_v44 = vld [vmem:[#allocation5 + $0x320] ss:$40 sps:$4 sm:$0xff]   ;;  %v10801_v51 = vld [vmem:[%s10775_s21] sm:$0xff] }
  0xea   : > { %5337 = vmatpush1.bf16.msra.mxu0 %v8983_v15  ;;  %5297 = vmatprep.subr.bf16.mxu1 %v8984_v16  ;;  %v9025_v45 = vld [vmem:[#allocation5 + $0x820] ss:$40 sps:$4 sm:$0xff]   ;;  %v9026_v46 = vld [vmem:[#allocation5 + $0x374] ss:$40 sps:$4 sm:$0xff]   ;;  %v9030_v50 = vld [vmem:[#allocation5 + $0x370] ss:$40 sps:$4 sm:$0xff]   ;;  %v406_v52 = vunpack.c.h.bf16 %v10801_v51  ;;  %v405_v12 = vunpack.c.l.bf16 %v10801_v51 }
  0xeb   : > { %5338 = vmatprep.subr.bf16.mxu0 %v8986_v17  ;;  %v10797_v47 = vsub.s32 1, %v10794_v42  ;;  %v433_v48 = vsub.s32 3, %v10794_v42  ;;  %v9028_v49 = vld [vmem:[#allocation5 + $0x874] ss:$40 sps:$4 sm:$0xff]   ;;  %v10804_v53 = vld [vmem:[#allocation7] sm:$0xff]  ;;  %v10826_v6 = vsub.s32 0, %v10794_v42 }
  0xec   : > { %v10807_v54 = vld [vmem:[%s10775_s21 + $0x8] sm:$0xff]  ;;  %v429_v7 = vsub.s32 2, %v10794_v42  ;;  %vm6898_vm0 = vcmask 64512   ;;  %s8829_s8 = smul.u32 10, %s10771_s2  ;;  %vm11001_vm1 = vcmp.lt.s32.totalorder %v395_v37, 256  ;;  %s11132_s14 = sld [smem:[#allocation22_spill]] }
  0xed   : > { %5298 = vmatpush1.bf16.msra.mxu1 %v8988_v18  ;;  %v9031_v55 = vld [vmem:[#allocation5 + $0x870] ss:$40 sps:$4 sm:$0xff]   ;;  %v9032_v56 = vld [vmem:[#allocation5 + $0x3c4] ss:$40 sps:$4 sm:$0xff]   ;;  %v426_v57 = vrot.slane %v10804_v53, %v10797_v47  ;;  %v408_v58 = vunpack.c.h.bf16 %v10807_v54  ;;  %v434_v59 = vrot.slane %v10804_v53, %v433_v48  ;;  %v9036_v63 = vld [vmem:[#allocation5 + $0x3c0] ss:$40 sps:$4 sm:$0xff]   ;;  %v422_v13 = vrot.slane %v10804_v53, %v10826_v6 }
  0xee   : > { %5339 = vmatpush1.bf16.msra.mxu0 %v8989_v19  ;;  %5299 = vmatprep.subr.bf16.mxu1 %v8990_v20  ;;  %v9034_v60 = vld [vmem:[#allocation5 + $0x8c4] ss:$40 sps:$4 sm:$0xff]   ;;  %v9037_v0 = vld [vmem:[#allocation5 + $0x8c0] ss:$40 sps:$4 sm:$0xff]   ;;  %v9038_v1 = vld [vmem:[#allocation5 + $0x414] ss:$40 sps:$4 sm:$0xff]   ;;  %v407_v14 = vunpack.c.l.bf16 %v10807_v54  ;;  %v430_v15 = vrot.slane %v10804_v53, %v429_v7 }
  0xef   : > { %5340 = vmatprep.subr.bf16.mxu0 %v8992_v21  ;;  %v470_v61 = vmul.f32 %v426_v57, %v406_v52  ;;  %v472_v62 = vmul.f32 %v434_v59, %v408_v58  ;;  %v9040_v4 = vld [vmem:[#allocation5 + $0x914] ss:$40 sps:$4 sm:$0xff]   ;;  %v9042_v5 = vld [vmem:[#allocation5 + $0x410] ss:$40 sps:$4 sm:$0xff]   ;;  %v9044_v9 = vld [vmem:[#allocation5 + $0x464] ss:$40 sps:$4 sm:$0xff]   ;;  %v469_v20 = vmul.f32 %v422_v13, %v405_v12 }
  0xf0   : > { %v9043_v8 = vld [vmem:[#allocation5 + $0x910] ss:$40 sps:$4 sm:$0xff]   ;;  %v9046_v10 = vld [vmem:[#allocation5 + $0x964] ss:$40 sps:$4 sm:$0xff]   ;;  %v9048_v11 = vld [vmem:[#allocation5 + $0x460] ss:$40 sps:$4 sm:$0xff]   ;;  %v471_v21 = vmul.f32 %v430_v15, %v407_v14 }
  0xf1   : > { %5300 = vmatpush1.bf16.msra.mxu1 %v8994_v22  ;;  %v10819_v2 = vpack.c.bf16 %v470_v61, %v470_v61  ;;  %v10821_v3 = vpack.c.bf16 %v472_v62, %v472_v62  ;;  %v9049_v16 = vld [vmem:[#allocation5 + $0x960] ss:$40 sps:$4 sm:$0xff]   ;;  %v9050_v17 = vld [vmem:[#allocation5 + $0x4b4] ss:$40 sps:$4 sm:$0xff]   ;;  %v9054_v19 = vld [vmem:[#allocation5 + $0x4b0] ss:$40 sps:$4 sm:$0xff]  }
  0xf2   : > { %5341 = vmatpush1.bf16.msra.mxu0 %v8995_v23  ;;  %5301 = vmatprep.subr.bf16.mxu1 %v8996_v24  ;;  %v9052_v18 = vld [vmem:[#allocation5 + $0x9b4] ss:$40 sps:$4 sm:$0xff]   ;;  %v9055_v22 = vld [vmem:[#allocation5 + $0x9b0] ss:$40 sps:$4 sm:$0xff]   ;;  %v9058_v23 = vld [vmem:[#allocation5 + $0xa04] ss:$40 sps:$4 sm:$0xff]  }
  0xf3   : > { %5342 = vmatprep.subr.bf16.mxu0 %v8998_v25  ;;  %5321 = vmatprep.mubr.bf16.mxu1 %v10819_v2  ;;  %v9061_v24 = vld [vmem:[#allocation5 + $0xc] ss:$40 sps:$4 sm:$0xff]   ;;  %v10840_v25 = vpack.c.bf16 %v469_v20, %v469_v20  ;;  %v9089_v57 = vld [vmem:[#allocation5 + $0x198] ss:$40 sps:$4 sm:$0xff]   ;;  %s11005_s9 = scalar_lea.vmem [#allocation14], %s8829_s8  ;;  %s8830_s30 = smul.u32 160, %s10445_s27 }
  0xf4   : > { %5362 = vmatprep.mubr.bf16.mxu0 %v10821_v3  ;;  %v9094_v59 = vld [vmem:[#allocation5 + $0xbe4] ss:$40 sps:$4 sm:$0xff]   ;;  %v9110_v20 = vld [vmem:[#allocation5 + $0xcd0] ss:$40 sps:$4 sm:$0xff]   ;;  %v10070_v54 = vld [vmem:[#allocation5 + $0xfc0] ss:$40 sps:$4 sm:$0xff]  }
  0xf5   : > { %5302 = vmatpush1.bf16.msra.mxu1 %v9000_v26  ;;  %v9056_v26 = vld [vmem:[#allocation5 + $0xa00] ss:$40 sps:$4 sm:$0xff]   ;;  %v9106_v13 = vld [vmem:[#allocation5 + $0xc84] ss:$40 sps:$4 sm:$0xff]   ;;  %s7449_s15 = sshll.u32 %s11005_s9, 4  ;;  %s11046_s10 = scalar_lea.hbm %s11132_s14, %s8830_s30  ;;  %s11048_s15 = int_to_ptr.vmem [resolvable:$true] %s7449_s15 }
  0xf6   : > { %5343 = vmatpush1.bf16.msra.mxu0 %v9001_v27  ;;  %5303 = vmatprep.subr.bf16.mxu1 %v9002_v28  ;;  %v10842_v27 = vpack.c.bf16 %v471_v21, %v471_v21  ;;  %v9059_v28 = vld [vmem:[#allocation5 + $0x8] ss:$40 sps:$4 sm:$0xff]   ;;  %v9109_v15 = vld [vmem:[#allocation5 + $0x28c] ss:$40 sps:$4 sm:$0xff]   ;;  %v9113_v21 = vld [vmem:[#allocation5 + $0x2d8] ss:$40 sps:$4 sm:$0xff]  }
  0xf7   : > { %5344 = vmatprep.subr.bf16.mxu0 %v9004_v29  ;;  %v9064_v29 = vld [vmem:[#allocation5 + $0xa54] ss:$40 sps:$4 sm:$0xff]   ;;  %v10852_v62 = vld [vmem:[%s10775_s21 + $0x10] sm:$0xff]  ;;  %s7435_s20 = scalar_lea.sflag [#allocation4], %s10771_s2  ;;  %s10359_s23 = scalar_lea.vmem %s11048_s15, 160 }
  0xf8   : > { %p10360_p2 = scmp.ne.s32.totalorder %s11048_s15, %s10359_s23  ;;  %p11133_p9 = scmp.ne.s32.totalorder %s11125_s17, 0 }
  0xf9   : > { %5304 = vmatpush1.bf16.msra.mxu1 %v9006_v30  ;;  %v9067_v30 = vld [vmem:[#allocation5 + $0x5c] ss:$40 sps:$4 sm:$0xff]   ;;  %s10468_s27 = smov [#allocation14]  }
  0xfa   : > { %5345 = vmatpush1.bf16.msra.mxu0 %v9007_v31  ;;  %5305 = vmatprep.subr.bf16.mxu1 %v9008_v32  ;;  %v9062_v31 = vld [vmem:[#allocation5 + $0xa50] ss:$40 sps:$4 sm:$0xff]   ;;  %p10361_p10 = pnand %p10360_p2, %p11133_p9  ;;  %s10363_s12 = sshll.u32 %s10468_s27, 4  ;;  %s10364_s12 = int_to_ptr.vmem [resolvable:$false] %s10363_s12 }
  0xfb   : > { %5346 = vmatprep.subr.bf16.mxu0 %v9010_v33  ;;  %v9065_v32 = vld [vmem:[#allocation5 + $0x58] ss:$40 sps:$4 sm:$0xff]   ;;  %v9070_v33 = vld [vmem:[#allocation5 + $0xaa4] ss:$40 sps:$4 sm:$0xff]   ;;  %s10365_s1 = scalar_lea.vmem %s10364_s12, 320  ;;  %p10366_p0 = scmp.lt.s32.totalorder %s11048_s15, %s10364_s12 }
  0xfc   : > { %p10362_p1 = pneg %p10361_p10  ;;  %p10367_p7 = scmp.lt.s32.totalorder %s10365_s1, %s10359_s23 }
  0xfd   : > { %5306 = vmatpush1.bf16.msra.mxu1 %v9012_v34  ;;  %v9073_v34 = vld [vmem:[#allocation5 + $0xac] ss:$40 sps:$4 sm:$0xff]  }
  0xfe   : > { %5347 = vmatpush1.bf16.msra.mxu0 %v9013_v35  ;;  %5307 = vmatprep.subr.bf16.mxu1 %v9014_v36  ;;  %v9068_v35 = vld [vmem:[#allocation5 + $0xaa0] ss:$40 sps:$4 sm:$0xff]   ;;  %p10368_p5 = por %p10367_p7, %p10366_p0 }
  0xff   : > { %5348 = vmatprep.subr.bf16.mxu0 %v9016_v38  ;;  %v9071_v36 = vld [vmem:[#allocation5 + $0xa8] ss:$40 sps:$4 sm:$0xff]   ;;  %v9076_v38 = vld [vmem:[#allocation5 + $0xaf4] ss:$40 sps:$4 sm:$0xff]  }
 0x100   : > { %p10369_p8 = pnand %p10368_p5, %p10362_p1 }
 0x101   : > { %5308 = vmatpush1.bf16.msra.mxu1 %v9018_v39  ;;  %v9079_v39 = vld [vmem:[#allocation5 + $0xfc] ss:$40 sps:$4 sm:$0xff]  }
 0x102   : > { %5349 = vmatpush1.bf16.msra.mxu0 %v9019_v40  ;;  %5309 = vmatprep.subr.bf16.mxu1 %v9020_v41  ;;  %v9074_v40 = vld [vmem:[#allocation5 + $0xaf0] ss:$40 sps:$4 sm:$0xff]  }
 0x103   : > { %5350 = vmatprep.subr.bf16.mxu0 %v9022_v43  ;;  %v9077_v41 = vld [vmem:[#allocation5 + $0xf8] ss:$40 sps:$4 sm:$0xff]   ;;  %v9082_v43 = vld [vmem:[#allocation5 + $0xb44] ss:$40 sps:$4 sm:$0xff]  }
 0x105   : > { %5310 = vmatpush1.bf16.msra.mxu1 %v9024_v44  ;;  %v9085_v44 = vld [vmem:[#allocation5 + $0x14c] ss:$40 sps:$4 sm:$0xff]  }
 0x106   : > { %5351 = vmatpush1.bf16.msra.mxu0 %v9025_v45  ;;  %5311 = vmatprep.subr.bf16.mxu1 %v9026_v46  ;;  %v9080_v45 = vld [vmem:[#allocation5 + $0xb40] ss:$40 sps:$4 sm:$0xff]  }
 0x107   : > { %5352 = vmatprep.subr.bf16.mxu0 %v9028_v49  ;;  %v9083_v46 = vld [vmem:[#allocation5 + $0x148] ss:$40 sps:$4 sm:$0xff]   ;;  %v9088_v49 = vld [vmem:[#allocation5 + $0xb94] ss:$40 sps:$4 sm:$0xff]  }
 0x109   : > { %5312 = vmatpush1.bf16.msra.mxu1 %v9030_v50  ;;  %v9091_v50 = vld [vmem:[#allocation5 + $0x19c] ss:$40 sps:$4 sm:$0xff]  }
 0x10a   : > { %5353 = vmatpush1.bf16.msra.mxu0 %v9031_v55  ;;  %5313 = vmatprep.subr.bf16.mxu1 %v9032_v56  ;;  %v441_v55 = vsub.s32 5, %v10794_v42  ;;  %v9086_v56 = vld [vmem:[#allocation5 + $0xb90] ss:$40 sps:$4 sm:$0xff]  }
 0x10b   : > { %5354 = vmatprep.subr.bf16.mxu0 %v9034_v60  ;;  %v9097_v60 = vld [vmem:[#allocation5 + $0x1ec] ss:$40 sps:$4 sm:$0xff]  }
 0x10c   : > { %v442_v61 = vrot.slane %v10804_v53, %v441_v55 }
 0x10d   : > { %5314 = vmatpush1.bf16.msra.mxu1 %v9036_v63  ;;  %v9092_v63 = vld [vmem:[#allocation5 + $0xbe0] ss:$40 sps:$4 sm:$0xff]  }
 0x10e   : > { %5355 = vmatpush1.bf16.msra.mxu0 %v9037_v0  ;;  %5315 = vmatprep.subr.bf16.mxu1 %v9038_v1  ;;  %v9095_v0 = vld [vmem:[#allocation5 + $0x1e8] ss:$40 sps:$4 sm:$0xff]   ;;  %v410_v1 = vunpack.c.h.bf16 %v10852_v62 }
 0x10f   : > { %5356 = vmatprep.subr.bf16.mxu0 %v9040_v4  ;;  %v9100_v4 = vld [vmem:[#allocation5 + $0xc34] ss:$40 sps:$4 sm:$0xff]  }
 0x111   : > { %5316 = vmatpush1.bf16.msra.mxu1 %v9042_v5  ;;  %v9103_v5 = vld [vmem:[#allocation5 + $0x23c] ss:$40 sps:$4 sm:$0xff]  }
 0x112   : > { %5357 = vmatpush1.bf16.msra.mxu0 %v9043_v8  ;;  %5317 = vmatprep.subr.bf16.mxu1 %v9044_v9  ;;  %v474_v8 = vmul.f32 %v442_v61, %v410_v1  ;;  %v9098_v9 = vld [vmem:[#allocation5 + $0xc30] ss:$40 sps:$4 sm:$0xff]  }
 0x113   : > { %5358 = vmatprep.subr.bf16.mxu0 %v9046_v10  ;;  %v9101_v10 = vld [vmem:[#allocation5 + $0x238] ss:$40 sps:$4 sm:$0xff]  }
 0x115   : > { %5318 = vmatpush1.bf16.msra.mxu1 %v9048_v11  ;;  %v10857_v11 = vpack.c.bf16 %v474_v8, %v474_v8  ;;  %v9155_v8 = vld [vmem:[#allocation5 + $0x508] ss:$40 sps:$4 sm:$0xff]  }
 0x116   : > { %5359 = vmatpush1.bf16.msra.mxu0 %v9049_v16  ;;  %5319 = vmatprep.subr.bf16.mxu1 %v9050_v17  ;;  %v9104_v16 = vld [vmem:[#allocation5 + $0xc80] ss:$40 sps:$4 sm:$0xff]  }
 0x117   : > { %5360 = vmatprep.subr.bf16.mxu0 %v9052_v18  ;;  %v9107_v17 = vld [vmem:[#allocation5 + $0x288] ss:$40 sps:$4 sm:$0xff]   ;;  %v9112_v18 = vld [vmem:[#allocation5 + $0xcd4] ss:$40 sps:$4 sm:$0xff]  }
 0x119   : > { %5320 = vmatpush1.bf16.msra.mxu1 %v9054_v19  ;;  %v9115_v19 = vld [vmem:[#allocation5 + $0x2dc] ss:$40 sps:$4 sm:$0xff]  }
 0x11a   : > { %5361 = vmatpush1.bf16.msra.mxu0 %v9055_v22  ;;  %5494 = vmatprep.subr.bf16.mxu1 %v9061_v24  ;;  %v9118_v22 = vld [vmem:[#allocation5 + $0xd24] ss:$40 sps:$4 sm:$0xff]   ;;  %v9116_v24 = vld [vmem:[#allocation5 + $0xd20] ss:$40 sps:$4 sm:$0xff]  }
 0x11b   : > { %5371 = vmatprep.subr.bf16.mxu0 %v9058_v23  ;;  %v9121_v23 = vld [vmem:[#allocation5 + $0x32c] ss:$40 sps:$4 sm:$0xff]  }
 0x11c   : > { %5322 = vmatmul.mubr.bf16.vlgmr.msra.gmra.mrb[0].mxu1 %v10840_v25 }
 0x11d   : > { %5363 = vmatmul.mubr.bf16.vlgmr.msra.gmra.mrb[0].mxu0 %v10842_v27  ;;  %5495 = vmatpush1.bf16.msra.mxu1 %v9059_v28  ;;  %v9124_v28 = vld [vmem:[#allocation5 + $0xd74] ss:$40 sps:$4 sm:$0xff]  }
 0x11e   : > { %5372 = vmatpush1.bf16.msra.mxu0 %v9056_v26  ;;  %5496 = vmatprep.subr.bf16.mxu1 %v9067_v30  ;;  %v9119_v26 = vld [vmem:[#allocation5 + $0x328] ss:$40 sps:$4 sm:$0xff]  }
 0x11f   : > { %5373 = vmatprep.subr.bf16.mxu0 %v9064_v29  ;;  %5526 = vmatprep.mubr.bf16.mxu1 %v10819_v2  ;;  %v9127_v29 = vld [vmem:[#allocation5 + $0x37c] ss:$40 sps:$4 sm:$0xff]   ;;  %v9122_v30 = vld [vmem:[#allocation5 + $0xd70] ss:$40 sps:$4 sm:$0xff]  }
 0x120   : > { %5403 = vmatprep.mubr.bf16.mxu0 %v10857_v11 }
 0x121   : > { %5497 = vmatpush1.bf16.msra.mxu1 %v9065_v32  ;;  %v9130_v32 = vld [vmem:[#allocation5 + $0xdc4] ss:$40 sps:$4 sm:$0xff]  }
 0x122   : > { %5374 = vmatpush1.bf16.msra.mxu0 %v9062_v31  ;;  %5498 = vmatprep.subr.bf16.mxu1 %v9073_v34  ;;  %v9125_v31 = vld [vmem:[#allocation5 + $0x378] ss:$40 sps:$4 sm:$0xff]  }
 0x123   : > { %5375 = vmatprep.subr.bf16.mxu0 %v9070_v33  ;;  %v9133_v33 = vld [vmem:[#allocation5 + $0x3cc] ss:$40 sps:$4 sm:$0xff]   ;;  %v9128_v34 = vld [vmem:[#allocation5 + $0xdc0] ss:$40 sps:$4 sm:$0xff]  }
 0x125   : > { %5499 = vmatpush1.bf16.msra.mxu1 %v9071_v36  ;;  %v9136_v36 = vld [vmem:[#allocation5 + $0xe14] ss:$40 sps:$4 sm:$0xff]  }
 0x126   : > { %5376 = vmatpush1.bf16.msra.mxu0 %v9068_v35  ;;  %5500 = vmatprep.subr.bf16.mxu1 %v9079_v39  ;;  %v9131_v35 = vld [vmem:[#allocation5 + $0x3c8] ss:$40 sps:$4 sm:$0xff]  }
 0x127   : > { %5377 = vmatprep.subr.bf16.mxu0 %v9076_v38  ;;  %v9139_v38 = vld [vmem:[#allocation5 + $0x41c] ss:$40 sps:$4 sm:$0xff]   ;;  %v9134_v39 = vld [vmem:[#allocation5 + $0xe10] ss:$40 sps:$4 sm:$0xff]  }
 0x129   : > { %5501 = vmatpush1.bf16.msra.mxu1 %v9077_v41  ;;  %v437_v41 = vsub.s32 4, %v10794_v42 }
 0x12a   : > { %5378 = vmatpush1.bf16.msra.mxu0 %v9074_v40  ;;  %5502 = vmatprep.subr.bf16.mxu1 %v9085_v44  ;;  %v9137_v40 = vld [vmem:[#allocation5 + $0x418] ss:$40 sps:$4 sm:$0xff]   ;;  %v9145_v44 = vld [vmem:[#allocation5 + $0x46c] ss:$40 sps:$4 sm:$0xff]  }
 0x12b   : > { %5379 = vmatprep.subr.bf16.mxu0 %v9082_v43  ;;  %v9142_v43 = vld [vmem:[#allocation5 + $0xe64] ss:$40 sps:$4 sm:$0xff]  }
 0x12d   : > { %5503 = vmatpush1.bf16.msra.mxu1 %v9083_v46  ;;  %v9143_v46 = vld [vmem:[#allocation5 + $0x468] ss:$40 sps:$4 sm:$0xff]  }
 0x12e   : > { %5380 = vmatpush1.bf16.msra.mxu0 %v9080_v45  ;;  %5504 = vmatprep.subr.bf16.mxu1 %v9091_v50  ;;  %v9140_v45 = vld [vmem:[#allocation5 + $0xe60] ss:$40 sps:$4 sm:$0xff]   ;;  %v438_v50 = vrot.slane %v10804_v53, %v437_v41 }
 0x12f   : > { %5381 = vmatprep.subr.bf16.mxu0 %v9088_v49  ;;  %v409_v49 = vunpack.c.l.bf16 %v10852_v62 }
 0x131   : > { %5505 = vmatpush1.bf16.msra.mxu1 %v9089_v57  ;;  %v9151_v57 = vld [vmem:[#allocation5 + $0x4bc] ss:$40 sps:$4 sm:$0xff]   ;;  %v473_v61 = vmul.f32 %v438_v50, %v409_v49 }
 0x132   : > { %5382 = vmatpush1.bf16.msra.mxu0 %v9086_v56  ;;  %5506 = vmatprep.subr.bf16.mxu1 %v9097_v60  ;;  %v9148_v56 = vld [vmem:[#allocation5 + $0xeb4] ss:$40 sps:$4 sm:$0xff]   ;;  %v9149_v60 = vld [vmem:[#allocation5 + $0x4b8] ss:$40 sps:$4 sm:$0xff]  }
 0x133   : > { %5383 = vmatprep.subr.bf16.mxu0 %v9094_v59  ;;  %v9146_v59 = vld [vmem:[#allocation5 + $0xeb0] ss:$40 sps:$4 sm:$0xff]   ;;  %v9199_v50 = vld [vmem:[#allocation5 + $0x73c] ss:$40 sps:$4 sm:$0xff]  }
 0x135   : > { %5507 = vmatpush1.bf16.msra.mxu1 %v9095_v0  ;;  %v449_v0 = vsub.s32 7, %v10794_v42 }
 0x136   : > { %5384 = vmatpush1.bf16.msra.mxu0 %v9092_v63  ;;  %5508 = vmatprep.subr.bf16.mxu1 %v9103_v5  ;;  %v9154_v63 = vld [vmem:[#allocation5 + $0xf04] ss:$40 sps:$4 sm:$0xff]   ;;  %v9152_v5 = vld [vmem:[#allocation5 + $0xf00] ss:$40 sps:$4 sm:$0xff]  }
 0x137   : > { %5385 = vmatprep.subr.bf16.mxu0 %v9100_v4  ;;  %v9157_v4 = vld [vmem:[#allocation5 + $0x50c] ss:$40 sps:$4 sm:$0xff]  }
 0x139   : > { %5509 = vmatpush1.bf16.msra.mxu1 %v9101_v10  ;;  %v9160_v10 = vld [vmem:[#allocation5 + $0xf54] ss:$40 sps:$4 sm:$0xff]  }
 0x13a   : > { %5386 = vmatpush1.bf16.msra.mxu0 %v9098_v9  ;;  %5510 = vmatprep.subr.bf16.mxu1 %v9109_v15  ;;  %v10868_v9 = vpack.c.bf16 %v473_v61, %v473_v61  ;;  %v9163_v15 = vld [vmem:[#allocation5 + $0x55c] ss:$40 sps:$4 sm:$0xff]   ;;  %v9200_v61 = vld [vmem:[#allocation5 + $0x1180] ss:$40 sps:$4 sm:$0xff]  }
 0x13b   : > { %5387 = vmatprep.subr.bf16.mxu0 %v9106_v13  ;;  %v450_v13 = vrot.slane %v10804_v53, %v449_v0  ;;  %v9166_v53 = vld [vmem:[#allocation5 + $0xfa4] ss:$40 sps:$4 sm:$0xff]  }
 0x13d   : > { %5511 = vmatpush1.bf16.msra.mxu1 %v9107_v17 }
 0x13e   : > { %5388 = vmatpush1.bf16.msra.mxu0 %v9104_v16  ;;  %5512 = vmatprep.subr.bf16.mxu1 %v9115_v19  ;;  %v10874_v16 = vld [vmem:[%s10775_s21 + $0x18] sm:$0xff]  ;;  %v9161_v19 = vld [vmem:[#allocation5 + $0x558] ss:$40 sps:$4 sm:$0xff]  }
 0x13f   : > { %5389 = vmatprep.subr.bf16.mxu0 %v9112_v18  ;;  %v412_v17 = vunpack.c.h.bf16 %v10874_v16  ;;  %v9158_v18 = vld [vmem:[#allocation5 + $0xf50] ss:$40 sps:$4 sm:$0xff]  }
 0x141   : > { %5513 = vmatpush1.bf16.msra.mxu1 %v9113_v21  ;;  %v9169_v21 = vld [vmem:[#allocation5 + $0x5ac] ss:$40 sps:$4 sm:$0xff]  }
 0x142   : > { %5390 = vmatpush1.bf16.msra.mxu0 %v9110_v20  ;;  %5514 = vmatprep.subr.bf16.mxu1 %v9121_v23  ;;  %v476_v20 = vmul.f32 %v450_v13, %v412_v17  ;;  %v9164_v23 = vld [vmem:[#allocation5 + $0xfa0] ss:$40 sps:$4 sm:$0xff]   ;;  %v9214_v13 = vld [vmem:[#allocation5 + $0x1224] ss:$40 sps:$4 sm:$0xff]  }
 0x143   : > { %5391 = vmatprep.subr.bf16.mxu0 %v9118_v22 }
 0x144   : > { %v10881_v22 = vpack.c.bf16 %v476_v20, %v476_v20  ;;  %v9220_v20 = vld [vmem:[#allocation5 + $0x1274] ss:$40 sps:$4 sm:$0xff]  }
 0x145   : > { %5515 = vmatpush1.bf16.msra.mxu1 %v9119_v26  ;;  %v9172_v26 = vld [vmem:[#allocation5 + $0xff4] ss:$40 sps:$4 sm:$0xff]  }
 0x146   : > { %5392 = vmatpush1.bf16.msra.mxu0 %v9116_v24  ;;  %5516 = vmatprep.subr.bf16.mxu1 %v9127_v29  ;;  %v9167_v24 = vld [vmem:[#allocation5 + $0x5a8] ss:$40 sps:$4 sm:$0xff]  }
 0x147   : > { %5393 = vmatprep.subr.bf16.mxu0 %v9124_v28  ;;  %v9175_v28 = vld [vmem:[#allocation5 + $0x5fc] ss:$40 sps:$4 sm:$0xff]   ;;  %v9170_v29 = vld [vmem:[#allocation5 + $0xff0] ss:$40 sps:$4 sm:$0xff]  }
 0x149   : > { %5517 = vmatpush1.bf16.msra.mxu1 %v9125_v31  ;;  %v9178_v31 = vld [vmem:[#allocation5 + $0x1044] ss:$40 sps:$4 sm:$0xff]  }
 0x14a   : > { %5394 = vmatpush1.bf16.msra.mxu0 %v9122_v30  ;;  %5518 = vmatprep.subr.bf16.mxu1 %v9133_v33  ;;  %v9173_v30 = vld [vmem:[#allocation5 + $0x5f8] ss:$40 sps:$4 sm:$0xff]  }
 0x14b   : > { %5395 = vmatprep.subr.bf16.mxu0 %v9130_v32  ;;  %v9181_v32 = vld [vmem:[#allocation5 + $0x64c] ss:$40 sps:$4 sm:$0xff]   ;;  %v9176_v33 = vld [vmem:[#allocation5 + $0x1040] ss:$40 sps:$4 sm:$0xff]  }
 0x14d   : > { %5519 = vmatpush1.bf16.msra.mxu1 %v9131_v35  ;;  %v9184_v35 = vld [vmem:[#allocation5 + $0x1094] ss:$40 sps:$4 sm:$0xff]  }
 0x14e   : > { %5396 = vmatpush1.bf16.msra.mxu0 %v9128_v34  ;;  %5520 = vmatprep.subr.bf16.mxu1 %v9139_v38  ;;  %v9179_v34 = vld [vmem:[#allocation5 + $0x648] ss:$40 sps:$4 sm:$0xff]  }
 0x14f   : > { %5397 = vmatprep.subr.bf16.mxu0 %v9136_v36  ;;  %v9187_v36 = vld [vmem:[#allocation5 + $0x69c] ss:$40 sps:$4 sm:$0xff]   ;;  %v9182_v38 = vld [vmem:[#allocation5 + $0x1090] ss:$40 sps:$4 sm:$0xff]  }
 0x151   : > { %5521 = vmatpush1.bf16.msra.mxu1 %v9137_v40  ;;  %v9190_v40 = vld [vmem:[#allocation5 + $0x10e4] ss:$40 sps:$4 sm:$0xff]  }
 0x152   : > { %5398 = vmatpush1.bf16.msra.mxu0 %v9134_v39  ;;  %5522 = vmatprep.subr.bf16.mxu1 %v9145_v44  ;;  %v9185_v39 = vld [vmem:[#allocation5 + $0x698] ss:$40 sps:$4 sm:$0xff]  }
 0x153   : > { %5399 = vmatprep.subr.bf16.mxu0 %v9142_v43  ;;  %v9193_v43 = vld [vmem:[#allocation5 + $0x6ec] ss:$40 sps:$4 sm:$0xff]   ;;  %v9188_v44 = vld [vmem:[#allocation5 + $0x10e0] ss:$40 sps:$4 sm:$0xff]  }
 0x155   : > { %5523 = vmatpush1.bf16.msra.mxu1 %v9143_v46  ;;  %v9196_v46 = vld [vmem:[#allocation5 + $0x1134] ss:$40 sps:$4 sm:$0xff]  }
 0x156   : > { %5400 = vmatpush1.bf16.msra.mxu0 %v9140_v45  ;;  %5524 = vmatprep.subr.bf16.mxu1 %v9151_v57  ;;  %v9191_v45 = vld [vmem:[#allocation5 + $0x6e8] ss:$40 sps:$4 sm:$0xff]   ;;  %v9197_v57 = vld [vmem:[#allocation5 + $0x738] ss:$40 sps:$4 sm:$0xff]  }
 0x157   : > { %5401 = vmatprep.subr.bf16.mxu0 %v9148_v56  ;;  %v9194_v56 = vld [vmem:[#allocation5 + $0x1130] ss:$40 sps:$4 sm:$0xff]  }
 0x159   : > { %5525 = vmatpush1.bf16.msra.mxu1 %v9149_v60  ;;  %v9205_v60 = vld [vmem:[#allocation5 + $0x78c] ss:$40 sps:$4 sm:$0xff]  }
 0x15a   : > { %5402 = vmatpush1.bf16.msra.mxu0 %v9146_v59  ;;  %5535 = vmatprep.subr.bf16.mxu1 %v9157_v4  ;;  %v9202_v59 = vld [vmem:[#allocation5 + $0x1184] ss:$40 sps:$4 sm:$0xff]   ;;  %v9208_v4 = vld [vmem:[#allocation5 + $0x11d4] ss:$40 sps:$4 sm:$0xff]  }
 0x15b   : > { %5412 = vmatprep.subr.bf16.mxu0 %v9154_v63  ;;  %v9203_v63 = vld [vmem:[#allocation5 + $0x788] ss:$40 sps:$4 sm:$0xff]  }
 0x15c   : > { %5527 = vmatmul.mubr.bf16.vlgmr.msra.gmra.mrb[4].mxu1 %v10840_v25 }
 0x15d   : > { %5404 = vmatmul.mubr.bf16.vlgmr.msra.gmra.mrb[0].mxu0 %v10868_v9  ;;  %5536 = vmatpush1.bf16.msra.mxu1 %v9155_v8  ;;  %v9206_v8 = vld [vmem:[#allocation5 + $0x11d0] ss:$40 sps:$4 sm:$0xff]  }
 0x15e   : > { %5413 = vmatpush1.bf16.msra.mxu0 %v9152_v5  ;;  %5537 = vmatprep.subr.bf16.mxu1 %v9163_v15  ;;  %v9211_v5 = vld [vmem:[#allocation5 + $0x7dc] ss:$40 sps:$4 sm:$0xff]   ;;  %v9217_v15 = vld [vmem:[#allocation5 + $0x82c] ss:$40 sps:$4 sm:$0xff]  }
 0x15f   : > { %5414 = vmatprep.subr.bf16.mxu0 %v9160_v10  ;;  %5567 = vmatprep.mubr.bf16.mxu1 %v10821_v3  ;;  %v9209_v10 = vld [vmem:[#allocation5 + $0x7d8] ss:$40 sps:$4 sm:$0xff]  }
 0x160   : > { %5444 = vmatprep.mubr.bf16.mxu0 %v10881_v22 }
 0x161   : > { %5538 = vmatpush1.bf16.msra.mxu1 %v9161_v19  ;;  %v9215_v19 = vld [vmem:[#allocation5 + $0x828] ss:$40 sps:$4 sm:$0xff]  }
 0x162   : > { %5415 = vmatpush1.bf16.msra.mxu0 %v9158_v18  ;;  %5539 = vmatprep.subr.bf16.mxu1 %v9169_v21  ;;  %v9212_v18 = vld [vmem:[#allocation5 + $0x1220] ss:$40 sps:$4 sm:$0xff]   ;;  %v9218_v21 = vld [vmem:[#allocation5 + $0x1270] ss:$40 sps:$4 sm:$0xff]  }
 0x163   : > { %5416 = vmatprep.subr.bf16.mxu0 %v9166_v53  ;;  %v9223_v53 = vld [vmem:[#allocation5 + $0x87c] ss:$40 sps:$4 sm:$0xff]  }
 0x165   : > { %5540 = vmatpush1.bf16.msra.mxu1 %v9167_v24  ;;  %v9226_v24 = vld [vmem:[#allocation5 + $0x12c4] ss:$40 sps:$4 sm:$0xff]  }
 0x166   : > { %5417 = vmatpush1.bf16.msra.mxu0 %v9164_v23  ;;  %5541 = vmatprep.subr.bf16.mxu1 %v9175_v28  ;;  %v9221_v23 = vld [vmem:[#allocation5 + $0x878] ss:$40 sps:$4 sm:$0xff]  }
 0x167   : > { %5418 = vmatprep.subr.bf16.mxu0 %v9172_v26  ;;  %v9229_v26 = vld [vmem:[#allocation5 + $0x8cc] ss:$40 sps:$4 sm:$0xff]   ;;  %v9224_v28 = vld [vmem:[#allocation5 + $0x12c0] ss:$40 sps:$4 sm:$0xff]  }
 0x169   : > { %5542 = vmatpush1.bf16.msra.mxu1 %v9173_v30  ;;  %v9232_v30 = vld [vmem:[#allocation5 + $0x1314] ss:$40 sps:$4 sm:$0xff]  }
 0x16a   : > { %5419 = vmatpush1.bf16.msra.mxu0 %v9170_v29  ;;  %5543 = vmatprep.subr.bf16.mxu1 %v9181_v32  ;;  %v9227_v29 = vld [vmem:[#allocation5 + $0x8c8] ss:$40 sps:$4 sm:$0xff]  }
 0x16b   : > { %5420 = vmatprep.subr.bf16.mxu0 %v9178_v31  ;;  %v9235_v31 = vld [vmem:[#allocation5 + $0x91c] ss:$40 sps:$4 sm:$0xff]   ;;  %v9230_v32 = vld [vmem:[#allocation5 + $0x1310] ss:$40 sps:$4 sm:$0xff]  }
 0x16d   : > { %5544 = vmatpush1.bf16.msra.mxu1 %v9179_v34  ;;  %v9233_v34 = vld [vmem:[#allocation5 + $0x918] ss:$40 sps:$4 sm:$0xff]  }
 0x16e   : > { %5421 = vmatpush1.bf16.msra.mxu0 %v9176_v33  ;;  %5545 = vmatprep.subr.bf16.mxu1 %v9187_v36  ;;  %v445_v33 = vsub.s32 6, %v10794_v42  ;;  %v9241_v36 = vld [vmem:[#allocation5 + $0x96c] ss:$40 sps:$4 sm:$0xff]  }
 0x16f   : > { %5422 = vmatprep.subr.bf16.mxu0 %v9184_v35  ;;  %v9238_v35 = vld [vmem:[#allocation5 + $0x1364] ss:$40 sps:$4 sm:$0xff]  }
 0x171   : > { %5546 = vmatpush1.bf16.msra.mxu1 %v9185_v39  ;;  %v411_v39 = vunpack.c.l.bf16 %v10874_v16  ;;  %v10118_v16 = vld [vmem:[#allocation5 + $0x14c0] ss:$40 sps:$4 sm:$0xff]  }
 0x172   : > { %5423 = vmatpush1.bf16.msra.mxu0 %v9182_v38  ;;  %5547 = vmatprep.subr.bf16.mxu1 %v9193_v43  ;;  %v9236_v38 = vld [vmem:[#allocation5 + $0x1360] ss:$40 sps:$4 sm:$0xff]  }
 0x173   : > { %5424 = vmatprep.subr.bf16.mxu0 %v9190_v40  ;;  %v10160_v40 = vld [vmem:[#allocation7] sm:$0xff] }
 0x174   : > { %v446_v43 = vrot.slane %v10160_v40, %v445_v33  ;;  %v9280_v40 = vld [vmem:[#allocation5 + $0x1594] ss:$40 sps:$4 sm:$0xff]  }
 0x175   : > { %5548 = vmatpush1.bf16.msra.mxu1 %v9191_v45  ;;  %v10892_v45 = vld [vmem:[#allocation7 + $0x8] sm:$0x3] }
 0x176   : > { %5425 = vmatpush1.bf16.msra.mxu0 %v9188_v44  ;;  %5549 = vmatprep.subr.bf16.mxu1 %v9199_v50  ;;  %v10890_v44 = vld [vmem:[%s10775_s21 + $0x20] sm:$0xff] }
 0x177   : > { %5426 = vmatprep.subr.bf16.mxu0 %v9196_v46  ;;  %v9239_v46 = vld [vmem:[#allocation5 + $0x968] ss:$40 sps:$4 sm:$0xff]   ;;  %v9244_v50 = vld [vmem:[#allocation5 + $0x13b4] ss:$40 sps:$4 sm:$0xff]  }
 0x179   : > { %5550 = vmatpush1.bf16.msra.mxu1 %v9197_v57  ;;  %v414_v57 = vunpack.c.h.bf16 %v10890_v44 }
 0x17a   : > { %5427 = vmatpush1.bf16.msra.mxu0 %v9194_v56  ;;  %5551 = vmatprep.subr.bf16.mxu1 %v9205_v60  ;;  %v9247_v56 = vld [vmem:[#allocation5 + $0x9bc] ss:$40 sps:$4 sm:$0xff]   ;;  %v9242_v60 = vld [vmem:[#allocation5 + $0x13b0] ss:$40 sps:$4 sm:$0xff]  }
 0x17b   : > { %5428 = vmatprep.subr.bf16.mxu0 %v9202_v59  ;;  %v458_v59 = vrot.slane %v10892_v45, %v10797_v47 }
 0x17d   : > { %5552 = vmatpush1.bf16.msra.mxu1 %v9203_v63  ;;  %v9245_v63 = vld [vmem:[#allocation5 + $0x9b8] ss:$40 sps:$4 sm:$0xff]  }
 0x17e   : > { %5429 = vmatpush1.bf16.msra.mxu0 %v9200_v61  ;;  %5553 = vmatprep.subr.bf16.mxu1 %v9211_v5  ;;  %v475_v61 = vmul.f32 %v446_v43, %v411_v39  ;;  %v9253_v5 = vld [vmem:[#allocation5 + $0xa0c] ss:$40 sps:$4 sm:$0xff]   ;;  %v9283_v43 = vld [vmem:[#allocation5 + $0xb9c] ss:$40 sps:$4 sm:$0xff]  }
 0x17f   : > { %5430 = vmatprep.subr.bf16.mxu0 %v9208_v4  ;;  %v9250_v4 = vld [vmem:[#allocation5 + $0x1404] ss:$40 sps:$4 sm:$0xff]  }
 0x181   : > { %5554 = vmatpush1.bf16.msra.mxu1 %v9209_v10  ;;  %v9248_v10 = vld [vmem:[#allocation5 + $0x1400] ss:$40 sps:$4 sm:$0xff]  }
 0x182   : > { %5431 = vmatpush1.bf16.msra.mxu0 %v9206_v8  ;;  %5555 = vmatprep.subr.bf16.mxu1 %v9217_v15  ;;  %v478_v8 = vmul.f32 %v458_v59, %v414_v57  ;;  %v9251_v15 = vld [vmem:[#allocation5 + $0xa08] ss:$40 sps:$4 sm:$0xff]   ;;  %v9289_v59 = vld [vmem:[#allocation5 + $0xbec] ss:$40 sps:$4 sm:$0xff]  }
 0x183   : > { %5432 = vmatprep.subr.bf16.mxu0 %v9214_v13  ;;  %v10901_v13 = vpack.c.bf16 %v475_v61, %v475_v61  ;;  %v9287_v61 = vld [vmem:[#allocation5 + $0xbe8] ss:$40 sps:$4 sm:$0xff]  }
 0x185   : > { %5556 = vmatpush1.bf16.msra.mxu1 %v9215_v19  ;;  %v9259_v19 = vld [vmem:[#allocation5 + $0xa5c] ss:$40 sps:$4 sm:$0xff]  }
 0x186   : > { %5433 = vmatpush1.bf16.msra.mxu0 %v9212_v18  ;;  %5557 = vmatprep.subr.bf16.mxu1 %v9223_v53  ;;  %v9256_v18 = vld [vmem:[#allocation5 + $0x1454] ss:$40 sps:$4 sm:$0xff]   ;;  %v9254_v53 = vld [vmem:[#allocation5 + $0x1450] ss:$40 sps:$4 sm:$0xff]  }
 0x187   : > { %5434 = vmatprep.subr.bf16.mxu0 %v9220_v20  ;;  %v10903_v20 = vpack.c.bf16 %v478_v8, %v478_v8  ;;  %v9293_v8 = vld [vmem:[#allocation5 + $0xc38] ss:$40 sps:$4 sm:$0xff]  }
 0x189   : > { %5558 = vmatpush1.bf16.msra.mxu1 %v9221_v23  ;;  %v9262_v23 = vld [vmem:[#allocation5 + $0x14a4] ss:$40 sps:$4 sm:$0xff]  }
 0x18a   : > { %5435 = vmatpush1.bf16.msra.mxu0 %v9218_v21  ;;  %5559 = vmatprep.subr.bf16.mxu1 %v9229_v26  ;;  %v9257_v21 = vld [vmem:[#allocation5 + $0xa58] ss:$40 sps:$4 sm:$0xff]  }
 0x18b   : > { %5436 = vmatprep.subr.bf16.mxu0 %v9226_v24  ;;  %v9265_v24 = vld [vmem:[#allocation5 + $0xaac] ss:$40 sps:$4 sm:$0xff]   ;;  %v9260_v26 = vld [vmem:[#allocation5 + $0x14a0] ss:$40 sps:$4 sm:$0xff]  }
 0x18d   : > { %5560 = vmatpush1.bf16.msra.mxu1 %v9227_v29  ;;  %v9268_v29 = vld [vmem:[#allocation5 + $0x14f4] ss:$40 sps:$4 sm:$0xff]  }
 0x18e   : > { %5437 = vmatpush1.bf16.msra.mxu0 %v9224_v28  ;;  %5561 = vmatprep.subr.bf16.mxu1 %v9235_v31  ;;  %v9263_v28 = vld [vmem:[#allocation5 + $0xaa8] ss:$40 sps:$4 sm:$0xff]  }
 0x18f   : > { %5438 = vmatprep.subr.bf16.mxu0 %v9232_v30  ;;  %v9271_v30 = vld [vmem:[#allocation5 + $0xafc] ss:$40 sps:$4 sm:$0xff]   ;;  %v9266_v31 = vld [vmem:[#allocation5 + $0x14f0] ss:$40 sps:$4 sm:$0xff]  }
 0x191   : > { %5562 = vmatpush1.bf16.msra.mxu1 %v9233_v34  ;;  %v9274_v34 = vld [vmem:[#allocation5 + $0x1544] ss:$40 sps:$4 sm:$0xff]  }
 0x192   : > { %5439 = vmatpush1.bf16.msra.mxu0 %v9230_v32  ;;  %5563 = vmatprep.subr.bf16.mxu1 %v9241_v36  ;;  %v9269_v32 = vld [vmem:[#allocation5 + $0xaf8] ss:$40 sps:$4 sm:$0xff]  }
 0x193   : > { %5440 = vmatprep.subr.bf16.mxu0 %v9238_v35  ;;  %v9277_v35 = vld [vmem:[#allocation5 + $0xb4c] ss:$40 sps:$4 sm:$0xff]   ;;  %v9272_v36 = vld [vmem:[#allocation5 + $0x1540] ss:$40 sps:$4 sm:$0xff]  }
 0x195   : > { %5564 = vmatpush1.bf16.msra.mxu1 %v9239_v46  ;;  %v9278_v46 = vld [vmem:[#allocation5 + $0x1590] ss:$40 sps:$4 sm:$0xff]  }
 0x196   : > { %5441 = vmatpush1.bf16.msra.mxu0 %v9236_v38  ;;  %5565 = vmatprep.subr.bf16.mxu1 %v9247_v56  ;;  %v9275_v38 = vld [vmem:[#allocation5 + $0xb48] ss:$40 sps:$4 sm:$0xff]   ;;  %v9286_v56 = vld [vmem:[#allocation5 + $0x15e4] ss:$40 sps:$4 sm:$0xff]  }
 0x197   : > { %5442 = vmatprep.subr.bf16.mxu0 %v9244_v50  ;;  %v9281_v50 = vld [vmem:[#allocation5 + $0xb98] ss:$40 sps:$4 sm:$0xff]  }
 0x199   : > { %5566 = vmatpush1.bf16.msra.mxu1 %v9245_v63  ;;  %v9292_v63 = vld [vmem:[#allocation5 + $0x1634] ss:$40 sps:$4 sm:$0xff]  }
 0x19a   : > { %5443 = vmatpush1.bf16.msra.mxu0 %v9242_v60  ;;  %5576 = vmatprep.subr.bf16.mxu1 %v9253_v5  ;;  %v9284_v60 = vld [vmem:[#allocation5 + $0x15e0] ss:$40 sps:$4 sm:$0xff]   ;;  %v9290_v5 = vld [vmem:[#allocation5 + $0x1630] ss:$40 sps:$4 sm:$0xff]  }
 0x19b   : > { %5453 = vmatprep.subr.bf16.mxu0 %v9250_v4  ;;  %v9295_v4 = vld [vmem:[#allocation5 + $0xc3c] ss:$40 sps:$4 sm:$0xff]  }
 0x19c   : > { %5568 = vmatmul.mubr.bf16.vlgmr.msra.gmra.mrb[4].mxu1 %v10842_v27 }
 0x19d   : > { %5445 = vmatmul.mubr.bf16.vlgmr.msra.gmra.mrb[0].mxu0 %v10901_v13  ;;  %5577 = vmatpush1.bf16.msra.mxu1 %v9251_v15  ;;  %v9301_v15 = vld [vmem:[#allocation5 + $0xc8c] ss:$40 sps:$4 sm:$0xff]  }
 0x19e   : > { %5454 = vmatpush1.bf16.msra.mxu0 %v9248_v10  ;;  %5578 = vmatprep.subr.bf16.mxu1 %v9259_v19  ;;  %v9298_v10 = vld [vmem:[#allocation5 + $0x1684] ss:$40 sps:$4 sm:$0xff]   ;;  %v9299_v19 = vld [vmem:[#allocation5 + $0xc88] ss:$40 sps:$4 sm:$0xff]  }
 0x19f   : > { %5455 = vmatprep.subr.bf16.mxu0 %v9256_v18  ;;  %5485 = vmatprep.mubr.bf16.mxu0 %v10903_v20  ;;  %v9296_v18 = vld [vmem:[#allocation5 + $0x1680] ss:$40 sps:$4 sm:$0xff]  }
 0x1a0   : > { %5608 = vmatprep.mubr.bf16.mxu1 %v10857_v11 }
 0x1a1   : > { %5579 = vmatpush1.bf16.msra.mxu1 %v9257_v21  ;;  %v9307_v21 = vld [vmem:[#allocation5 + $0xcdc] ss:$40 sps:$4 sm:$0xff]  }
 0x1a2   : > { %5456 = vmatpush1.bf16.msra.mxu0 %v9254_v53  ;;  %5580 = vmatprep.subr.bf16.mxu1 %v9265_v24  ;;  %v9304_v53 = vld [vmem:[#allocation5 + $0x16d4] ss:$40 sps:$4 sm:$0xff]   ;;  %v9305_v24 = vld [vmem:[#allocation5 + $0xcd8] ss:$40 sps:$4 sm:$0xff]  }
 0x1a3   : > { %5457 = vmatprep.subr.bf16.mxu0 %v9262_v23  ;;  %v9302_v23 = vld [vmem:[#allocation5 + $0x16d0] ss:$40 sps:$4 sm:$0xff]  }
 0x1a5   : > { %5581 = vmatpush1.bf16.msra.mxu1 %v9263_v28  ;;  %v9313_v28 = vld [vmem:[#allocation5 + $0xd2c] ss:$40 sps:$4 sm:$0xff]  }
 0x1a6   : > { %5458 = vmatpush1.bf16.msra.mxu0 %v9260_v26  ;;  %5582 = vmatprep.subr.bf16.mxu1 %v9271_v30  ;;  %v9310_v26 = vld [vmem:[#allocation5 + $0x1724] ss:$40 sps:$4 sm:$0xff]   ;;  %v9311_v30 = vld [vmem:[#allocation5 + $0xd28] ss:$40 sps:$4 sm:$0xff]  }
 0x1a7   : > { %5459 = vmatprep.subr.bf16.mxu0 %v9268_v29  ;;  %v9308_v29 = vld [vmem:[#allocation5 + $0x1720] ss:$40 sps:$4 sm:$0xff]  }
 0x1a9   : > { %5583 = vmatpush1.bf16.msra.mxu1 %v9269_v32  ;;  %v9319_v32 = vld [vmem:[#allocation5 + $0xd7c] ss:$40 sps:$4 sm:$0xff]  }
 0x1aa   : > { %5460 = vmatpush1.bf16.msra.mxu0 %v9266_v31  ;;  %5584 = vmatprep.subr.bf16.mxu1 %v9277_v35  ;;  %v9316_v31 = vld [vmem:[#allocation5 + $0x1774] ss:$40 sps:$4 sm:$0xff]   ;;  %v9317_v35 = vld [vmem:[#allocation5 + $0xd78] ss:$40 sps:$4 sm:$0xff]  }
 0x1ab   : > { %5461 = vmatprep.subr.bf16.mxu0 %v9274_v34  ;;  %v9314_v34 = vld [vmem:[#allocation5 + $0x1770] ss:$40 sps:$4 sm:$0xff]  }
 0x1ad   : > { %5585 = vmatpush1.bf16.msra.mxu1 %v9275_v38  ;;  %v9325_v38 = vld [vmem:[#allocation5 + $0xdcc] ss:$40 sps:$4 sm:$0xff]  }
 0x1ae   : > { %5462 = vmatpush1.bf16.msra.mxu0 %v9272_v36  ;;  %5586 = vmatprep.subr.bf16.mxu1 %v9283_v43  ;;  %v9322_v36 = vld [vmem:[#allocation5 + $0x17c4] ss:$40 sps:$4 sm:$0xff]   ;;  %v9323_v43 = vld [vmem:[#allocation5 + $0xdc8] ss:$40 sps:$4 sm:$0xff]  }
 0x1af   : > { %5463 = vmatprep.subr.bf16.mxu0 %v9280_v40  ;;  %v9320_v40 = vld [vmem:[#allocation5 + $0x17c0] ss:$40 sps:$4 sm:$0xff]  }
 0x1b1   : > { %5587 = vmatpush1.bf16.msra.mxu1 %v9281_v50  ;;  %v9331_v50 = vld [vmem:[#allocation5 + $0xe1c] ss:$40 sps:$4 sm:$0xff]  }
 0x1b2   : > { %5464 = vmatpush1.bf16.msra.mxu0 %v9278_v46  ;;  %5588 = vmatprep.subr.bf16.mxu1 %v9289_v59  ;;  %v9328_v46 = vld [vmem:[#allocation5 + $0x1814] ss:$40 sps:$4 sm:$0xff]   ;;  %v9329_v59 = vld [vmem:[#allocation5 + $0xe18] ss:$40 sps:$4 sm:$0xff]  }
 0x1b3   : > { %5465 = vmatprep.subr.bf16.mxu0 %v9286_v56  ;;  %v9326_v56 = vld [vmem:[#allocation5 + $0x1810] ss:$40 sps:$4 sm:$0xff]  }
 0x1b5   : > { %5589 = vmatpush1.bf16.msra.mxu1 %v9287_v61  ;;  %v9337_v61 = vld [vmem:[#allocation5 + $0xe6c] ss:$40 sps:$4 sm:$0xff]  }
 0x1b6   : > { %5466 = vmatpush1.bf16.msra.mxu0 %v9284_v60  ;;  %5590 = vmatprep.subr.bf16.mxu1 %v9295_v4  ;;  %v9334_v60 = vld [vmem:[#allocation5 + $0x1864] ss:$40 sps:$4 sm:$0xff]   ;;  %v413_v4 = vunpack.c.l.bf16 %v10890_v44 }
 0x1b7   : > { %5467 = vmatprep.subr.bf16.mxu0 %v9292_v63  ;;  %v9332_v63 = vld [vmem:[#allocation5 + $0x1860] ss:$40 sps:$4 sm:$0xff]   ;;  %v10156_v44 = vld [vmem:[#allocation5 + $0x1884] ss:$40 sps:$4 sm:$0xff]  }
 0x1b9   : > { %5591 = vmatpush1.bf16.msra.mxu1 %v9293_v8  ;;  %v9335_v8 = vld [vmem:[#allocation5 + $0xe68] ss:$40 sps:$4 sm:$0xff]  }
 0x1ba   : > { %5468 = vmatpush1.bf16.msra.mxu0 %v9290_v5  ;;  %5592 = vmatprep.subr.bf16.mxu1 %v9301_v15  ;;  %v454_v5 = vrot.slane %v10892_v45, %v10826_v6  ;;  %v9343_v15 = vld [vmem:[#allocation5 + $0xebc] ss:$40 sps:$4 sm:$0xff]   ;;  %v9344_v45 = vld [vmem:[#allocation5 + $0xf08] ss:$40 sps:$4 sm:$0xff]  }
 0x1bb   : > { %5469 = vmatprep.subr.bf16.mxu0 %v9298_v10  ;;  %v9340_v10 = vld [vmem:[#allocation5 + $0x18b4] ss:$40 sps:$4 sm:$0xff]  }
 0x1bd   : > { %5593 = vmatpush1.bf16.msra.mxu1 %v9299_v19  ;;  %v477_v19 = vmul.f32 %v454_v5, %v413_v4  ;;  %v9374_v5 = vld [vmem:[#allocation5 + $0x1098] ss:$40 sps:$4 sm:$0xff]  }
 0x1be   : > { %5470 = vmatpush1.bf16.msra.mxu0 %v9296_v18  ;;  %5594 = vmatprep.subr.bf16.mxu1 %v9307_v21  ;;  %v9338_v18 = vld [vmem:[#allocation5 + $0x18b0] ss:$40 sps:$4 sm:$0xff]   ;;  %v9346_v21 = vld [vmem:[#allocation5 + $0xf0c] ss:$40 sps:$4 sm:$0xff]  }
 0x1bf   : > { %5471 = vmatprep.subr.bf16.mxu0 %v9304_v53  ;;  %v9341_v53 = vld [vmem:[#allocation5 + $0xeb8] ss:$40 sps:$4 sm:$0xff]  }
 0x1c1   : > { %5595 = vmatpush1.bf16.msra.mxu1 %v9305_v24  ;;  %v10914_v24 = vpack.c.bf16 %v477_v19, %v477_v19 }
 0x1c2   : > { %5472 = vmatpush1.bf16.msra.mxu0 %v9302_v23  ;;  %5596 = vmatprep.subr.bf16.mxu1 %v9313_v28  ;;  %v9349_v23 = vld [vmem:[#allocation5 + $0x14] ss:$40 sps:$4 sm:$0xff]  }
 0x1c3   : > { %5473 = vmatprep.subr.bf16.mxu0 %v9310_v26  ;;  %v9347_v26 = vld [vmem:[#allocation5 + $0x10] ss:$40 sps:$4 sm:$0xff]   ;;  %v9352_v28 = vld [vmem:[#allocation5 + $0xf5c] ss:$40 sps:$4 sm:$0xff]  }
 0x1c5   : > { %5597 = vmatpush1.bf16.msra.mxu1 %v9311_v30  ;;  %v9350_v30 = vld [vmem:[#allocation5 + $0xf58] ss:$40 sps:$4 sm:$0xff]  }
 0x1c6   : > { %5474 = vmatpush1.bf16.msra.mxu0 %v9308_v29  ;;  %5598 = vmatprep.subr.bf16.mxu1 %v9319_v32  ;;  %v9355_v29 = vld [vmem:[#allocation5 + $0x64] ss:$40 sps:$4 sm:$0xff]  }
 0x1c7   : > { %5475 = vmatprep.subr.bf16.mxu0 %v9316_v31  ;;  %v9353_v31 = vld [vmem:[#allocation5 + $0x60] ss:$40 sps:$4 sm:$0xff]   ;;  %v9358_v32 = vld [vmem:[#allocation5 + $0xfac] ss:$40 sps:$4 sm:$0xff]  }
 0x1c9   : > { %5599 = vmatpush1.bf16.msra.mxu1 %v9317_v35  ;;  %v9356_v35 = vld [vmem:[#allocation5 + $0xfa8] ss:$40 sps:$4 sm:$0xff]  }
 0x1ca   : > { %5476 = vmatpush1.bf16.msra.mxu0 %v9314_v34  ;;  %5600 = vmatprep.subr.bf16.mxu1 %v9325_v38  ;;  %v9361_v34 = vld [vmem:[#allocation5 + $0xb4] ss:$40 sps:$4 sm:$0xff]  }
 0x1cb   : > { %5477 = vmatprep.subr.bf16.mxu0 %v9322_v36  ;;  %v9359_v36 = vld [vmem:[#allocation5 + $0xb0] ss:$40 sps:$4 sm:$0xff]   ;;  %v9364_v38 = vld [vmem:[#allocation5 + $0xffc] ss:$40 sps:$4 sm:$0xff]  }
 0x1cd   : > { %5601 = vmatpush1.bf16.msra.mxu1 %v9323_v43  ;;  %v9362_v43 = vld [vmem:[#allocation5 + $0xff8] ss:$40 sps:$4 sm:$0xff]  }
 0x1ce   : > { %5478 = vmatpush1.bf16.msra.mxu0 %v9320_v40  ;;  %5602 = vmatprep.subr.bf16.mxu1 %v9331_v50  ;;  %v9367_v40 = vld [vmem:[#allocation5 + $0x104] ss:$40 sps:$4 sm:$0xff]  }
 0x1cf   : > { %5479 = vmatprep.subr.bf16.mxu0 %v9328_v46  ;;  %v9365_v46 = vld [vmem:[#allocation5 + $0x100] ss:$40 sps:$4 sm:$0xff]   ;;  %v9370_v50 = vld [vmem:[#allocation5 + $0x104c] ss:$40 sps:$4 sm:$0xff]  }
 0x1d1   : > { %5603 = vmatpush1.bf16.msra.mxu1 %v9329_v59  ;;  %v9368_v59 = vld [vmem:[#allocation5 + $0x1048] ss:$40 sps:$4 sm:$0xff]  }
 0x1d2   : > { %5480 = vmatpush1.bf16.msra.mxu0 %v9326_v56  ;;  %5604 = vmatprep.subr.bf16.mxu1 %v9337_v61  ;;  %v9373_v56 = vld [vmem:[#allocation5 + $0x154] ss:$40 sps:$4 sm:$0xff]  }
 0x1d3   : > { %5481 = vmatprep.subr.bf16.mxu0 %v9334_v60  ;;  %v9371_v60 = vld [vmem:[#allocation5 + $0x150] ss:$40 sps:$4 sm:$0xff]   ;;  %v9376_v61 = vld [vmem:[#allocation5 + $0x109c] ss:$40 sps:$4 sm:$0xff]  }
 0x1d5   : > { %5605 = vmatpush1.bf16.msra.mxu1 %v9335_v8  ;;  %v9377_v8 = vld [vmem:[#allocation5 + $0x1a0] ss:$40 sps:$4 sm:$0xff]  }
 0x1d6   : > { %5482 = vmatpush1.bf16.msra.mxu0 %v9332_v63  ;;  %5606 = vmatprep.subr.bf16.mxu1 %v9343_v15  ;;  %v9379_v63 = vld [vmem:[#allocation5 + $0x1a4] ss:$40 sps:$4 sm:$0xff]   ;;  %v9385_v15 = vld [vmem:[#allocation5 + $0x1f4] ss:$40 sps:$4 sm:$0xff]  }
 0x1d7   : > { %5483 = vmatprep.subr.bf16.mxu0 %v9340_v10  ;;  %v9382_v10 = vld [vmem:[#allocation5 + $0x10ec] ss:$40 sps:$4 sm:$0xff]  }
 0x1d9   : > { %5607 = vmatpush1.bf16.msra.mxu1 %v9341_v53 }
 0x1da   : > { %5484 = vmatpush1.bf16.msra.mxu0 %v9338_v18  ;;  %5617 = vmatprep.subr.bf16.mxu1 %v9346_v21  ;;  %v9380_v21 = vld [vmem:[#allocation5 + $0x10e8] ss:$40 sps:$4 sm:$0xff]  }
 0x1db   : > { %5699 = vmatprep.subr.bf16.mxu0 %v9349_v23  ;;  %v9383_v23 = vld [vmem:[#allocation5 + $0x1f0] ss:$40 sps:$4 sm:$0xff]  }
 0x1dc   : > { %5609 = vmatmul.mubr.bf16.vlgmr.msra.gmra.mrb[4].mxu1 %v10868_v9 }
 0x1dd   : > { %5486 = vmatmul.mubr.bf16.vlgmr.msra.gmra.mrb[0].mxu0 %v10914_v24  ;;  %5618 = vmatpush1.bf16.msra.mxu1 %v9344_v45 }
 0x1de   : > { %5700 = vmatpush1.bf16.msra.mxu0 %v9347_v26  ;;  %5619 = vmatprep.subr.bf16.mxu1 %v9352_v28  ;;  %v9388_v26 = vld [vmem:[#allocation5 + $0x113c] ss:$40 sps:$4 sm:$0xff]  }
 0x1df   : > { %5701 = vmatprep.subr.bf16.mxu0 %v9355_v29  ;;  %5649 = vmatprep.mubr.bf16.mxu1 %v10881_v22  ;;  %v9391_v28 = vld [vmem:[#allocation5 + $0x244] ss:$40 sps:$4 sm:$0xff]   ;;  %v9386_v29 = vld [vmem:[#allocation5 + $0x1138] ss:$40 sps:$4 sm:$0xff]  }
 0x1e0   : > { %5731 = vmatprep.mubr.bf16.mxu0 %v10819_v2 }
 0x1e1   : > { %5620 = vmatpush1.bf16.msra.mxu1 %v9350_v30  ;;  %v9389_v30 = vld [vmem:[#allocation5 + $0x240] ss:$40 sps:$4 sm:$0xff]  }
 0x1e2   : > { %5702 = vmatpush1.bf16.msra.mxu0 %v9353_v31  ;;  %5621 = vmatprep.subr.bf16.mxu1 %v9358_v32  ;;  %v9394_v31 = vld [vmem:[#allocation5 + $0x118c] ss:$40 sps:$4 sm:$0xff]  }
 0x1e3   : > { %5703 = vmatprep.subr.bf16.mxu0 %v9361_v34  ;;  %v9397_v32 = vld [vmem:[#allocation5 + $0x294] ss:$40 sps:$4 sm:$0xff]   ;;  %v9392_v34 = vld [vmem:[#allocation5 + $0x1188] ss:$40 sps:$4 sm:$0xff]  }
 0x1e5   : > { %5622 = vmatpush1.bf16.msra.mxu1 %v9356_v35  ;;  %v9395_v35 = vld [vmem:[#allocation5 + $0x290] ss:$40 sps:$4 sm:$0xff]  }
 0x1e6   : > { %5704 = vmatpush1.bf16.msra.mxu0 %v9359_v36  ;;  %5623 = vmatprep.subr.bf16.mxu1 %v9364_v38  ;;  %v9400_v36 = vld [vmem:[#allocation5 + $0x11dc] ss:$40 sps:$4 sm:$0xff]  }
 0x1e7   : > { %5705 = vmatprep.subr.bf16.mxu0 %v9367_v40  ;;  %v9403_v38 = vld [vmem:[#allocation5 + $0x2e4] ss:$40 sps:$4 sm:$0xff]   ;;  %v9398_v40 = vld [vmem:[#allocation5 + $0x11d8] ss:$40 sps:$4 sm:$0xff]  }
 0x1e9   : > { %5624 = vmatpush1.bf16.msra.mxu1 %v9362_v43  ;;  %v9401_v43 = vld [vmem:[#allocation5 + $0x2e0] ss:$40 sps:$4 sm:$0xff]  }
 0x1ea   : > { %5706 = vmatpush1.bf16.msra.mxu0 %v9365_v46  ;;  %5625 = vmatprep.subr.bf16.mxu1 %v9370_v50  ;;  %v9406_v46 = vld [vmem:[#allocation5 + $0x122c] ss:$40 sps:$4 sm:$0xff]  }
 0x1eb   : > { %5707 = vmatprep.subr.bf16.mxu0 %v9373_v56  ;;  %v9409_v50 = vld [vmem:[#allocation5 + $0x334] ss:$40 sps:$4 sm:$0xff]   ;;  %v9404_v56 = vld [vmem:[#allocation5 + $0x1228] ss:$40 sps:$4 sm:$0xff]  }
 0x1ed   : > { %5626 = vmatpush1.bf16.msra.mxu1 %v9368_v59  ;;  %v9407_v59 = vld [vmem:[#allocation5 + $0x330] ss:$40 sps:$4 sm:$0xff]  }
 0x1ee   : > { %5708 = vmatpush1.bf16.msra.mxu0 %v9371_v60  ;;  %5627 = vmatprep.subr.bf16.mxu1 %v9376_v61  ;;  %v9412_v60 = vld [vmem:[#allocation5 + $0x127c] ss:$40 sps:$4 sm:$0xff]  }
 0x1ef   : > { %5709 = vmatprep.subr.bf16.mxu0 %v9379_v63  ;;  %v10920_v18 = vpop.f32.mrb[0].mxu1  ;;  %v9415_v61 = vld [vmem:[#allocation5 + $0x384] ss:$40 sps:$4 sm:$0xff]   ;;  %v9410_v63 = vld [vmem:[#allocation5 + $0x1278] ss:$40 sps:$4 sm:$0xff]  }
 0x1f0   : > { %v10922_v19 = vpop.f32.mrb[1].mxu1 }
 0x1f1   : > { %v5327_v53 = vpop.f32.mrb[2].mxu1  ;;  %5628 = vmatpush1.bf16.msra.mxu1 %v9374_v5  ;;  %v9413_v5 = vld [vmem:[#allocation5 + $0x380] ss:$40 sps:$4 sm:$0xff]  }
 0x1f2   : > { %5710 = vmatpush1.bf16.msra.mxu0 %v9377_v8  ;;  %v5328_v45 = vpop.f32.mrb[3].mxu1  ;;  %5629 = vmatprep.subr.bf16.mxu1 %v9382_v10  ;;  %v9418_v8 = vld [vmem:[#allocation5 + $0x12cc] ss:$40 sps:$4 sm:$0xff]   ;;  %v9419_v53 = vld [vmem:[#allocation5 + $0x3d0] ss:$40 sps:$4 sm:$0xff]  }
 0x1f3   : > { %5711 = vmatprep.subr.bf16.mxu0 %v9385_v15  ;;  %v9421_v10 = vld [vmem:[#allocation5 + $0x3d4] ss:$40 sps:$4 sm:$0xff]   ;;  %v9416_v15 = vld [vmem:[#allocation5 + $0x12c8] ss:$40 sps:$4 sm:$0xff]   ;;  %v9422_v45 = vld [vmem:[#allocation5 + $0x1318] ss:$40 sps:$4 sm:$0xff]  }
 0x1f5   : > { %5630 = vmatpush1.bf16.msra.mxu1 %v9380_v21  ;;  %v9424_v21 = vld [vmem:[#allocation5 + $0x131c] ss:$40 sps:$4 sm:$0xff]  }
 0x1f6   : > { %5712 = vmatpush1.bf16.msra.mxu0 %v9383_v23  ;;  %5631 = vmatprep.subr.bf16.mxu1 %v9388_v26  ;;  %v9427_v23 = vld [vmem:[#allocation5 + $0x424] ss:$40 sps:$4 sm:$0xff]   ;;  %v9425_v26 = vld [vmem:[#allocation5 + $0x420] ss:$40 sps:$4 sm:$0xff]  }
 0x1f7   : > { %5713 = vmatprep.subr.bf16.mxu0 %v9391_v28  ;;  %v9430_v28 = vld [vmem:[#allocation5 + $0x136c] ss:$40 sps:$4 sm:$0xff]  }
 0x1f9   : > { %5632 = vmatpush1.bf16.msra.mxu1 %v9386_v29  ;;  %v9433_v29 = vld [vmem:[#allocation5 + $0x474] ss:$40 sps:$4 sm:$0xff]  }
 0x1fa   : > { %5714 = vmatpush1.bf16.msra.mxu0 %v9389_v30  ;;  %5633 = vmatprep.subr.bf16.mxu1 %v9394_v31  ;;  %v9428_v30 = vld [vmem:[#allocation5 + $0x1368] ss:$40 sps:$4 sm:$0xff]  }
 0x1fb   : > { %5715 = vmatprep.subr.bf16.mxu0 %v9397_v32  ;;  %v9431_v31 = vld [vmem:[#allocation5 + $0x470] ss:$40 sps:$4 sm:$0xff]   ;;  %v9436_v32 = vld [vmem:[#allocation5 + $0x13bc] ss:$40 sps:$4 sm:$0xff]  }
 0x1fd   : > { %5634 = vmatpush1.bf16.msra.mxu1 %v9392_v34  ;;  %v9439_v34 = vld [vmem:[#allocation5 + $0x4c4] ss:$40 sps:$4 sm:$0xff]  }
 0x1fe   : > { %5716 = vmatpush1.bf16.msra.mxu0 %v9395_v35  ;;  %5635 = vmatprep.subr.bf16.mxu1 %v9400_v36  ;;  %v9434_v35 = vld [vmem:[#allocation5 + $0x13b8] ss:$40 sps:$4 sm:$0xff]  }
 0x1ff   : > { %5717 = vmatprep.subr.bf16.mxu0 %v9403_v38  ;;  %v9437_v36 = vld [vmem:[#allocation5 + $0x4c0] ss:$40 sps:$4 sm:$0xff]   ;;  %v9442_v38 = vld [vmem:[#allocation5 + $0x140c] ss:$40 sps:$4 sm:$0xff]  }
 0x201   : > { %5636 = vmatpush1.bf16.msra.mxu1 %v9398_v40  ;;  %v9445_v40 = vld [vmem:[#allocation5 + $0x514] ss:$40 sps:$4 sm:$0xff]  }
 0x202   : > { %5718 = vmatpush1.bf16.msra.mxu0 %v9401_v43  ;;  %5637 = vmatprep.subr.bf16.mxu1 %v9406_v46  ;;  %v9440_v43 = vld [vmem:[#allocation5 + $0x1408] ss:$40 sps:$4 sm:$0xff]  }
 0x203   : > { %5719 = vmatprep.subr.bf16.mxu0 %v9409_v50  ;;  %v9443_v46 = vld [vmem:[#allocation5 + $0x510] ss:$40 sps:$4 sm:$0xff]   ;;  %v9448_v50 = vld [vmem:[#allocation5 + $0x145c] ss:$40 sps:$4 sm:$0xff]  }
 0x205   : > { %5638 = vmatpush1.bf16.msra.mxu1 %v9404_v56  ;;  %v9451_v56 = vld [vmem:[#allocation5 + $0x564] ss:$40 sps:$4 sm:$0xff]  }
 0x206   : > { %5720 = vmatpush1.bf16.msra.mxu0 %v9407_v59  ;;  %5639 = vmatprep.subr.bf16.mxu1 %v9412_v60  ;;  %v9446_v59 = vld [vmem:[#allocation5 + $0x1458] ss:$40 sps:$4 sm:$0xff]  }
 0x207   : > { %5721 = vmatprep.subr.bf16.mxu0 %v9415_v61  ;;  %v9449_v60 = vld [vmem:[#allocation5 + $0x560] ss:$40 sps:$4 sm:$0xff]   ;;  %v9454_v61 = vld [vmem:[#allocation5 + $0x14ac] ss:$40 sps:$4 sm:$0xff]  }
 0x209   : > { %5640 = vmatpush1.bf16.msra.mxu1 %v9410_v63  ;;  %v9457_v63 = vld [vmem:[#allocation5 + $0x5b4] ss:$40 sps:$4 sm:$0xff]  }
 0x20a   : > { %5722 = vmatpush1.bf16.msra.mxu0 %v9413_v5  ;;  %5641 = vmatprep.subr.bf16.mxu1 %v9418_v8  ;;  %v9452_v5 = vld [vmem:[#allocation5 + $0x14a8] ss:$40 sps:$4 sm:$0xff]  }
 0x20b   : > { %5723 = vmatprep.subr.bf16.mxu0 %v9421_v10  ;;  %v9455_v8 = vld [vmem:[#allocation5 + $0x5b0] ss:$40 sps:$4 sm:$0xff]   ;;  %v9460_v10 = vld [vmem:[#allocation5 + $0x14fc] ss:$40 sps:$4 sm:$0xff]  }
 0x20d   : > { %5642 = vmatpush1.bf16.msra.mxu1 %v9416_v15  ;;  %v9463_v15 = vld [vmem:[#allocation5 + $0x604] ss:$40 sps:$4 sm:$0xff]  }
 0x20e   : > { %5724 = vmatpush1.bf16.msra.mxu0 %v9419_v53  ;;  %5643 = vmatprep.subr.bf16.mxu1 %v9424_v21  ;;  %v9458_v53 = vld [vmem:[#allocation5 + $0x14f8] ss:$40 sps:$4 sm:$0xff]  }
 0x20f   : > { %5725 = vmatprep.subr.bf16.mxu0 %v9427_v23  ;;  %v9461_v21 = vld [vmem:[#allocation5 + $0x600] ss:$40 sps:$4 sm:$0xff]   ;;  %v9466_v23 = vld [vmem:[#allocation5 + $0x154c] ss:$40 sps:$4 sm:$0xff]  }
 0x211   : > { %5644 = vmatpush1.bf16.msra.mxu1 %v9422_v45  ;;  %v9469_v45 = vld [vmem:[#allocation5 + $0x654] ss:$40 sps:$4 sm:$0xff]  }
 0x212   : > { %5726 = vmatpush1.bf16.msra.mxu0 %v9425_v26  ;;  %5645 = vmatprep.subr.bf16.mxu1 %v9430_v28  ;;  %v9464_v26 = vld [vmem:[#allocation5 + $0x1548] ss:$40 sps:$4 sm:$0xff]  }
 0x213   : > { %5727 = vmatprep.subr.bf16.mxu0 %v9433_v29  ;;  %v9467_v28 = vld [vmem:[#allocation5 + $0x650] ss:$40 sps:$4 sm:$0xff]   ;;  %v9472_v29 = vld [vmem:[#allocation5 + $0x159c] ss:$40 sps:$4 sm:$0xff]  }
 0x215   : > { %5646 = vmatpush1.bf16.msra.mxu1 %v9428_v30  ;;  %v9475_v30 = vld [vmem:[#allocation5 + $0x6a4] ss:$40 sps:$4 sm:$0xff]  }
 0x216   : > { %5728 = vmatpush1.bf16.msra.mxu0 %v9431_v31  ;;  %5647 = vmatprep.subr.bf16.mxu1 %v9436_v32  ;;  %v9470_v31 = vld [vmem:[#allocation5 + $0x1598] ss:$40 sps:$4 sm:$0xff]  }
 0x217   : > { %5729 = vmatprep.subr.bf16.mxu0 %v9439_v34  ;;  %v9473_v32 = vld [vmem:[#allocation5 + $0x6a0] ss:$40 sps:$4 sm:$0xff]   ;;  %v9478_v34 = vld [vmem:[#allocation5 + $0x15ec] ss:$40 sps:$4 sm:$0xff]  }
 0x219   : > { %5648 = vmatpush1.bf16.msra.mxu1 %v9434_v35  ;;  %v9481_v35 = vld [vmem:[#allocation5 + $0x6f4] ss:$40 sps:$4 sm:$0xff]  }
 0x21a   : > { %5730 = vmatpush1.bf16.msra.mxu0 %v9437_v36  ;;  %5658 = vmatprep.subr.bf16.mxu1 %v9442_v38  ;;  %v9476_v36 = vld [vmem:[#allocation5 + $0x15e8] ss:$40 sps:$4 sm:$0xff]  }
 0x21b   : > { %5740 = vmatprep.subr.bf16.mxu0 %v9445_v40  ;;  %v9479_v38 = vld [vmem:[#allocation5 + $0x6f0] ss:$40 sps:$4 sm:$0xff]   ;;  %v9484_v40 = vld [vmem:[#allocation5 + $0x163c] ss:$40 sps:$4 sm:$0xff]  }
 0x21c   : > { %5650 = vmatmul.mubr.bf16.vlgmr.msra.gmra.mrb[4].mxu1 %v10901_v13 }
 0x21d   : > { %5732 = vmatmul.mubr.bf16.vlgmr.msra.gmra.mrb[4].mxu0 %v10840_v25  ;;  %5659 = vmatpush1.bf16.msra.mxu1 %v9440_v43  ;;  %v9487_v43 = vld [vmem:[#allocation5 + $0x744] ss:$40 sps:$4 sm:$0xff]  }
 0x21e   : > { %5741 = vmatpush1.bf16.msra.mxu0 %v9443_v46  ;;  %5660 = vmatprep.subr.bf16.mxu1 %v9448_v50  ;;  %v9482_v46 = vld [vmem:[#allocation5 + $0x1638] ss:$40 sps:$4 sm:$0xff]  }
 0x21f   : > { %5742 = vmatprep.subr.bf16.mxu0 %v9451_v56  ;;  %5690 = vmatprep.mubr.bf16.mxu1 %v10903_v20  ;;  %v9485_v50 = vld [vmem:[#allocation5 + $0x740] ss:$40 sps:$4 sm:$0xff]   ;;  %v9490_v56 = vld [vmem:[#allocation5 + $0x168c] ss:$40 sps:$4 sm:$0xff]  }
 0x220   : > { %5772 = vmatprep.mubr.bf16.mxu0 %v10821_v3 }
 0x221   : > { %5661 = vmatpush1.bf16.msra.mxu1 %v9446_v59  ;;  %v9493_v59 = vld [vmem:[#allocation5 + $0x794] ss:$40 sps:$4 sm:$0xff]  }
 0x222   : > { %5743 = vmatpush1.bf16.msra.mxu0 %v9449_v60  ;;  %5662 = vmatprep.subr.bf16.mxu1 %v9454_v61  ;;  %v9488_v60 = vld [vmem:[#allocation5 + $0x1688] ss:$40 sps:$4 sm:$0xff]  }
 0x223   : > { %5744 = vmatprep.subr.bf16.mxu0 %v9457_v63  ;;  %v9491_v61 = vld [vmem:[#allocation5 + $0x790] ss:$40 sps:$4 sm:$0xff]   ;;  %v9496_v63 = vld [vmem:[#allocation5 + $0x16dc] ss:$40 sps:$4 sm:$0xff]  }
 0x225   : > { %5663 = vmatpush1.bf16.msra.mxu1 %v9452_v5  ;;  %v9499_v5 = vld [vmem:[#allocation5 + $0x7e4] ss:$40 sps:$4 sm:$0xff]  }
 0x226   : > { %5745 = vmatpush1.bf16.msra.mxu0 %v9455_v8  ;;  %5664 = vmatprep.subr.bf16.mxu1 %v9460_v10  ;;  %v9494_v8 = vld [vmem:[#allocation5 + $0x16d8] ss:$40 sps:$4 sm:$0xff]  }
 0x227   : > { %5746 = vmatprep.subr.bf16.mxu0 %v9463_v15  ;;  %v9497_v10 = vld [vmem:[#allocation5 + $0x7e0] ss:$40 sps:$4 sm:$0xff]   ;;  %v9502_v15 = vld [vmem:[#allocation5 + $0x172c] ss:$40 sps:$4 sm:$0xff]  }
 0x229   : > { %5665 = vmatpush1.bf16.msra.mxu1 %v9458_v53  ;;  %v9505_v53 = vld [vmem:[#allocation5 + $0x834] ss:$40 sps:$4 sm:$0xff]  }
 0x22a   : > { %5747 = vmatpush1.bf16.msra.mxu0 %v9461_v21  ;;  %5666 = vmatprep.subr.bf16.mxu1 %v9466_v23  ;;  %v9500_v21 = vld [vmem:[#allocation5 + $0x1728] ss:$40 sps:$4 sm:$0xff]  }
 0x22b   : > { %5748 = vmatprep.subr.bf16.mxu0 %v9469_v45  ;;  %v9503_v23 = vld [vmem:[#allocation5 + $0x830] ss:$40 sps:$4 sm:$0xff]   ;;  %v9508_v45 = vld [vmem:[#allocation5 + $0x177c] ss:$40 sps:$4 sm:$0xff]  }
 0x22d   : > { %5667 = vmatpush1.bf16.msra.mxu1 %v9464_v26  ;;  %v9511_v26 = vld [vmem:[#allocation5 + $0x884] ss:$40 sps:$4 sm:$0xff]  }
 0x22e   : > { %5749 = vmatpush1.bf16.msra.mxu0 %v9467_v28  ;;  %5668 = vmatprep.subr.bf16.mxu1 %v9472_v29  ;;  %v9506_v28 = vld [vmem:[#allocation5 + $0x1778] ss:$40 sps:$4 sm:$0xff]  }
 0x22f   : > { %5750 = vmatprep.subr.bf16.mxu0 %v9475_v30  ;;  %v9509_v29 = vld [vmem:[#allocation5 + $0x880] ss:$40 sps:$4 sm:$0xff]   ;;  %v9514_v30 = vld [vmem:[#allocation5 + $0x17cc] ss:$40 sps:$4 sm:$0xff]  }
 0x231   : > { %5669 = vmatpush1.bf16.msra.mxu1 %v9470_v31  ;;  %v9517_v31 = vld [vmem:[#allocation5 + $0x8d4] ss:$40 sps:$4 sm:$0xff]  }
 0x232   : > { %5751 = vmatpush1.bf16.msra.mxu0 %v9473_v32  ;;  %5670 = vmatprep.subr.bf16.mxu1 %v9478_v34  ;;  %v9512_v32 = vld [vmem:[#allocation5 + $0x17c8] ss:$40 sps:$4 sm:$0xff]  }
 0x233   : > { %5752 = vmatprep.subr.bf16.mxu0 %v9481_v35  ;;  %v9515_v34 = vld [vmem:[#allocation5 + $0x8d0] ss:$40 sps:$4 sm:$0xff]   ;;  %v9520_v35 = vld [vmem:[#allocation5 + $0x181c] ss:$40 sps:$4 sm:$0xff]  }
 0x235   : > { %5671 = vmatpush1.bf16.msra.mxu1 %v9476_v36  ;;  %v9523_v36 = vld [vmem:[#allocation5 + $0x924] ss:$40 sps:$4 sm:$0xff]  }
 0x236   : > { %5753 = vmatpush1.bf16.msra.mxu0 %v9479_v38  ;;  %5672 = vmatprep.subr.bf16.mxu1 %v9484_v40  ;;  %v9518_v38 = vld [vmem:[#allocation5 + $0x1818] ss:$40 sps:$4 sm:$0xff]  }
 0x237   : > { %5754 = vmatprep.subr.bf16.mxu0 %v9487_v43  ;;  %v9521_v40 = vld [vmem:[#allocation5 + $0x920] ss:$40 sps:$4 sm:$0xff]   ;;  %v9526_v43 = vld [vmem:[#allocation5 + $0x186c] ss:$40 sps:$4 sm:$0xff]  }
 0x239   : > { %5673 = vmatpush1.bf16.msra.mxu1 %v9482_v46  ;;  %v9529_v46 = vld [vmem:[#allocation5 + $0x974] ss:$40 sps:$4 sm:$0xff]  }
 0x23a   : > { %5755 = vmatpush1.bf16.msra.mxu0 %v9485_v50  ;;  %5674 = vmatprep.subr.bf16.mxu1 %v9490_v56  ;;  %v9524_v50 = vld [vmem:[#allocation5 + $0x1868] ss:$40 sps:$4 sm:$0xff]  }
 0x23b   : > { %5756 = vmatprep.subr.bf16.mxu0 %v9493_v59  ;;  %v9527_v56 = vld [vmem:[#allocation5 + $0x970] ss:$40 sps:$4 sm:$0xff]   ;;  %v9532_v59 = vld [vmem:[#allocation5 + $0x18bc] ss:$40 sps:$4 sm:$0xff]  }
 0x23d   : > { %5675 = vmatpush1.bf16.msra.mxu1 %v9488_v60  ;;  %v9535_v60 = vld [vmem:[#allocation5 + $0x9c4] ss:$40 sps:$4 sm:$0xff]  }
 0x23e   : > { %5757 = vmatpush1.bf16.msra.mxu0 %v9491_v61  ;;  %5676 = vmatprep.subr.bf16.mxu1 %v9496_v63  ;;  %v9530_v61 = vld [vmem:[#allocation5 + $0x18b8] ss:$40 sps:$4 sm:$0xff]  }
 0x23f   : > { %5758 = vmatprep.subr.bf16.mxu0 %v9499_v5  ;;  %v9533_v63 = vld [vmem:[#allocation5 + $0x9c0] ss:$40 sps:$4 sm:$0xff]   ;;  %v9538_v5 = vld [vmem:[#allocation5 + $0xa14] ss:$40 sps:$4 sm:$0xff]  }
 0x241   : > { %5677 = vmatpush1.bf16.msra.mxu1 %v9494_v8  ;;  %v9541_v8 = vld [vmem:[#allocation5 + $0x1c] ss:$40 sps:$4 sm:$0xff]  }
 0x242   : > { %5759 = vmatpush1.bf16.msra.mxu0 %v9497_v10  ;;  %5678 = vmatprep.subr.bf16.mxu1 %v9502_v15  ;;  %v9536_v10 = vld [vmem:[#allocation5 + $0xa10] ss:$40 sps:$4 sm:$0xff]  }
 0x243   : > { %5760 = vmatprep.subr.bf16.mxu0 %v9505_v53  ;;  %v9539_v15 = vld [vmem:[#allocation5 + $0x18] ss:$40 sps:$4 sm:$0xff]   ;;  %v9544_v53 = vld [vmem:[#allocation5 + $0xa64] ss:$40 sps:$4 sm:$0xff]  }
 0x245   : > { %5679 = vmatpush1.bf16.msra.mxu1 %v9500_v21  ;;  %v9547_v21 = vld [vmem:[#allocation5 + $0x6c] ss:$40 sps:$4 sm:$0xff]  }
 0x246   : > { %5761 = vmatpush1.bf16.msra.mxu0 %v9503_v23  ;;  %5680 = vmatprep.subr.bf16.mxu1 %v9508_v45  ;;  %v9542_v23 = vld [vmem:[#allocation5 + $0xa60] ss:$40 sps:$4 sm:$0xff]  }
 0x247   : > { %5762 = vmatprep.subr.bf16.mxu0 %v9511_v26  ;;  %v9545_v45 = vld [vmem:[#allocation5 + $0x68] ss:$40 sps:$4 sm:$0xff]   ;;  %v9550_v26 = vld [vmem:[#allocation5 + $0xab4] ss:$40 sps:$4 sm:$0xff]  }
 0x249   : > { %5681 = vmatpush1.bf16.msra.mxu1 %v9506_v28  ;;  %v9553_v28 = vld [vmem:[#allocation5 + $0xbc] ss:$40 sps:$4 sm:$0xff]  }
 0x24a   : > { %5763 = vmatpush1.bf16.msra.mxu0 %v9509_v29  ;;  %5682 = vmatprep.subr.bf16.mxu1 %v9514_v30  ;;  %v9548_v29 = vld [vmem:[#allocation5 + $0xab0] ss:$40 sps:$4 sm:$0xff]  }
 0x24b   : > { %5764 = vmatprep.subr.bf16.mxu0 %v9517_v31  ;;  %v9551_v30 = vld [vmem:[#allocation5 + $0xb8] ss:$40 sps:$4 sm:$0xff]   ;;  %v9556_v31 = vld [vmem:[#allocation5 + $0xb04] ss:$40 sps:$4 sm:$0xff]  }
 0x24d   : > { %5683 = vmatpush1.bf16.msra.mxu1 %v9512_v32  ;;  %v9559_v32 = vld [vmem:[#allocation5 + $0x10c] ss:$40 sps:$4 sm:$0xff]  }
 0x24e   : > { %5765 = vmatpush1.bf16.msra.mxu0 %v9515_v34  ;;  %5684 = vmatprep.subr.bf16.mxu1 %v9520_v35  ;;  %v9554_v34 = vld [vmem:[#allocation5 + $0xb00] ss:$40 sps:$4 sm:$0xff]  }
 0x24f   : > { %5766 = vmatprep.subr.bf16.mxu0 %v9523_v36  ;;  %v9557_v35 = vld [vmem:[#allocation5 + $0x108] ss:$40 sps:$4 sm:$0xff]   ;;  %v9562_v36 = vld [vmem:[#allocation5 + $0xb54] ss:$40 sps:$4 sm:$0xff]  }
 0x251   : > { %5685 = vmatpush1.bf16.msra.mxu1 %v9518_v38  ;;  %v9565_v38 = vld [vmem:[#allocation5 + $0x15c] ss:$40 sps:$4 sm:$0xff]  }
 0x252   : > { %5767 = vmatpush1.bf16.msra.mxu0 %v9521_v40  ;;  %5686 = vmatprep.subr.bf16.mxu1 %v9526_v43  ;;  %v9560_v40 = vld [vmem:[#allocation5 + $0xb50] ss:$40 sps:$4 sm:$0xff]  }
 0x253   : > { %5768 = vmatprep.subr.bf16.mxu0 %v9529_v46  ;;  %v9563_v43 = vld [vmem:[#allocation5 + $0x158] ss:$40 sps:$4 sm:$0xff]   ;;  %v9568_v46 = vld [vmem:[#allocation5 + $0xba4] ss:$40 sps:$4 sm:$0xff]  }
 0x255   : > { %5687 = vmatpush1.bf16.msra.mxu1 %v9524_v50  ;;  %v9571_v50 = vld [vmem:[#allocation5 + $0x1ac] ss:$40 sps:$4 sm:$0xff]  }
 0x256   : > { %5769 = vmatpush1.bf16.msra.mxu0 %v9527_v56  ;;  %5688 = vmatprep.subr.bf16.mxu1 %v9532_v59  ;;  %v9566_v56 = vld [vmem:[#allocation5 + $0xba0] ss:$40 sps:$4 sm:$0xff]  }
 0x257   : > { %5770 = vmatprep.subr.bf16.mxu0 %v9535_v60  ;;  %v9569_v59 = vld [vmem:[#allocation5 + $0x1a8] ss:$40 sps:$4 sm:$0xff]   ;;  %v9574_v60 = vld [vmem:[#allocation5 + $0xbf4] ss:$40 sps:$4 sm:$0xff]  }
 0x259   : > { %5689 = vmatpush1.bf16.msra.mxu1 %v9530_v61  ;;  %v9577_v61 = vld [vmem:[#allocation5 + $0x1fc] ss:$40 sps:$4 sm:$0xff]  }
 0x25a   : > { %5771 = vmatpush1.bf16.msra.mxu0 %v9533_v63  ;;  %5904 = vmatprep.subr.bf16.mxu1 %v9541_v8  ;;  %v9572_v63 = vld [vmem:[#allocation5 + $0xbf0] ss:$40 sps:$4 sm:$0xff]   ;;  %v9580_v8 = vld [vmem:[#allocation5 + $0xc44] ss:$40 sps:$4 sm:$0xff]  }
 0x25b   : > { %5781 = vmatprep.subr.bf16.mxu0 %v9538_v5  ;;  %v9575_v5 = vld [vmem:[#allocation5 + $0x1f8] ss:$40 sps:$4 sm:$0xff]  }
 0x25c   : > { %5691 = vmatmul.mubr.bf16.vlgmr.msra.gmra.mrb[4].mxu1 %v10914_v24 }
 0x25d   : > { %5773 = vmatmul.mubr.bf16.vlgmr.msra.gmra.mrb[4].mxu0 %v10842_v27  ;;  %5905 = vmatpush1.bf16.msra.mxu1 %v9539_v15  ;;  %v9578_v15 = vld [vmem:[#allocation5 + $0xc40] ss:$40 sps:$4 sm:$0xff]  }
 0x25e   : > { %5782 = vmatpush1.bf16.msra.mxu0 %v9536_v10  ;;  %5906 = vmatprep.subr.bf16.mxu1 %v9547_v21  ;;  %v9583_v10 = vld [vmem:[#allocation5 + $0x24c] ss:$40 sps:$4 sm:$0xff]  }
 0x25f   : > { %5783 = vmatprep.subr.bf16.mxu0 %v9544_v53  ;;  %5813 = vmatprep.mubr.bf16.mxu0 %v10857_v11  ;;  %v9581_v53 = vld [vmem:[#allocation5 + $0x248] ss:$40 sps:$4 sm:$0xff]   ;;  %v9586_v21 = vld [vmem:[#allocation5 + $0xc94] ss:$40 sps:$4 sm:$0xff]  }
 0x260   : > { %5936 = vmatprep.mubr.bf16.mxu1 %v10819_v2 }
 0x261   : > { %5907 = vmatpush1.bf16.msra.mxu1 %v9545_v45  ;;  %v9584_v45 = vld [vmem:[#allocation5 + $0xc90] ss:$40 sps:$4 sm:$0xff]  }
 0x262   : > { %5784 = vmatpush1.bf16.msra.mxu0 %v9542_v23  ;;  %5908 = vmatprep.subr.bf16.mxu1 %v9553_v28  ;;  %v9589_v23 = vld [vmem:[#allocation5 + $0x29c] ss:$40 sps:$4 sm:$0xff]  }
 0x263   : > { %5785 = vmatprep.subr.bf16.mxu0 %v9550_v26  ;;  %v9587_v26 = vld [vmem:[#allocation5 + $0x298] ss:$40 sps:$4 sm:$0xff]   ;;  %v9592_v28 = vld [vmem:[#allocation5 + $0xce4] ss:$40 sps:$4 sm:$0xff]  }
 0x265   : > { %5909 = vmatpush1.bf16.msra.mxu1 %v9551_v30  ;;  %v9590_v30 = vld [vmem:[#allocation5 + $0xce0] ss:$40 sps:$4 sm:$0xff]  }
 0x266   : > { %5786 = vmatpush1.bf16.msra.mxu0 %v9548_v29  ;;  %5910 = vmatprep.subr.bf16.mxu1 %v9559_v32  ;;  %v9595_v29 = vld [vmem:[#allocation5 + $0x2ec] ss:$40 sps:$4 sm:$0xff]  }
 0x267   : > { %5787 = vmatprep.subr.bf16.mxu0 %v9556_v31  ;;  %v9593_v31 = vld [vmem:[#allocation5 + $0x2e8] ss:$40 sps:$4 sm:$0xff]   ;;  %v9598_v32 = vld [vmem:[#allocation5 + $0xd34] ss:$40 sps:$4 sm:$0xff]  }
 0x269   : > { %5911 = vmatpush1.bf16.msra.mxu1 %v9557_v35  ;;  %v9596_v35 = vld [vmem:[#allocation5 + $0xd30] ss:$40 sps:$4 sm:$0xff]  }
 0x26a   : > { %5788 = vmatpush1.bf16.msra.mxu0 %v9554_v34  ;;  %5912 = vmatprep.subr.bf16.mxu1 %v9565_v38  ;;  %v9601_v34 = vld [vmem:[#allocation5 + $0x33c] ss:$40 sps:$4 sm:$0xff]  }
 0x26b   : > { %5789 = vmatprep.subr.bf16.mxu0 %v9562_v36  ;;  %v9599_v36 = vld [vmem:[#allocation5 + $0x338] ss:$40 sps:$4 sm:$0xff]   ;;  %v9604_v38 = vld [vmem:[#allocation5 + $0xd84] ss:$40 sps:$4 sm:$0xff]  }
 0x26d   : > { %5913 = vmatpush1.bf16.msra.mxu1 %v9563_v43  ;;  %v9602_v43 = vld [vmem:[#allocation5 + $0xd80] ss:$40 sps:$4 sm:$0xff]  }
 0x26e   : > { %5790 = vmatpush1.bf16.msra.mxu0 %v9560_v40  ;;  %5914 = vmatprep.subr.bf16.mxu1 %v9571_v50  ;;  %v9607_v40 = vld [vmem:[#allocation5 + $0x38c] ss:$40 sps:$4 sm:$0xff]  }
 0x26f   : > { %5791 = vmatprep.subr.bf16.mxu0 %v9568_v46  ;;  %v9605_v46 = vld [vmem:[#allocation5 + $0x388] ss:$40 sps:$4 sm:$0xff]   ;;  %v9610_v50 = vld [vmem:[#allocation5 + $0xdd4] ss:$40 sps:$4 sm:$0xff]  }
 0x271   : > { %5915 = vmatpush1.bf16.msra.mxu1 %v9569_v59  ;;  %v9608_v59 = vld [vmem:[#allocation5 + $0xdd0] ss:$40 sps:$4 sm:$0xff]  }
 0x272   : > { %5792 = vmatpush1.bf16.msra.mxu0 %v9566_v56  ;;  %5916 = vmatprep.subr.bf16.mxu1 %v9577_v61  ;;  %v9613_v56 = vld [vmem:[#allocation5 + $0x3dc] ss:$40 sps:$4 sm:$0xff]  }
 0x273   : > { %5793 = vmatprep.subr.bf16.mxu0 %v9574_v60  ;;  %v9611_v60 = vld [vmem:[#allocation5 + $0x3d8] ss:$40 sps:$4 sm:$0xff]   ;;  %v9616_v61 = vld [vmem:[#allocation5 + $0xe24] ss:$40 sps:$4 sm:$0xff]  }
 0x275   : > { %5917 = vmatpush1.bf16.msra.mxu1 %v9575_v5  ;;  %v9614_v5 = vld [vmem:[#allocation5 + $0xe20] ss:$40 sps:$4 sm:$0xff]  }
 0x276   : > { %5794 = vmatpush1.bf16.msra.mxu0 %v9572_v63  ;;  %5918 = vmatprep.subr.bf16.mxu1 %v9583_v10  ;;  %v9619_v63 = vld [vmem:[#allocation5 + $0x42c] ss:$40 sps:$4 sm:$0xff]  }
 0x277   : > { %5795 = vmatprep.subr.bf16.mxu0 %v9580_v8  ;;  %v9617_v8 = vld [vmem:[#allocation5 + $0x428] ss:$40 sps:$4 sm:$0xff]   ;;  %v9622_v10 = vld [vmem:[#allocation5 + $0xe74] ss:$40 sps:$4 sm:$0xff]  }
 0x279   : > { %5919 = vmatpush1.bf16.msra.mxu1 %v9581_v53  ;;  %v9620_v53 = vld [vmem:[#allocation5 + $0xe70] ss:$40 sps:$4 sm:$0xff]  }
 0x27a   : > { %5796 = vmatpush1.bf16.msra.mxu0 %v9578_v15  ;;  %5920 = vmatprep.subr.bf16.mxu1 %v9589_v23  ;;  %v9625_v15 = vld [vmem:[#allocation5 + $0x47c] ss:$40 sps:$4 sm:$0xff]  }
 0x27b   : > { %5797 = vmatprep.subr.bf16.mxu0 %v9586_v21  ;;  %v9623_v21 = vld [vmem:[#allocation5 + $0x478] ss:$40 sps:$4 sm:$0xff]   ;;  %v9628_v23 = vld [vmem:[#allocation5 + $0xec4] ss:$40 sps:$4 sm:$0xff]  }
 0x27d   : > { %5921 = vmatpush1.bf16.msra.mxu1 %v9587_v26  ;;  %v9626_v26 = vld [vmem:[#allocation5 + $0xec0] ss:$40 sps:$4 sm:$0xff]  }
 0x27e   : > { %5798 = vmatpush1.bf16.msra.mxu0 %v9584_v45  ;;  %5922 = vmatprep.subr.bf16.mxu1 %v9595_v29  ;;  %v9631_v45 = vld [vmem:[#allocation5 + $0x4cc] ss:$40 sps:$4 sm:$0xff]  }
 0x27f   : > { %5799 = vmatprep.subr.bf16.mxu0 %v9592_v28  ;;  %v9629_v28 = vld [vmem:[#allocation5 + $0x4c8] ss:$40 sps:$4 sm:$0xff]   ;;  %v9634_v29 = vld [vmem:[#allocation5 + $0xf14] ss:$40 sps:$4 sm:$0xff]  }
 0x281   : > { %5923 = vmatpush1.bf16.msra.mxu1 %v9593_v31  ;;  %v9632_v31 = vld [vmem:[#allocation5 + $0xf10] ss:$40 sps:$4 sm:$0xff]  }
 0x282   : > { %5800 = vmatpush1.bf16.msra.mxu0 %v9590_v30  ;;  %5924 = vmatprep.subr.bf16.mxu1 %v9601_v34  ;;  %v9637_v30 = vld [vmem:[#allocation5 + $0x51c] ss:$40 sps:$4 sm:$0xff]  }
 0x283   : > { %5801 = vmatprep.subr.bf16.mxu0 %v9598_v32  ;;  %v9635_v32 = vld [vmem:[#allocation5 + $0x518] ss:$40 sps:$4 sm:$0xff]   ;;  %v9640_v34 = vld [vmem:[#allocation5 + $0xf64] ss:$40 sps:$4 sm:$0xff]  }
 0x285   : > { %5925 = vmatpush1.bf16.msra.mxu1 %v9599_v36  ;;  %v9638_v36 = vld [vmem:[#allocation5 + $0xf60] ss:$40 sps:$4 sm:$0xff]  }
 0x286   : > { %5802 = vmatpush1.bf16.msra.mxu0 %v9596_v35  ;;  %5926 = vmatprep.subr.bf16.mxu1 %v9607_v40  ;;  %v9643_v35 = vld [vmem:[#allocation5 + $0x56c] ss:$40 sps:$4 sm:$0xff]  }
 0x287   : > { %5803 = vmatprep.subr.bf16.mxu0 %v9604_v38  ;;  %v9641_v38 = vld [vmem:[#allocation5 + $0x568] ss:$40 sps:$4 sm:$0xff]   ;;  %v9646_v40 = vld [vmem:[#allocation5 + $0xfb4] ss:$40 sps:$4 sm:$0xff]  }
 0x289   : > { %5927 = vmatpush1.bf16.msra.mxu1 %v9605_v46  ;;  %v9644_v46 = vld [vmem:[#allocation5 + $0xfb0] ss:$40 sps:$4 sm:$0xff]  }
 0x28a   : > { %5804 = vmatpush1.bf16.msra.mxu0 %v9602_v43  ;;  %5928 = vmatprep.subr.bf16.mxu1 %v9613_v56  ;;  %v9649_v43 = vld [vmem:[#allocation5 + $0x5bc] ss:$40 sps:$4 sm:$0xff]  }
 0x28b   : > { %5805 = vmatprep.subr.bf16.mxu0 %v9610_v50  ;;  %v9647_v50 = vld [vmem:[#allocation5 + $0x5b8] ss:$40 sps:$4 sm:$0xff]   ;;  %v9652_v56 = vld [vmem:[#allocation5 + $0x1004] ss:$40 sps:$4 sm:$0xff]  }
 0x28d   : > { %5929 = vmatpush1.bf16.msra.mxu1 %v9611_v60  ;;  %v9650_v60 = vld [vmem:[#allocation5 + $0x1000] ss:$40 sps:$4 sm:$0xff]  }
 0x28e   : > { %5806 = vmatpush1.bf16.msra.mxu0 %v9608_v59  ;;  %5930 = vmatprep.subr.bf16.mxu1 %v9619_v63  ;;  %v9655_v59 = vld [vmem:[#allocation5 + $0x60c] ss:$40 sps:$4 sm:$0xff]  }
 0x28f   : > { %5807 = vmatprep.subr.bf16.mxu0 %v9616_v61  ;;  %v9653_v61 = vld [vmem:[#allocation5 + $0x608] ss:$40 sps:$4 sm:$0xff]   ;;  %v9658_v63 = vld [vmem:[#allocation5 + $0x1054] ss:$40 sps:$4 sm:$0xff]  }
 0x291   : > { %5931 = vmatpush1.bf16.msra.mxu1 %v9617_v8  ;;  %v9656_v8 = vld [vmem:[#allocation5 + $0x1050] ss:$40 sps:$4 sm:$0xff]  }
 0x292   : > { %5808 = vmatpush1.bf16.msra.mxu0 %v9614_v5  ;;  %5932 = vmatprep.subr.bf16.mxu1 %v9625_v15  ;;  %v9661_v5 = vld [vmem:[#allocation5 + $0x65c] ss:$40 sps:$4 sm:$0xff]  }
 0x293   : > { %5809 = vmatprep.subr.bf16.mxu0 %v9622_v10  ;;  %v9659_v10 = vld [vmem:[#allocation5 + $0x658] ss:$40 sps:$4 sm:$0xff]   ;;  %v9664_v15 = vld [vmem:[#allocation5 + $0x10a4] ss:$40 sps:$4 sm:$0xff]  }
 0x295   : > { %5933 = vmatpush1.bf16.msra.mxu1 %v9623_v21  ;;  %v9662_v21 = vld [vmem:[#allocation5 + $0x10a0] ss:$40 sps:$4 sm:$0xff]  }
 0x296   : > { %5810 = vmatpush1.bf16.msra.mxu0 %v9620_v53  ;;  %5934 = vmatprep.subr.bf16.mxu1 %v9631_v45  ;;  %v9667_v53 = vld [vmem:[#allocation5 + $0x6ac] ss:$40 sps:$4 sm:$0xff]  }
 0x297   : > { %5811 = vmatprep.subr.bf16.mxu0 %v9628_v23  ;;  %v9665_v23 = vld [vmem:[#allocation5 + $0x6a8] ss:$40 sps:$4 sm:$0xff]   ;;  %v9670_v45 = vld [vmem:[#allocation5 + $0x10f4] ss:$40 sps:$4 sm:$0xff]  }
 0x299   : > { %5935 = vmatpush1.bf16.msra.mxu1 %v9629_v28 }
 0x29a   : > { %5812 = vmatpush1.bf16.msra.mxu0 %v9626_v26  ;;  %5945 = vmatprep.subr.bf16.mxu1 %v9637_v30  ;;  %v9673_v26 = vld [vmem:[#allocation5 + $0x6fc] ss:$40 sps:$4 sm:$0xff]  }
 0x29b   : > { %5822 = vmatprep.subr.bf16.mxu0 %v9634_v29 }
 0x29c   : > { %5937 = vmatmul.mubr.bf16.vlgmr.msra.gmra.mrb[8].mxu1 %v10840_v25 }
 0x29d   : > { %5814 = vmatmul.mubr.bf16.vlgmr.msra.gmra.mrb[4].mxu0 %v10868_v9  ;;  %5946 = vmatpush1.bf16.msra.mxu1 %v9635_v32  ;;  %v9668_v32 = vld [vmem:[#allocation5 + $0x10f0] ss:$40 sps:$4 sm:$0xff]  }
 0x29e   : > { %5823 = vmatpush1.bf16.msra.mxu0 %v9632_v31  ;;  %5947 = vmatprep.subr.bf16.mxu1 %v9643_v35 }
 0x29f   : > { %5824 = vmatprep.subr.bf16.mxu0 %v9640_v34  ;;  %5854 = vmatprep.mubr.bf16.mxu0 %v10881_v22  ;;  %v9671_v34 = vld [vmem:[#allocation5 + $0x6f8] ss:$40 sps:$4 sm:$0xff]  }
 0x2a0   : > { %5977 = vmatprep.mubr.bf16.mxu1 %v10821_v3 }
 0x2a1   : > { %5948 = vmatpush1.bf16.msra.mxu1 %v9641_v38  ;;  %v9676_v38 = vld [vmem:[#allocation5 + $0x1144] ss:$40 sps:$4 sm:$0xff]  }
 0x2a2   : > { %5825 = vmatpush1.bf16.msra.mxu0 %v9638_v36  ;;  %5949 = vmatprep.subr.bf16.mxu1 %v9649_v43  ;;  %v9674_v43 = vld [vmem:[#allocation5 + $0x1140] ss:$40 sps:$4 sm:$0xff]  }
 0x2a3   : > { %5826 = vmatprep.subr.bf16.mxu0 %v9646_v40  ;;  %v9679_v40 = vld [vmem:[#allocation5 + $0x74c] ss:$40 sps:$4 sm:$0xff]  }
 0x2a5   : > { %5950 = vmatpush1.bf16.msra.mxu1 %v9647_v50  ;;  %v9685_v50 = vld [vmem:[#allocation5 + $0x79c] ss:$40 sps:$4 sm:$0xff]  }
 0x2a6   : > { %5827 = vmatpush1.bf16.msra.mxu0 %v9644_v46  ;;  %5951 = vmatprep.subr.bf16.mxu1 %v9655_v59  ;;  %v9677_v46 = vld [vmem:[#allocation5 + $0x748] ss:$40 sps:$4 sm:$0xff]   ;;  %v9688_v59 = vld [vmem:[#allocation5 + $0x11e4] ss:$40 sps:$4 sm:$0xff]  }
 0x2a7   : > { %5828 = vmatprep.subr.bf16.mxu0 %v9652_v56  ;;  %v9683_v56 = vld [vmem:[#allocation5 + $0x798] ss:$40 sps:$4 sm:$0xff]  }
 0x2a9   : > { %5952 = vmatpush1.bf16.msra.mxu1 %v9653_v61  ;;  %v9686_v61 = vld [vmem:[#allocation5 + $0x11e0] ss:$40 sps:$4 sm:$0xff]  }
 0x2aa   : > { %5829 = vmatpush1.bf16.msra.mxu0 %v9650_v60  ;;  %5953 = vmatprep.subr.bf16.mxu1 %v9661_v5  ;;  %v9691_v60 = vld [vmem:[#allocation5 + $0x7ec] ss:$40 sps:$4 sm:$0xff]  }
 0x2ab   : > { %5830 = vmatprep.subr.bf16.mxu0 %v9658_v63  ;;  %v9689_v63 = vld [vmem:[#allocation5 + $0x7e8] ss:$40 sps:$4 sm:$0xff]   ;;  %v9694_v5 = vld [vmem:[#allocation5 + $0x1234] ss:$40 sps:$4 sm:$0xff]  }
 0x2ad   : > { %5954 = vmatpush1.bf16.msra.mxu1 %v9659_v10  ;;  %v9692_v10 = vld [vmem:[#allocation5 + $0x1230] ss:$40 sps:$4 sm:$0xff]  }
 0x2ae   : > { %5831 = vmatpush1.bf16.msra.mxu0 %v9656_v8  ;;  %5955 = vmatprep.subr.bf16.mxu1 %v9667_v53  ;;  %v9697_v8 = vld [vmem:[#allocation5 + $0x83c] ss:$40 sps:$4 sm:$0xff]  }
 0x2af   : > { %5832 = vmatprep.subr.bf16.mxu0 %v9664_v15  ;;  %v9695_v15 = vld [vmem:[#allocation5 + $0x838] ss:$40 sps:$4 sm:$0xff]   ;;  %v9700_v53 = vld [vmem:[#allocation5 + $0x1284] ss:$40 sps:$4 sm:$0xff]  }
 0x2b0   : > { %v5487_v28 = vpop.f32.mrb[0].mxu0 }
 0x2b1   : > { %v10937_v29 = vadd.f32 %v5487_v28, %v10920_v18  ;;  %v5489_v30 = vpop.f32.mrb[1].mxu0  ;;  %5956 = vmatpush1.bf16.msra.mxu1 %v9665_v23  ;;  %v9682_v18 = vld [vmem:[#allocation5 + $0x1194] ss:$40 sps:$4 sm:$0xff]   ;;  %v9698_v23 = vld [vmem:[#allocation5 + $0x1280] ss:$40 sps:$4 sm:$0xff]  }
 0x2b2   : > { %v10940_v31 = vadd.f32 %v5489_v30, %v10922_v19  ;;  %5833 = vmatpush1.bf16.msra.mxu0 %v9662_v21  ;;  %v5491_v35 = vpop.f32.mrb[2].mxu0  ;;  %5957 = vmatprep.subr.bf16.mxu1 %v9673_v26  ;;  %v9680_v19 = vld [vmem:[#allocation5 + $0x1190] ss:$40 sps:$4 sm:$0xff]   ;;  %v9703_v21 = vld [vmem:[#allocation5 + $0x88c] ss:$40 sps:$4 sm:$0xff]  }
 0x2b3   : > { %5834 = vmatprep.subr.bf16.mxu0 %v9670_v45  ;;  %v5492_v36 = vpop.f32.mrb[3].mxu0  ;;  %v9701_v45 = vld [vmem:[#allocation5 + $0x888] ss:$40 sps:$4 sm:$0xff]   ;;  %v9706_v26 = vld [vmem:[#allocation5 + $0x12d4] ss:$40 sps:$4 sm:$0xff]  }
 0x2b4   : > { %v9709_v28 = vld [vmem:[#allocation5 + $0x8dc] ss:$40 sps:$4 sm:$0xff]   ;;  %v9704_v30 = vld [vmem:[#allocation5 + $0x12d0] ss:$40 sps:$4 sm:$0xff]   ;;  %v9715_v35 = vld [vmem:[#allocation5 + $0x92c] ss:$40 sps:$4 sm:$0xff]  }
 0x2b5   : > { %5958 = vmatpush1.bf16.msra.mxu1 %v9671_v34  ;;  %v9712_v34 = vld [vmem:[#allocation5 + $0x1324] ss:$40 sps:$4 sm:$0xff]   ;;  %v9710_v36 = vld [vmem:[#allocation5 + $0x1320] ss:$40 sps:$4 sm:$0xff]  }
 0x2b6   : > { %5835 = vmatpush1.bf16.msra.mxu0 %v9668_v32  ;;  %5959 = vmatprep.subr.bf16.mxu1 %v9679_v40  ;;  %v9707_v32 = vld [vmem:[#allocation5 + $0x8d8] ss:$40 sps:$4 sm:$0xff]   ;;  %v9718_v40 = vld [vmem:[#allocation5 + $0x1374] ss:$40 sps:$4 sm:$0xff]  }
 0x2b7   : > { %5836 = vmatprep.subr.bf16.mxu0 %v9676_v38  ;;  %v9713_v38 = vld [vmem:[#allocation5 + $0x928] ss:$40 sps:$4 sm:$0xff]  }
 0x2b9   : > { %5960 = vmatpush1.bf16.msra.mxu1 %v9677_v46  ;;  %v9716_v46 = vld [vmem:[#allocation5 + $0x1370] ss:$40 sps:$4 sm:$0xff]  }
 0x2ba   : > { %5837 = vmatpush1.bf16.msra.mxu0 %v9674_v43  ;;  %5961 = vmatprep.subr.bf16.mxu1 %v9685_v50  ;;  %v9721_v43 = vld [vmem:[#allocation5 + $0x97c] ss:$40 sps:$4 sm:$0xff]  }
 0x2bb   : > { %5838 = vmatprep.subr.bf16.mxu0 %v9682_v18  ;;  %v9719_v18 = vld [vmem:[#allocation5 + $0x978] ss:$40 sps:$4 sm:$0xff]   ;;  %v9724_v50 = vld [vmem:[#allocation5 + $0x13c4] ss:$40 sps:$4 sm:$0xff]  }
 0x2bd   : > { %5962 = vmatpush1.bf16.msra.mxu1 %v9683_v56  ;;  %v9722_v56 = vld [vmem:[#allocation5 + $0x13c0] ss:$40 sps:$4 sm:$0xff]  }
 0x2be   : > { %5839 = vmatpush1.bf16.msra.mxu0 %v9680_v19  ;;  %5963 = vmatprep.subr.bf16.mxu1 %v9691_v60  ;;  %v9727_v19 = vld [vmem:[#allocation5 + $0x9cc] ss:$40 sps:$4 sm:$0xff]  }
 0x2bf   : > { %5840 = vmatprep.subr.bf16.mxu0 %v9688_v59  ;;  %v9725_v59 = vld [vmem:[#allocation5 + $0x9c8] ss:$40 sps:$4 sm:$0xff]   ;;  %v9730_v60 = vld [vmem:[#allocation5 + $0x1414] ss:$40 sps:$4 sm:$0xff]  }
 0x2c1   : > { %5964 = vmatpush1.bf16.msra.mxu1 %v9689_v63  ;;  %v9728_v63 = vld [vmem:[#allocation5 + $0x1410] ss:$40 sps:$4 sm:$0xff]  }
 0x2c2   : > { %5841 = vmatpush1.bf16.msra.mxu0 %v9686_v61  ;;  %5965 = vmatprep.subr.bf16.mxu1 %v9697_v8  ;;  %v9733_v61 = vld [vmem:[#allocation5 + $0xa1c] ss:$40 sps:$4 sm:$0xff]  }
 0x2c3   : > { %5842 = vmatprep.subr.bf16.mxu0 %v9694_v5  ;;  %v9731_v5 = vld [vmem:[#allocation5 + $0xa18] ss:$40 sps:$4 sm:$0xff]   ;;  %v9736_v8 = vld [vmem:[#allocation5 + $0x1464] ss:$40 sps:$4 sm:$0xff]  }
 0x2c5   : > { %5966 = vmatpush1.bf16.msra.mxu1 %v9695_v15  ;;  %v9734_v15 = vld [vmem:[#allocation5 + $0x1460] ss:$40 sps:$4 sm:$0xff]  }
 0x2c6   : > { %5843 = vmatpush1.bf16.msra.mxu0 %v9692_v10  ;;  %5967 = vmatprep.subr.bf16.mxu1 %v9703_v21  ;;  %v9739_v10 = vld [vmem:[#allocation5 + $0xa6c] ss:$40 sps:$4 sm:$0xff]  }
 0x2c7   : > { %5844 = vmatprep.subr.bf16.mxu0 %v9700_v53  ;;  %v9737_v53 = vld [vmem:[#allocation5 + $0xa68] ss:$40 sps:$4 sm:$0xff]   ;;  %v9742_v21 = vld [vmem:[#allocation5 + $0x14b4] ss:$40 sps:$4 sm:$0xff]  }
 0x2c9   : > { %5968 = vmatpush1.bf16.msra.mxu1 %v9701_v45  ;;  %v9740_v45 = vld [vmem:[#allocation5 + $0x14b0] ss:$40 sps:$4 sm:$0xff]  }
 0x2ca   : > { %5845 = vmatpush1.bf16.msra.mxu0 %v9698_v23  ;;  %5969 = vmatprep.subr.bf16.mxu1 %v9709_v28  ;;  %v9745_v23 = vld [vmem:[#allocation5 + $0xabc] ss:$40 sps:$4 sm:$0xff]  }
 0x2cb   : > { %5846 = vmatprep.subr.bf16.mxu0 %v9706_v26  ;;  %v9743_v26 = vld [vmem:[#allocation5 + $0xab8] ss:$40 sps:$4 sm:$0xff]   ;;  %v9748_v28 = vld [vmem:[#allocation5 + $0x1504] ss:$40 sps:$4 sm:$0xff]  }
 0x2cd   : > { %5970 = vmatpush1.bf16.msra.mxu1 %v9707_v32  ;;  %v9746_v32 = vld [vmem:[#allocation5 + $0x1500] ss:$40 sps:$4 sm:$0xff]  }
 0x2ce   : > { %5847 = vmatpush1.bf16.msra.mxu0 %v9704_v30  ;;  %5971 = vmatprep.subr.bf16.mxu1 %v9715_v35  ;;  %v9751_v30 = vld [vmem:[#allocation5 + $0xb0c] ss:$40 sps:$4 sm:$0xff]  }
 0x2cf   : > { %5848 = vmatprep.subr.bf16.mxu0 %v9712_v34  ;;  %v9749_v34 = vld [vmem:[#allocation5 + $0xb08] ss:$40 sps:$4 sm:$0xff]   ;;  %v9754_v35 = vld [vmem:[#allocation5 + $0x1554] ss:$40 sps:$4 sm:$0xff]  }
 0x2d1   : > { %5972 = vmatpush1.bf16.msra.mxu1 %v9713_v38  ;;  %v9752_v38 = vld [vmem:[#allocation5 + $0x1550] ss:$40 sps:$4 sm:$0xff]  }
 0x2d2   : > { %5849 = vmatpush1.bf16.msra.mxu0 %v9710_v36  ;;  %5973 = vmatprep.subr.bf16.mxu1 %v9721_v43  ;;  %v9757_v36 = vld [vmem:[#allocation5 + $0xb5c] ss:$40 sps:$4 sm:$0xff]  }
 0x2d3   : > { %5850 = vmatprep.subr.bf16.mxu0 %v9718_v40  ;;  %v9755_v40 = vld [vmem:[#allocation5 + $0xb58] ss:$40 sps:$4 sm:$0xff]   ;;  %v9760_v43 = vld [vmem:[#allocation5 + $0x15a4] ss:$40 sps:$4 sm:$0xff]  }
 0x2d5   : > { %5974 = vmatpush1.bf16.msra.mxu1 %v9719_v18  ;;  %v9758_v18 = vld [vmem:[#allocation5 + $0x15a0] ss:$40 sps:$4 sm:$0xff]  }
 0x2d6   : > { %5851 = vmatpush1.bf16.msra.mxu0 %v9716_v46  ;;  %5975 = vmatprep.subr.bf16.mxu1 %v9727_v19  ;;  %v9763_v46 = vld [vmem:[#allocation5 + $0xbac] ss:$40 sps:$4 sm:$0xff]  }
 0x2d7   : > { %5852 = vmatprep.subr.bf16.mxu0 %v9724_v50  ;;  %v9761_v50 = vld [vmem:[#allocation5 + $0xba8] ss:$40 sps:$4 sm:$0xff]   ;;  %v9766_v19 = vld [vmem:[#allocation5 + $0x15f4] ss:$40 sps:$4 sm:$0xff]  }
 0x2d9   : > { %5976 = vmatpush1.bf16.msra.mxu1 %v9725_v59  ;;  %v9764_v59 = vld [vmem:[#allocation5 + $0x15f0] ss:$40 sps:$4 sm:$0xff]  }
 0x2da   : > { %5853 = vmatpush1.bf16.msra.mxu0 %v9722_v56  ;;  %5986 = vmatprep.subr.bf16.mxu1 %v9733_v61  ;;  %v9769_v56 = vld [vmem:[#allocation5 + $0xbfc] ss:$40 sps:$4 sm:$0xff]  }
 0x2db   : > { %5863 = vmatprep.subr.bf16.mxu0 %v9730_v60  ;;  %v9767_v60 = vld [vmem:[#allocation5 + $0xbf8] ss:$40 sps:$4 sm:$0xff]   ;;  %v9772_v61 = vld [vmem:[#allocation5 + $0x1644] ss:$40 sps:$4 sm:$0xff]  }
 0x2dc   : > { %5978 = vmatmul.mubr.bf16.vlgmr.msra.gmra.mrb[8].mxu1 %v10842_v27 }
 0x2dd   : > { %5855 = vmatmul.mubr.bf16.vlgmr.msra.gmra.mrb[4].mxu0 %v10901_v13  ;;  %5987 = vmatpush1.bf16.msra.mxu1 %v9731_v5  ;;  %v9770_v5 = vld [vmem:[#allocation5 + $0x1640] ss:$40 sps:$4 sm:$0xff]  }
 0x2de   : > { %5864 = vmatpush1.bf16.msra.mxu0 %v9728_v63  ;;  %5988 = vmatprep.subr.bf16.mxu1 %v9739_v10  ;;  %v9775_v63 = vld [vmem:[#allocation5 + $0xc4c] ss:$40 sps:$4 sm:$0xff]  }
 0x2df   : > { %5865 = vmatprep.subr.bf16.mxu0 %v9736_v8  ;;  %5895 = vmatprep.mubr.bf16.mxu0 %v10903_v20  ;;  %v9773_v8 = vld [vmem:[#allocation5 + $0xc48] ss:$40 sps:$4 sm:$0xff]   ;;  %v9778_v10 = vld [vmem:[#allocation5 + $0x1694] ss:$40 sps:$4 sm:$0xff]  }
 0x2e0   : > { %6018 = vmatprep.mubr.bf16.mxu1 %v10857_v11 }
 0x2e1   : > { %5989 = vmatpush1.bf16.msra.mxu1 %v9737_v53  ;;  %v9776_v53 = vld [vmem:[#allocation5 + $0x1690] ss:$40 sps:$4 sm:$0xff]  }
 0x2e2   : > { %5866 = vmatpush1.bf16.msra.mxu0 %v9734_v15  ;;  %5990 = vmatprep.subr.bf16.mxu1 %v9745_v23  ;;  %v9781_v15 = vld [vmem:[#allocation5 + $0xc9c] ss:$40 sps:$4 sm:$0xff]  }
 0x2e3   : > { %5867 = vmatprep.subr.bf16.mxu0 %v9742_v21  ;;  %v9779_v21 = vld [vmem:[#allocation5 + $0xc98] ss:$40 sps:$4 sm:$0xff]   ;;  %v9784_v23 = vld [vmem:[#allocation5 + $0x16e4] ss:$40 sps:$4 sm:$0xff]  }
 0x2e5   : > { %5991 = vmatpush1.bf16.msra.mxu1 %v9743_v26  ;;  %v9782_v26 = vld [vmem:[#allocation5 + $0x16e0] ss:$40 sps:$4 sm:$0xff]  }
 0x2e6   : > { %5868 = vmatpush1.bf16.msra.mxu0 %v9740_v45  ;;  %5992 = vmatprep.subr.bf16.mxu1 %v9751_v30  ;;  %v9787_v45 = vld [vmem:[#allocation5 + $0xcec] ss:$40 sps:$4 sm:$0xff]  }
 0x2e7   : > { %5869 = vmatprep.subr.bf16.mxu0 %v9748_v28  ;;  %v9785_v28 = vld [vmem:[#allocation5 + $0xce8] ss:$40 sps:$4 sm:$0xff]   ;;  %v9790_v30 = vld [vmem:[#allocation5 + $0x1734] ss:$40 sps:$4 sm:$0xff]  }
 0x2e9   : > { %5993 = vmatpush1.bf16.msra.mxu1 %v9749_v34  ;;  %v9788_v34 = vld [vmem:[#allocation5 + $0x1730] ss:$40 sps:$4 sm:$0xff]  }
 0x2ea   : > { %5870 = vmatpush1.bf16.msra.mxu0 %v9746_v32  ;;  %5994 = vmatprep.subr.bf16.mxu1 %v9757_v36  ;;  %v9793_v32 = vld [vmem:[#allocation5 + $0xd3c] ss:$40 sps:$4 sm:$0xff]  }
 0x2eb   : > { %5871 = vmatprep.subr.bf16.mxu0 %v9754_v35  ;;  %v9791_v35 = vld [vmem:[#allocation5 + $0xd38] ss:$40 sps:$4 sm:$0xff]   ;;  %v9796_v36 = vld [vmem:[#allocation5 + $0x1784] ss:$40 sps:$4 sm:$0xff]  }
 0x2ed   : > { %5995 = vmatpush1.bf16.msra.mxu1 %v9755_v40  ;;  %v9794_v40 = vld [vmem:[#allocation5 + $0x1780] ss:$40 sps:$4 sm:$0xff]  }
 0x2ee   : > { %5872 = vmatpush1.bf16.msra.mxu0 %v9752_v38  ;;  %5996 = vmatprep.subr.bf16.mxu1 %v9763_v46  ;;  %v9799_v38 = vld [vmem:[#allocation5 + $0xd8c] ss:$40 sps:$4 sm:$0xff]  }
 0x2ef   : > { %5873 = vmatprep.subr.bf16.mxu0 %v9760_v43  ;;  %v9797_v43 = vld [vmem:[#allocation5 + $0xd88] ss:$40 sps:$4 sm:$0xff]   ;;  %v9802_v46 = vld [vmem:[#allocation5 + $0x17d4] ss:$40 sps:$4 sm:$0xff]  }
 0x2f1   : > { %5997 = vmatpush1.bf16.msra.mxu1 %v9761_v50  ;;  %v9800_v50 = vld [vmem:[#allocation5 + $0x17d0] ss:$40 sps:$4 sm:$0xff]  }
 0x2f2   : > { %5874 = vmatpush1.bf16.msra.mxu0 %v9758_v18  ;;  %5998 = vmatprep.subr.bf16.mxu1 %v9769_v56  ;;  %v9805_v18 = vld [vmem:[#allocation5 + $0xddc] ss:$40 sps:$4 sm:$0xff]  }
 0x2f3   : > { %5875 = vmatprep.subr.bf16.mxu0 %v9766_v19  ;;  %v9803_v19 = vld [vmem:[#allocation5 + $0xdd8] ss:$40 sps:$4 sm:$0xff]   ;;  %v9808_v56 = vld [vmem:[#allocation5 + $0x1824] ss:$40 sps:$4 sm:$0xff]  }
 0x2f5   : > { %5999 = vmatpush1.bf16.msra.mxu1 %v9767_v60  ;;  %v9806_v60 = vld [vmem:[#allocation5 + $0x1820] ss:$40 sps:$4 sm:$0xff]  }
 0x2f6   : > { %5876 = vmatpush1.bf16.msra.mxu0 %v9764_v59  ;;  %6000 = vmatprep.subr.bf16.mxu1 %v9775_v63  ;;  %v9811_v59 = vld [vmem:[#allocation5 + $0xe2c] ss:$40 sps:$4 sm:$0xff]  }
 0x2f7   : > { %5877 = vmatprep.subr.bf16.mxu0 %v9772_v61  ;;  %v9809_v61 = vld [vmem:[#allocation5 + $0xe28] ss:$40 sps:$4 sm:$0xff]   ;;  %v9814_v63 = vld [vmem:[#allocation5 + $0x1874] ss:$40 sps:$4 sm:$0xff]  }
 0x2f9   : > { %6001 = vmatpush1.bf16.msra.mxu1 %v9773_v8  ;;  %v9812_v8 = vld [vmem:[#allocation5 + $0x1870] ss:$40 sps:$4 sm:$0xff]  }
 0x2fa   : > { %5878 = vmatpush1.bf16.msra.mxu0 %v9770_v5  ;;  %6002 = vmatprep.subr.bf16.mxu1 %v9781_v15  ;;  %v9817_v5 = vld [vmem:[#allocation5 + $0xe7c] ss:$40 sps:$4 sm:$0xff]  }
 0x2fb   : > { %5879 = vmatprep.subr.bf16.mxu0 %v9778_v10  ;;  %v9815_v10 = vld [vmem:[#allocation5 + $0xe78] ss:$40 sps:$4 sm:$0xff]   ;;  %v9820_v15 = vld [vmem:[#allocation5 + $0x18c4] ss:$40 sps:$4 sm:$0xff]  }
 0x2fd   : > { %6003 = vmatpush1.bf16.msra.mxu1 %v9779_v21  ;;  %v9818_v21 = vld [vmem:[#allocation5 + $0x18c0] ss:$40 sps:$4 sm:$0xff]  }
 0x2fe   : > { %5880 = vmatpush1.bf16.msra.mxu0 %v9776_v53  ;;  %6004 = vmatprep.subr.bf16.mxu1 %v9787_v45  ;;  %v9823_v53 = vld [vmem:[#allocation5 + $0xecc] ss:$40 sps:$4 sm:$0xff]   ;;  %v9826_v45 = vld [vmem:[#allocation5 + $0xf1c] ss:$40 sps:$4 sm:$0xff]  }
 0x2ff   : > { %5881 = vmatprep.subr.bf16.mxu0 %v9784_v23  ;;  %v9821_v23 = vld [vmem:[#allocation5 + $0xec8] ss:$40 sps:$4 sm:$0xff]  }
 0x301   : > { %6005 = vmatpush1.bf16.msra.mxu1 %v9785_v28  ;;  %v9824_v28 = vld [vmem:[#allocation5 + $0xf18] ss:$40 sps:$4 sm:$0xff]  }
 0x302   : > { %5882 = vmatpush1.bf16.msra.mxu0 %v9782_v26  ;;  %6006 = vmatprep.subr.bf16.mxu1 %v9793_v32  ;;  %v9829_v26 = vld [vmem:[#allocation5 + $0x24] ss:$40 sps:$4 sm:$0xff]  }
 0x303   : > { %5883 = vmatprep.subr.bf16.mxu0 %v9790_v30  ;;  %v9827_v30 = vld [vmem:[#allocation5 + $0x20] ss:$40 sps:$4 sm:$0xff]   ;;  %v9832_v32 = vld [vmem:[#allocation5 + $0xf6c] ss:$40 sps:$4 sm:$0xff]  }
 0x305   : > { %6007 = vmatpush1.bf16.msra.mxu1 %v9791_v35  ;;  %v9830_v35 = vld [vmem:[#allocation5 + $0xf68] ss:$40 sps:$4 sm:$0xff]  }
 0x306   : > { %5884 = vmatpush1.bf16.msra.mxu0 %v9788_v34  ;;  %6008 = vmatprep.subr.bf16.mxu1 %v9799_v38  ;;  %v9835_v34 = vld [vmem:[#allocation5 + $0x74] ss:$40 sps:$4 sm:$0xff]  }
 0x307   : > { %5885 = vmatprep.subr.bf16.mxu0 %v9796_v36  ;;  %v9833_v36 = vld [vmem:[#allocation5 + $0x70] ss:$40 sps:$4 sm:$0xff]   ;;  %v9838_v38 = vld [vmem:[#allocation5 + $0xfbc] ss:$40 sps:$4 sm:$0xff]  }
 0x309   : > { %6009 = vmatpush1.bf16.msra.mxu1 %v9797_v43  ;;  %v9836_v43 = vld [vmem:[#allocation5 + $0xfb8] ss:$40 sps:$4 sm:$0xff]  }
 0x30a   : > { %5886 = vmatpush1.bf16.msra.mxu0 %v9794_v40  ;;  %6010 = vmatprep.subr.bf16.mxu1 %v9805_v18  ;;  %v9841_v40 = vld [vmem:[#allocation5 + $0xc4] ss:$40 sps:$4 sm:$0xff]  }
 0x30b   : > { %5887 = vmatprep.subr.bf16.mxu0 %v9802_v46  ;;  %v9839_v46 = vld [vmem:[#allocation5 + $0xc0] ss:$40 sps:$4 sm:$0xff]   ;;  %v9844_v18 = vld [vmem:[#allocation5 + $0x100c] ss:$40 sps:$4 sm:$0xff]  }
 0x30d   : > { %6011 = vmatpush1.bf16.msra.mxu1 %v9803_v19  ;;  %v9842_v19 = vld [vmem:[#allocation5 + $0x1008] ss:$40 sps:$4 sm:$0xff]  }
 0x30e   : > { %5888 = vmatpush1.bf16.msra.mxu0 %v9800_v50  ;;  %6012 = vmatprep.subr.bf16.mxu1 %v9811_v59  ;;  %v9847_v50 = vld [vmem:[#allocation5 + $0x114] ss:$40 sps:$4 sm:$0xff]  }
 0x30f   : > { %5889 = vmatprep.subr.bf16.mxu0 %v9808_v56  ;;  %v9845_v56 = vld [vmem:[#allocation5 + $0x110] ss:$40 sps:$4 sm:$0xff]   ;;  %v9850_v59 = vld [vmem:[#allocation5 + $0x105c] ss:$40 sps:$4 sm:$0xff]  }
 0x311   : > { %6013 = vmatpush1.bf16.msra.mxu1 %v9809_v61  ;;  %v9848_v61 = vld [vmem:[#allocation5 + $0x1058] ss:$40 sps:$4 sm:$0xff]  }
 0x312   : > { %5890 = vmatpush1.bf16.msra.mxu0 %v9806_v60  ;;  %6014 = vmatprep.subr.bf16.mxu1 %v9817_v5  ;;  %v9853_v60 = vld [vmem:[#allocation5 + $0x164] ss:$40 sps:$4 sm:$0xff]   ;;  %v9859_v5 = vld [vmem:[#allocation5 + $0x1b4] ss:$40 sps:$4 sm:$0xff]  }
 0x313   : > { %5891 = vmatprep.subr.bf16.mxu0 %v9814_v63  ;;  %v9856_v63 = vld [vmem:[#allocation5 + $0x10ac] ss:$40 sps:$4 sm:$0xff]  }
 0x315   : > { %6015 = vmatpush1.bf16.msra.mxu1 %v9815_v10  ;;  %v9857_v10 = vld [vmem:[#allocation5 + $0x1b0] ss:$40 sps:$4 sm:$0xff]  }
 0x316   : > { %5892 = vmatpush1.bf16.msra.mxu0 %v9812_v8  ;;  %6016 = vmatprep.subr.bf16.mxu1 %v9823_v53  ;;  %v9854_v8 = vld [vmem:[#allocation5 + $0x10a8] ss:$40 sps:$4 sm:$0xff]   ;;  %v9865_v53 = vld [vmem:[#allocation5 + $0x204] ss:$40 sps:$4 sm:$0xff]  }
 0x317   : > { %5893 = vmatprep.subr.bf16.mxu0 %v9820_v15  ;;  %v9862_v15 = vld [vmem:[#allocation5 + $0x10fc] ss:$40 sps:$4 sm:$0xff]  }
 0x319   : > { %6017 = vmatpush1.bf16.msra.mxu1 %v9821_v23 }
 0x31a   : > { %5894 = vmatpush1.bf16.msra.mxu0 %v9818_v21  ;;  %6027 = vmatprep.subr.bf16.mxu1 %v9826_v45 }
 0x31b   : > { %6109 = vmatprep.subr.bf16.mxu0 %v9829_v26  ;;  %v9860_v26 = vld [vmem:[#allocation5 + $0x10f8] ss:$40 sps:$4 sm:$0xff]  }
 0x31c   : > { %6019 = vmatmul.mubr.bf16.vlgmr.msra.gmra.mrb[8].mxu1 %v10868_v9 }
 0x31d   : > { %5896 = vmatmul.mubr.bf16.vlgmr.msra.gmra.mrb[4].mxu0 %v10914_v24  ;;  %6028 = vmatpush1.bf16.msra.mxu1 %v9824_v28  ;;  %v9863_v28 = vld [vmem:[#allocation5 + $0x200] ss:$40 sps:$4 sm:$0xff]  }
 0x31e   : > { %6110 = vmatpush1.bf16.msra.mxu0 %v9827_v30  ;;  %6029 = vmatprep.subr.bf16.mxu1 %v9832_v32  ;;  %v9868_v32 = vld [vmem:[#allocation5 + $0x114c] ss:$40 sps:$4 sm:$0xff]  }
 0x31f   : > { %6111 = vmatprep.subr.bf16.mxu0 %v9835_v34  ;;  %6059 = vmatprep.mubr.bf16.mxu1 %v10881_v22  ;;  %v9871_v34 = vld [vmem:[#allocation5 + $0x254] ss:$40 sps:$4 sm:$0xff]  }
 0x320   : > { %6141 = vmatprep.mubr.bf16.mxu0 %v10819_v2  ;;  %v9851_v2 = vld [vmem:[#allocation5 + $0x160] ss:$40 sps:$4 sm:$0xff]  }
 0x321   : > { %6030 = vmatpush1.bf16.msra.mxu1 %v9830_v35  ;;  %v9866_v35 = vld [vmem:[#allocation5 + $0x1148] ss:$40 sps:$4 sm:$0xff]  }
 0x322   : > { %6112 = vmatpush1.bf16.msra.mxu0 %v9833_v36  ;;  %6031 = vmatprep.subr.bf16.mxu1 %v9838_v38  ;;  %v9869_v36 = vld [vmem:[#allocation5 + $0x250] ss:$40 sps:$4 sm:$0xff]   ;;  %v9874_v38 = vld [vmem:[#allocation5 + $0x119c] ss:$40 sps:$4 sm:$0xff]  }
 0x323   : > { %6113 = vmatprep.subr.bf16.mxu0 %v9841_v40  ;;  %v9877_v40 = vld [vmem:[#allocation5 + $0x2a4] ss:$40 sps:$4 sm:$0xff]  }
 0x325   : > { %6032 = vmatpush1.bf16.msra.mxu1 %v9836_v43  ;;  %v9872_v43 = vld [vmem:[#allocation5 + $0x1198] ss:$40 sps:$4 sm:$0xff]  }
 0x326   : > { %6114 = vmatpush1.bf16.msra.mxu0 %v9839_v46  ;;  %6033 = vmatprep.subr.bf16.mxu1 %v9844_v18  ;;  %v9875_v46 = vld [vmem:[#allocation5 + $0x2a0] ss:$40 sps:$4 sm:$0xff]   ;;  %v9880_v18 = vld [vmem:[#allocation5 + $0x11ec] ss:$40 sps:$4 sm:$0xff]  }
 0x327   : > { %6115 = vmatprep.subr.bf16.mxu0 %v9847_v50  ;;  %v9883_v50 = vld [vmem:[#allocation5 + $0x2f4] ss:$40 sps:$4 sm:$0xff]  }
 0x329   : > { %6034 = vmatpush1.bf16.msra.mxu1 %v9842_v19  ;;  %v9878_v19 = vld [vmem:[#allocation5 + $0x11e8] ss:$40 sps:$4 sm:$0xff]  }
 0x32a   : > { %6116 = vmatpush1.bf16.msra.mxu0 %v9845_v56  ;;  %6035 = vmatprep.subr.bf16.mxu1 %v9850_v59  ;;  %v9881_v56 = vld [vmem:[#allocation5 + $0x2f0] ss:$40 sps:$4 sm:$0xff]   ;;  %v9886_v59 = vld [vmem:[#allocation5 + $0x123c] ss:$40 sps:$4 sm:$0xff]  }
 0x32b   : > { %6117 = vmatprep.subr.bf16.mxu0 %v9853_v60  ;;  %v9889_v60 = vld [vmem:[#allocation5 + $0x344] ss:$40 sps:$4 sm:$0xff]  }
 0x32d   : > { %6036 = vmatpush1.bf16.msra.mxu1 %v9848_v61  ;;  %v9884_v61 = vld [vmem:[#allocation5 + $0x1238] ss:$40 sps:$4 sm:$0xff]  }
 0x32e   : > { %6118 = vmatpush1.bf16.msra.mxu0 %v9851_v2  ;;  %6037 = vmatprep.subr.bf16.mxu1 %v9856_v63  ;;  %v9887_v2 = vld [vmem:[#allocation5 + $0x340] ss:$40 sps:$4 sm:$0xff]   ;;  %v9892_v63 = vld [vmem:[#allocation5 + $0x128c] ss:$40 sps:$4 sm:$0xff]  }
 0x32f   : > { %6119 = vmatprep.subr.bf16.mxu0 %v9859_v5  ;;  %v10950_v21 = vpop.f32.mrb[4].mxu1  ;;  %v9895_v5 = vld [vmem:[#allocation5 + $0x394] ss:$40 sps:$4 sm:$0xff]  }
 0x330   : > { %v10952_v23 = vpop.f32.mrb[5].mxu1 }
 0x331   : > { %v5696_v45 = vpop.f32.mrb[6].mxu1  ;;  %6038 = vmatpush1.bf16.msra.mxu1 %v9854_v8  ;;  %v9890_v8 = vld [vmem:[#allocation5 + $0x1288] ss:$40 sps:$4 sm:$0xff]  }
 0x332   : > { %6120 = vmatpush1.bf16.msra.mxu0 %v9857_v10  ;;  %v5697_v30 = vpop.f32.mrb[7].mxu1  ;;  %6039 = vmatprep.subr.bf16.mxu1 %v9862_v15  ;;  %v9893_v10 = vld [vmem:[#allocation5 + $0x390] ss:$40 sps:$4 sm:$0xff]   ;;  %v9898_v15 = vld [vmem:[#allocation5 + $0x12dc] ss:$40 sps:$4 sm:$0xff]  }
 0x333   : > { %6121 = vmatprep.subr.bf16.mxu0 %v9865_v53  ;;  %v9901_v53 = vld [vmem:[#allocation5 + $0x3e4] ss:$40 sps:$4 sm:$0xff]   ;;  %v9896_v45 = vld [vmem:[#allocation5 + $0x12d8] ss:$40 sps:$4 sm:$0xff]   ;;  %v9907_v30 = vld [vmem:[#allocation5 + $0x434] ss:$40 sps:$4 sm:$0xff]  }
 0x335   : > { %6040 = vmatpush1.bf16.msra.mxu1 %v9860_v26  ;;  %v9899_v26 = vld [vmem:[#allocation5 + $0x3e0] ss:$40 sps:$4 sm:$0xff]  }
 0x336   : > { %6122 = vmatpush1.bf16.msra.mxu0 %v9863_v28  ;;  %6041 = vmatprep.subr.bf16.mxu1 %v9868_v32  ;;  %v9904_v28 = vld [vmem:[#allocation5 + $0x132c] ss:$40 sps:$4 sm:$0xff]   ;;  %v9902_v32 = vld [vmem:[#allocation5 + $0x1328] ss:$40 sps:$4 sm:$0xff]  }
 0x337   : > { %6123 = vmatprep.subr.bf16.mxu0 %v9871_v34  ;;  %v9905_v34 = vld [vmem:[#allocation5 + $0x430] ss:$40 sps:$4 sm:$0xff]  }
 0x339   : > { %6042 = vmatpush1.bf16.msra.mxu1 %v9866_v35  ;;  %v9910_v35 = vld [vmem:[#allocation5 + $0x137c] ss:$40 sps:$4 sm:$0xff]  }
 0x33a   : > { %6124 = vmatpush1.bf16.msra.mxu0 %v9869_v36  ;;  %6043 = vmatprep.subr.bf16.mxu1 %v9874_v38  ;;  %v9913_v36 = vld [vmem:[#allocation5 + $0x484] ss:$40 sps:$4 sm:$0xff]   ;;  %v9908_v38 = vld [vmem:[#allocation5 + $0x1378] ss:$40 sps:$4 sm:$0xff]  }
 0x33b   : > { %6125 = vmatprep.subr.bf16.mxu0 %v9877_v40  ;;  %v9911_v40 = vld [vmem:[#allocation5 + $0x480] ss:$40 sps:$4 sm:$0xff]  }
 0x33d   : > { %6044 = vmatpush1.bf16.msra.mxu1 %v9872_v43  ;;  %v9916_v43 = vld [vmem:[#allocation5 + $0x13cc] ss:$40 sps:$4 sm:$0xff]  }
 0x33e   : > { %6126 = vmatpush1.bf16.msra.mxu0 %v9875_v46  ;;  %6045 = vmatprep.subr.bf16.mxu1 %v9880_v18  ;;  %v9919_v46 = vld [vmem:[#allocation5 + $0x4d4] ss:$40 sps:$4 sm:$0xff]   ;;  %v9914_v18 = vld [vmem:[#allocation5 + $0x13c8] ss:$40 sps:$4 sm:$0xff]  }
 0x33f   : > { %6127 = vmatprep.subr.bf16.mxu0 %v9883_v50  ;;  %v9917_v50 = vld [vmem:[#allocation5 + $0x4d0] ss:$40 sps:$4 sm:$0xff]  }
 0x341   : > { %6046 = vmatpush1.bf16.msra.mxu1 %v9878_v19  ;;  %v9922_v19 = vld [vmem:[#allocation5 + $0x141c] ss:$40 sps:$4 sm:$0xff]  }
 0x342   : > { %6128 = vmatpush1.bf16.msra.mxu0 %v9881_v56  ;;  %6047 = vmatprep.subr.bf16.mxu1 %v9886_v59  ;;  %v9925_v56 = vld [vmem:[#allocation5 + $0x524] ss:$40 sps:$4 sm:$0xff]   ;;  %v9920_v59 = vld [vmem:[#allocation5 + $0x1418] ss:$40 sps:$4 sm:$0xff]  }
 0x343   : > { %6129 = vmatprep.subr.bf16.mxu0 %v9889_v60  ;;  %v9923_v60 = vld [vmem:[#allocation5 + $0x520] ss:$40 sps:$4 sm:$0xff]  }
 0x345   : > { %6048 = vmatpush1.bf16.msra.mxu1 %v9884_v61  ;;  %v9928_v61 = vld [vmem:[#allocation5 + $0x146c] ss:$40 sps:$4 sm:$0xff]  }
 0x346   : > { %6130 = vmatpush1.bf16.msra.mxu0 %v9887_v2  ;;  %6049 = vmatprep.subr.bf16.mxu1 %v9892_v63  ;;  %v9931_v2 = vld [vmem:[#allocation5 + $0x574] ss:$40 sps:$4 sm:$0xff]   ;;  %v9926_v63 = vld [vmem:[#allocation5 + $0x1468] ss:$40 sps:$4 sm:$0xff]  }
 0x347   : > { %6131 = vmatprep.subr.bf16.mxu0 %v9895_v5  ;;  %v9929_v5 = vld [vmem:[#allocation5 + $0x570] ss:$40 sps:$4 sm:$0xff]  }
 0x349   : > { %6050 = vmatpush1.bf16.msra.mxu1 %v9890_v8  ;;  %v9934_v8 = vld [vmem:[#allocation5 + $0x14bc] ss:$40 sps:$4 sm:$0xff]  }
 0x34a   : > { %6132 = vmatpush1.bf16.msra.mxu0 %v9893_v10  ;;  %6051 = vmatprep.subr.bf16.mxu1 %v9898_v15  ;;  %v9937_v10 = vld [vmem:[#allocation5 + $0x5c4] ss:$40 sps:$4 sm:$0xff]   ;;  %v9932_v15 = vld [vmem:[#allocation5 + $0x14b8] ss:$40 sps:$4 sm:$0xff]  }
 0x34b   : > { %6133 = vmatprep.subr.bf16.mxu0 %v9901_v53  ;;  %v9935_v53 = vld [vmem:[#allocation5 + $0x5c0] ss:$40 sps:$4 sm:$0xff]  }
 0x34d   : > { %6052 = vmatpush1.bf16.msra.mxu1 %v9896_v45  ;;  %v9940_v45 = vld [vmem:[#allocation5 + $0x150c] ss:$40 sps:$4 sm:$0xff]  }
 0x34e   : > { %6134 = vmatpush1.bf16.msra.mxu0 %v9899_v26  ;;  %6053 = vmatprep.subr.bf16.mxu1 %v9904_v28  ;;  %v9938_v26 = vld [vmem:[#allocation5 + $0x1508] ss:$40 sps:$4 sm:$0xff]  }
 0x34f   : > { %6135 = vmatprep.subr.bf16.mxu0 %v9907_v30  ;;  %v9941_v28 = vld [vmem:[#allocation5 + $0x610] ss:$40 sps:$4 sm:$0xff]   ;;  %v9946_v30 = vld [vmem:[#allocation5 + $0x155c] ss:$40 sps:$4 sm:$0xff]  }
 0x351   : > { %6054 = vmatpush1.bf16.msra.mxu1 %v9902_v32  ;;  %v9949_v32 = vld [vmem:[#allocation5 + $0x664] ss:$40 sps:$4 sm:$0xff]  }
 0x352   : > { %6136 = vmatpush1.bf16.msra.mxu0 %v9905_v34  ;;  %6055 = vmatprep.subr.bf16.mxu1 %v9910_v35  ;;  %v9944_v34 = vld [vmem:[#allocation5 + $0x1558] ss:$40 sps:$4 sm:$0xff]   ;;  %v9952_v35 = vld [vmem:[#allocation5 + $0x15ac] ss:$40 sps:$4 sm:$0xff]  }
 0x353   : > { %6137 = vmatprep.subr.bf16.mxu0 %v9913_v36  ;;  %v9955_v36 = vld [vmem:[#allocation5 + $0x6b4] ss:$40 sps:$4 sm:$0xff]  }
 0x355   : > { %6056 = vmatpush1.bf16.msra.mxu1 %v9908_v38  ;;  %v9950_v38 = vld [vmem:[#allocation5 + $0x15a8] ss:$40 sps:$4 sm:$0xff]  }
 0x356   : > { %6138 = vmatpush1.bf16.msra.mxu0 %v9911_v40  ;;  %6057 = vmatprep.subr.bf16.mxu1 %v9916_v43  ;;  %v9953_v40 = vld [vmem:[#allocation5 + $0x6b0] ss:$40 sps:$4 sm:$0xff]   ;;  %v9958_v43 = vld [vmem:[#allocation5 + $0x15fc] ss:$40 sps:$4 sm:$0xff]  }
 0x357   : > { %6139 = vmatprep.subr.bf16.mxu0 %v9919_v46  ;;  %v9961_v46 = vld [vmem:[#allocation5 + $0x704] ss:$40 sps:$4 sm:$0xff]  }
 0x359   : > { %6058 = vmatpush1.bf16.msra.mxu1 %v9914_v18  ;;  %v9956_v18 = vld [vmem:[#allocation5 + $0x15f8] ss:$40 sps:$4 sm:$0xff]  }
 0x35a   : > { %6140 = vmatpush1.bf16.msra.mxu0 %v9917_v50  ;;  %6068 = vmatprep.subr.bf16.mxu1 %v9922_v19  ;;  %v9959_v50 = vld [vmem:[#allocation5 + $0x700] ss:$40 sps:$4 sm:$0xff]   ;;  %v9964_v19 = vld [vmem:[#allocation5 + $0x164c] ss:$40 sps:$4 sm:$0xff]  }
 0x35b   : > { %6150 = vmatprep.subr.bf16.mxu0 %v9925_v56  ;;  %v9967_v56 = vld [vmem:[#allocation5 + $0x754] ss:$40 sps:$4 sm:$0xff]  }
 0x35c   : > { %6060 = vmatmul.mubr.bf16.vlgmr.msra.gmra.mrb[8].mxu1 %v10901_v13 }
 0x35d   : > { %6142 = vmatmul.mubr.bf16.vlgmr.msra.gmra.mrb[8].mxu0 %v10840_v25  ;;  %6069 = vmatpush1.bf16.msra.mxu1 %v9920_v59  ;;  %v9943_v25 = vld [vmem:[#allocation5 + $0x614] ss:$40 sps:$4 sm:$0xff]   ;;  %v9962_v59 = vld [vmem:[#allocation5 + $0x1648] ss:$40 sps:$4 sm:$0xff]  }
 0x35e   : > { %6151 = vmatpush1.bf16.msra.mxu0 %v9923_v60  ;;  %6070 = vmatprep.subr.bf16.mxu1 %v9928_v61  ;;  %v9965_v60 = vld [vmem:[#allocation5 + $0x750] ss:$40 sps:$4 sm:$0xff]   ;;  %v9970_v61 = vld [vmem:[#allocation5 + $0x169c] ss:$40 sps:$4 sm:$0xff]  }
 0x35f   : > { %6152 = vmatprep.subr.bf16.mxu0 %v9931_v2  ;;  %6100 = vmatprep.mubr.bf16.mxu1 %v10903_v20  ;;  %v9973_v2 = vld [vmem:[#allocation5 + $0x7a4] ss:$40 sps:$4 sm:$0xff]  }
 0x360   : > { %6182 = vmatprep.mubr.bf16.mxu0 %v10821_v3  ;;  %v9947_v3 = vld [vmem:[#allocation5 + $0x660] ss:$40 sps:$4 sm:$0xff]  }
 0x361   : > { %6071 = vmatpush1.bf16.msra.mxu1 %v9926_v63  ;;  %v9968_v63 = vld [vmem:[#allocation5 + $0x1698] ss:$40 sps:$4 sm:$0xff]  }
 0x362   : > { %6153 = vmatpush1.bf16.msra.mxu0 %v9929_v5  ;;  %6072 = vmatprep.subr.bf16.mxu1 %v9934_v8  ;;  %v9971_v5 = vld [vmem:[#allocation5 + $0x7a0] ss:$40 sps:$4 sm:$0xff]   ;;  %v9976_v8 = vld [vmem:[#allocation5 + $0x16ec] ss:$40 sps:$4 sm:$0xff]  }
 0x363   : > { %6154 = vmatprep.subr.bf16.mxu0 %v9937_v10  ;;  %v9979_v10 = vld [vmem:[#allocation5 + $0x7f4] ss:$40 sps:$4 sm:$0xff]  }
 0x365   : > { %6073 = vmatpush1.bf16.msra.mxu1 %v9932_v15  ;;  %v9974_v15 = vld [vmem:[#allocation5 + $0x16e8] ss:$40 sps:$4 sm:$0xff]  }
 0x366   : > { %6155 = vmatpush1.bf16.msra.mxu0 %v9935_v53  ;;  %6074 = vmatprep.subr.bf16.mxu1 %v9940_v45  ;;  %v9977_v53 = vld [vmem:[#allocation5 + $0x7f0] ss:$40 sps:$4 sm:$0xff]   ;;  %v9982_v45 = vld [vmem:[#allocation5 + $0x173c] ss:$40 sps:$4 sm:$0xff]  }
 0x367   : > { %6156 = vmatprep.subr.bf16.mxu0 %v9943_v25  ;;  %v9985_v25 = vld [vmem:[#allocation5 + $0x844] ss:$40 sps:$4 sm:$0xff]  }
 0x369   : > { %6075 = vmatpush1.bf16.msra.mxu1 %v9938_v26  ;;  %v9980_v26 = vld [vmem:[#allocation5 + $0x1738] ss:$40 sps:$4 sm:$0xff]  }
 0x36a   : > { %6157 = vmatpush1.bf16.msra.mxu0 %v9941_v28  ;;  %6076 = vmatprep.subr.bf16.mxu1 %v9946_v30  ;;  %v9983_v28 = vld [vmem:[#allocation5 + $0x840] ss:$40 sps:$4 sm:$0xff]   ;;  %v9988_v30 = vld [vmem:[#allocation5 + $0x178c] ss:$40 sps:$4 sm:$0xff]  }
 0x36b   : > { %6158 = vmatprep.subr.bf16.mxu0 %v9949_v32  ;;  %v9991_v32 = vld [vmem:[#allocation5 + $0x894] ss:$40 sps:$4 sm:$0xff]  }
 0x36d   : > { %6077 = vmatpush1.bf16.msra.mxu1 %v9944_v34  ;;  %v9986_v34 = vld [vmem:[#allocation5 + $0x1788] ss:$40 sps:$4 sm:$0xff]  }
 0x36e   : > { %6159 = vmatpush1.bf16.msra.mxu0 %v9947_v3  ;;  %6078 = vmatprep.subr.bf16.mxu1 %v9952_v35  ;;  %v9989_v3 = vld [vmem:[#allocation5 + $0x890] ss:$40 sps:$4 sm:$0xff]   ;;  %v9994_v35 = vld [vmem:[#allocation5 + $0x17dc] ss:$40 sps:$4 sm:$0xff]  }
 0x36f   : > { %6160 = vmatprep.subr.bf16.mxu0 %v9955_v36  ;;  %v9997_v36 = vld [vmem:[#allocation5 + $0x8e4] ss:$40 sps:$4 sm:$0xff]  }
 0x371   : > { %6079 = vmatpush1.bf16.msra.mxu1 %v9950_v38  ;;  %v9992_v38 = vld [vmem:[#allocation5 + $0x17d8] ss:$40 sps:$4 sm:$0xff]  }
 0x372   : > { %6161 = vmatpush1.bf16.msra.mxu0 %v9953_v40  ;;  %6080 = vmatprep.subr.bf16.mxu1 %v9958_v43  ;;  %v9995_v40 = vld [vmem:[#allocation5 + $0x8e0] ss:$40 sps:$4 sm:$0xff]   ;;  %v10000_v43 = vld [vmem:[#allocation5 + $0x182c] ss:$40 sps:$4 sm:$0xff]  }
 0x373   : > { %6162 = vmatprep.subr.bf16.mxu0 %v9961_v46  ;;  %v10003_v46 = vld [vmem:[#allocation5 + $0x934] ss:$40 sps:$4 sm:$0xff]  }
 0x375   : > { %6081 = vmatpush1.bf16.msra.mxu1 %v9956_v18  ;;  %v9998_v18 = vld [vmem:[#allocation5 + $0x1828] ss:$40 sps:$4 sm:$0xff]  }
 0x376   : > { %6163 = vmatpush1.bf16.msra.mxu0 %v9959_v50  ;;  %6082 = vmatprep.subr.bf16.mxu1 %v9964_v19  ;;  %v10001_v50 = vld [vmem:[#allocation5 + $0x930] ss:$40 sps:$4 sm:$0xff]   ;;  %v10006_v19 = vld [vmem:[#allocation5 + $0x187c] ss:$40 sps:$4 sm:$0xff]  }
 0x377   : > { %6164 = vmatprep.subr.bf16.mxu0 %v9967_v56  ;;  %v10009_v56 = vld [vmem:[#allocation5 + $0x984] ss:$40 sps:$4 sm:$0xff]  }
 0x379   : > { %6083 = vmatpush1.bf16.msra.mxu1 %v9962_v59  ;;  %v10004_v59 = vld [vmem:[#allocation5 + $0x1878] ss:$40 sps:$4 sm:$0xff]  }
 0x37a   : > { %6165 = vmatpush1.bf16.msra.mxu0 %v9965_v60  ;;  %6084 = vmatprep.subr.bf16.mxu1 %v9970_v61  ;;  %v10007_v60 = vld [vmem:[#allocation5 + $0x980] ss:$40 sps:$4 sm:$0xff]   ;;  %v10012_v61 = vld [vmem:[#allocation5 + $0x18cc] ss:$40 sps:$4 sm:$0xff]  }
 0x37b   : > { %6166 = vmatprep.subr.bf16.mxu0 %v9973_v2  ;;  %v10015_v2 = vld [vmem:[#allocation5 + $0x9d4] ss:$40 sps:$4 sm:$0xff]  }
 0x37d   : > { %6085 = vmatpush1.bf16.msra.mxu1 %v9968_v63  ;;  %v6394_v63 = vld [vmem:[#allocation10 + $0x80] sm:$0xff] }
 0x37e   : > { %6167 = vmatpush1.bf16.msra.mxu0 %v9971_v5  ;;  %6086 = vmatprep.subr.bf16.mxu1 %v9976_v8  ;;  %v6395_v5 = vld [vmem:[#allocation10 + $0x88] sm:$0xff]  ;;  %v10010_v8 = vld [vmem:[#allocation5 + $0x18c8] ss:$40 sps:$4 sm:$0xff]  }
 0x37f   : > { %6168 = vmatprep.subr.bf16.mxu0 %v9979_v10  ;;  %v10013_v10 = vld [vmem:[#allocation5 + $0x9d0] ss:$40 sps:$4 sm:$0xff]  }
 0x381   : > { %6087 = vmatpush1.bf16.msra.mxu1 %v9974_v15  ;;  %v10018_v15 = vld [vmem:[#allocation5 + $0xa24] ss:$40 sps:$4 sm:$0xff]  }
 0x382   : > { %6169 = vmatpush1.bf16.msra.mxu0 %v9977_v53  ;;  %6088 = vmatprep.subr.bf16.mxu1 %v9982_v45  ;;  %v8588_v53 = vpack.c.bf16 %v6395_v5, %v6394_v63  ;;  %v6378_v45 = vld [vmem:[#allocation10] sm:$0xff]  ;;  %v6384_v5 = vld [vmem:[#allocation10 + $0x30] sm:$0xff] }
 0x383   : > { %6170 = vmatprep.subr.bf16.mxu0 %v9985_v25  ;;  %v6379_v25 = vld [vmem:[#allocation10 + $0x8] sm:$0xff] }
 0x385   : > { %6089 = vmatpush1.bf16.msra.mxu1 %v9980_v26  ;;  %v6396_v26 = vld [vmem:[#allocation10 + $0x90] sm:$0xff] }
 0x386   : > { %6171 = vmatpush1.bf16.msra.mxu0 %v9983_v28  ;;  %6090 = vmatprep.subr.bf16.mxu1 %v9988_v30  ;;  %v6397_v28 = vld [vmem:[#allocation10 + $0x98] sm:$0xff]  ;;  %v10016_v30 = vld [vmem:[#allocation5 + $0xa20] ss:$40 sps:$4 sm:$0xff]  }
 0x387   : > { %6172 = vmatprep.subr.bf16.mxu0 %v9991_v32  ;;  %v8590_v32 = vpack.c.bf16 %v6379_v25, %v6378_v45  ;;  %v6386_v25 = vld [vmem:[#allocation10 + $0x40] sm:$0xff] }
 0x389   : > { %6091 = vmatpush1.bf16.msra.mxu1 %v9986_v34  ;;  %v10021_v34 = vld [vmem:[#allocation5 + $0xa74] ss:$40 sps:$4 sm:$0xff]  }
 0x38a   : > { %6173 = vmatpush1.bf16.msra.mxu0 %v9989_v3  ;;  %6092 = vmatprep.subr.bf16.mxu1 %v9994_v35  ;;  %v8592_v3 = vpack.c.bf16 %v6397_v28, %v6396_v26  ;;  %v6380_v35 = vld [vmem:[#allocation10 + $0x10] sm:$0xff]  ;;  %v6387_v26 = vld [vmem:[#allocation10 + $0x48] sm:$0xff] }
 0x38b   : > { %6174 = vmatprep.subr.bf16.mxu0 %v9997_v36  ;;  %v6381_v36 = vld [vmem:[#allocation10 + $0x18] sm:$0xff]  ;;  %v6404_v28 = vld [vmem:[#allocation10 + $0xd0] sm:$0xff] }
 0x38d   : > { %6093 = vmatpush1.bf16.msra.mxu1 %v9992_v38  ;;  %v6398_v38 = vld [vmem:[#allocation10 + $0xa0] sm:$0xff] }
 0x38e   : > { %6175 = vmatpush1.bf16.msra.mxu0 %v9995_v40  ;;  %6094 = vmatprep.subr.bf16.mxu1 %v10000_v43  ;;  %v6399_v40 = vld [vmem:[#allocation10 + $0xa8] sm:$0xff]  ;;  %v10019_v43 = vld [vmem:[#allocation5 + $0xa70] ss:$40 sps:$4 sm:$0xff]  }
 0x38f   : > { %6176 = vmatprep.subr.bf16.mxu0 %v10003_v46  ;;  %v8594_v46 = vpack.c.bf16 %v6381_v36, %v6380_v35  ;;  %v6388_v36 = vld [vmem:[#allocation10 + $0x50] sm:$0xff] }
 0x391   : > { %6095 = vmatpush1.bf16.msra.mxu1 %v9998_v18  ;;  %v10024_v18 = vld [vmem:[#allocation5 + $0xac4] ss:$40 sps:$4 sm:$0xff]  }
 0x392   : > { %6177 = vmatpush1.bf16.msra.mxu0 %v10001_v50  ;;  %6096 = vmatprep.subr.bf16.mxu1 %v10006_v19  ;;  %v8596_v50 = vpack.c.bf16 %v6399_v40, %v6398_v38  ;;  %v6382_v19 = vld [vmem:[#allocation10 + $0x20] sm:$0xff]  ;;  %v6389_v38 = vld [vmem:[#allocation10 + $0x58] sm:$0xff] }
 0x393   : > { %6178 = vmatprep.subr.bf16.mxu0 %v10009_v56  ;;  %v6383_v56 = vld [vmem:[#allocation10 + $0x28] sm:$0xff]  ;;  %v6406_v40 = vld [vmem:[#allocation10 + $0xe0] sm:$0xff] }
 0x395   : > { %6097 = vmatpush1.bf16.msra.mxu1 %v10004_v59  ;;  %v6400_v59 = vld [vmem:[#allocation10 + $0xb0] sm:$0xff] }
 0x396   : > { %6179 = vmatpush1.bf16.msra.mxu0 %v10007_v60  ;;  %6098 = vmatprep.subr.bf16.mxu1 %v10012_v61  ;;  %v6401_v60 = vld [vmem:[#allocation10 + $0xb8] sm:$0xff]  ;;  %v8598_v61 = vpack.c.bf16 %v6383_v56, %v6382_v19  ;;  %v6390_v56 = vld [vmem:[#allocation10 + $0x60] sm:$0xff] }
 0x397   : > { %6180 = vmatprep.subr.bf16.mxu0 %v10015_v2  ;;  %v10027_v2 = vld [vmem:[#allocation5 + $0xb14] ss:$40 sps:$4 sm:$0xff]   ;;  %v8600_v63 = vpack.c.bf16 %v6401_v60, %v6400_v59  ;;  %v6408_v60 = vld [vmem:[#allocation10 + $0xf0] sm:$0xff] }
 0x398   : > { %v6391_v59 = vld [vmem:[#allocation10 + $0x68] sm:$0xff] }
 0x399   : > { %6099 = vmatpush1.bf16.msra.mxu1 %v10010_v8  ;;  %v6385_v8 = vld [vmem:[#allocation10 + $0x38] sm:$0xff] }
 0x39a   : > { %6181 = vmatpush1.bf16.msra.mxu0 %v10013_v10  ;;  %8589 = vmatprep.subr.bf16.mxu1 %v8588_v53  ;;  %v6402_v10 = vld [vmem:[#allocation10 + $0xc0] sm:$0xff]  ;;  %v8602_v45 = vpack.c.bf16 %v6385_v8, %v6384_v5  ;;  %v6392_v8 = vld [vmem:[#allocation10 + $0x70] sm:$0xff] }
 0x39b   : > { %6191 = vmatprep.subr.bf16.mxu0 %v10018_v15  ;;  %v6403_v15 = vld [vmem:[#allocation10 + $0xc8] sm:$0xff]  ;;  %v10025_v53 = vld [vmem:[#allocation5 + $0xb10] ss:$40 sps:$4 sm:$0xff]  }
 0x39c   : > { %6101 = vmatmul.mubr.bf16.vlgmr.msra.gmra.mrb[8].mxu1 %v10914_v24 }
 0x39d   : > { %6183 = vmatmul.mubr.bf16.vlgmr.msra.gmra.mrb[8].mxu0 %v10842_v27  ;;  %8591 = vmatpush3.bf16.msra.mxu1 %v8590_v32  ;;  %v10022_v27 = vld [vmem:[#allocation5 + $0xac0] ss:$40 sps:$4 sm:$0xff]  }
 0x39e   : > { %6192 = vmatpush1.bf16.msra.mxu0 %v10016_v30  ;;  %8593 = vmatprep.subr.bf16.mxu1 %v8592_v3  ;;  %v6405_v30 = vld [vmem:[#allocation10 + $0xd8] sm:$0xff]  ;;  %v10028_v32 = vld [vmem:[#allocation5 + $0xb60] ss:$40 sps:$4 sm:$0xff]   ;;  %v10033_v3 = vld [vmem:[#allocation5 + $0xbb4] ss:$40 sps:$4 sm:$0xff]  }
 0x39f   : > { %6193 = vmatprep.subr.bf16.mxu0 %v10021_v34  ;;  %6602 = vmatprep.mubr.f32.mxu1 %v406_v52  ;;  %v10030_v52 = vld [vmem:[#allocation5 + $0xb64] ss:$40 sps:$4 sm:$0xff]   ;;  %v8606_v34 = vpack.c.bf16 %v6387_v26, %v6386_v25  ;;  %v8608_v35 = vpack.c.bf16 %v6405_v30, %v6404_v28  ;;  %v6410_v26 = vld [vmem:[#allocation10 + $0x100] sm:$0xff]  ;;  %v6411_v28 = vld [vmem:[#allocation10 + $0x108] sm:$0xff] }
 0x3a0   : > { %6223 = vmatprep.mubr.bf16.mxu0 %v10857_v11  ;;  %v8604_v11 = vpack.c.bf16 %v6403_v15, %v6402_v10  ;;  %v6393_v10 = vld [vmem:[#allocation10 + $0x78] sm:$0xff]  ;;  %v6426_v15 = vld [vmem:[#allocation10 + $0x180] sm:$0xff]  ;;  %v6428_v30 = vld [vmem:[#allocation10 + $0x190] sm:$0xff] }
 0x3a1   : > { %8595 = vmatpush3.bf16.msra.mxu1 %v8594_v46  ;;  %v10031_v46 = vld [vmem:[#allocation5 + $0xbb0] ss:$40 sps:$4 sm:$0xff]  }
 0x3a2   : > { %6194 = vmatpush1.bf16.msra.mxu0 %v10019_v43  ;;  %8597 = vmatprep.subr.bf16.mxu1 %v8596_v50  ;;  %v6407_v43 = vld [vmem:[#allocation10 + $0xe8] sm:$0xff]  ;;  %v10036_v50 = vld [vmem:[#allocation5 + $0xc04] ss:$40 sps:$4 sm:$0xff]  }
 0x3a3   : > { %6195 = vmatprep.subr.bf16.mxu0 %v10024_v18  ;;  %v8610_v18 = vpack.c.bf16 %v6389_v38, %v6388_v36  ;;  %v8612_v19 = vpack.c.bf16 %v6407_v43, %v6406_v40  ;;  %v6412_v38 = vld [vmem:[#allocation10 + $0x110] sm:$0xff]  ;;  %v6413_v40 = vld [vmem:[#allocation10 + $0x118] sm:$0xff]  ;;  %v6430_v43 = vld [vmem:[#allocation10 + $0x1a0] sm:$0xff] }
 0x3a5   : > { %8599 = vmatpush3.bf16.msra.mxu1 %v8598_v61  ;;  %v10034_v61 = vld [vmem:[#allocation5 + $0xc00] ss:$40 sps:$4 sm:$0xff]  }
 0x3a6   : > { %6196 = vmatpush1.bf16.msra.mxu0 %v10022_v27  ;;  %8601 = vmatprep.subr.bf16.mxu1 %v8600_v63  ;;  %v6409_v27 = vld [vmem:[#allocation10 + $0xf8] sm:$0xff]  ;;  %v10039_v63 = vld [vmem:[#allocation5 + $0xc54] ss:$40 sps:$4 sm:$0xff]  }
 0x3a7   : > { %6197 = vmatprep.subr.bf16.mxu0 %v10027_v2  ;;  %v8614_v2 = vpack.c.bf16 %v6391_v59, %v6390_v56  ;;  %v8616_v5 = vpack.c.bf16 %v6409_v27, %v6408_v60  ;;  %v6414_v59 = vld [vmem:[#allocation10 + $0x120] sm:$0xff]  ;;  %v6415_v60 = vld [vmem:[#allocation10 + $0x128] sm:$0xff]  ;;  %v6432_v27 = vld [vmem:[#allocation10 + $0x1b0] sm:$0xff] }
 0x3a8   : > { %v8630_v51 = vpack.c.bf16 %v6415_v60, %v6414_v59  ;;  %v6440_v59 = vld [vmem:[#allocation10 + $0x1f0] sm:$0xff]  ;;  %v6441_v60 = vld [vmem:[#allocation10 + $0x1f8] sm:$0xff] }
 0x3a9   : > { %8603 = vmatpush3.bf16.msra.mxu1 %v8602_v45  ;;  %v10037_v45 = vld [vmem:[#allocation5 + $0xc50] ss:$40 sps:$4 sm:$0xff]  }
 0x3aa   : > { %6198 = vmatpush1.bf16.msra.mxu0 %v10025_v53  ;;  %8605 = vmatprep.subr.bf16.mxu1 %v8604_v11  ;;  %v6427_v53 = vld [vmem:[#allocation10 + $0x188] sm:$0xff]  ;;  %v10042_v11 = vld [vmem:[#allocation5 + $0xca4] ss:$40 sps:$4 sm:$0xff]  }
 0x3ab   : > { %6199 = vmatprep.subr.bf16.mxu0 %v10030_v52  ;;  %v8618_v52 = vpack.c.bf16 %v6393_v10, %v6392_v8  ;;  %v8620_v25 = vpack.c.bf16 %v6427_v53, %v6426_v15  ;;  %v6417_v8 = vld [vmem:[#allocation10 + $0x138] sm:$0xff]  ;;  %v6434_v10 = vld [vmem:[#allocation10 + $0x1c0] sm:$0xff]  ;;  %v6435_v15 = vld [vmem:[#allocation10 + $0x1c8] sm:$0xff] }
 0x3ac   : > { %v10049_v53 = vld [vmem:[#allocation5 + $0xd90] ss:$40 sps:$4 sm:$0xff]  }
 0x3ad   : > { %8607 = vmatpush3.bf16.msra.mxu1 %v8606_v34  ;;  %v10040_v34 = vld [vmem:[#allocation5 + $0xca0] ss:$40 sps:$4 sm:$0xff]  }
 0x3ae   : > { %6200 = vmatpush1.bf16.msra.mxu0 %v10028_v32  ;;  %8609 = vmatprep.subr.bf16.mxu1 %v8608_v35  ;;  %v6429_v32 = vld [vmem:[#allocation10 + $0x198] sm:$0xff]  ;;  %v10045_v35 = vld [vmem:[#allocation5 + $0xcf4] ss:$40 sps:$4 sm:$0xff]  }
 0x3af   : > { %6201 = vmatprep.subr.bf16.mxu0 %v10033_v3  ;;  %v8622_v3 = vpack.c.bf16 %v6411_v28, %v6410_v26  ;;  %v8624_v36 = vpack.c.bf16 %v6429_v32, %v6428_v30  ;;  %v6436_v26 = vld [vmem:[#allocation10 + $0x1d0] sm:$0xff]  ;;  %v6437_v28 = vld [vmem:[#allocation10 + $0x1d8] sm:$0xff] }
 0x3b0   : > { %v10052_v30 = vld [vmem:[#allocation5 + $0xde0] ss:$40 sps:$4 sm:$0xff]  }
 0x3b1   : > { %8611 = vmatpush3.bf16.msra.mxu1 %v8610_v18  ;;  %v10043_v18 = vld [vmem:[#allocation5 + $0xcf0] ss:$40 sps:$4 sm:$0xff]  }
 0x3b2   : > { %6202 = vmatpush1.bf16.msra.mxu0 %v10031_v46  ;;  %8613 = vmatprep.subr.bf16.mxu1 %v8612_v19  ;;  %v6431_v46 = vld [vmem:[#allocation10 + $0x1a8] sm:$0xff]  ;;  %v10048_v19 = vld [vmem:[#allocation5 + $0xd44] ss:$40 sps:$4 sm:$0xff]  }
 0x3b3   : > { %6203 = vmatprep.subr.bf16.mxu0 %v10036_v50  ;;  %v8626_v50 = vpack.c.bf16 %v6413_v40, %v6412_v38  ;;  %v8628_v56 = vpack.c.bf16 %v6431_v46, %v6430_v43  ;;  %v6438_v38 = vld [vmem:[#allocation10 + $0x1e0] sm:$0xff]  ;;  %v6439_v40 = vld [vmem:[#allocation10 + $0x1e8] sm:$0xff] }
 0x3b4   : > { %v10055_v43 = vld [vmem:[#allocation5 + $0xe30] ss:$40 sps:$4 sm:$0xff]  }
 0x3b5   : > { %8615 = vmatpush3.bf16.msra.mxu1 %v8614_v2  ;;  %v10046_v2 = vld [vmem:[#allocation5 + $0xd40] ss:$40 sps:$4 sm:$0xff]  }
 0x3b6   : > { %6204 = vmatpush1.bf16.msra.mxu0 %v10034_v61  ;;  %8617 = vmatprep.subr.bf16.mxu1 %v8616_v5  ;;  %v6433_v61 = vld [vmem:[#allocation10 + $0x1b8] sm:$0xff]  ;;  %v6416_v5 = vld [vmem:[#allocation10 + $0x130] sm:$0xff] }
 0x3b7   : > { %6205 = vmatprep.subr.bf16.mxu0 %v10039_v63  ;;  %v8632_v63 = vpack.c.bf16 %v6433_v61, %v6432_v27  ;;  %v10058_v27 = vld [vmem:[#allocation5 + $0xe80] ss:$40 sps:$4 sm:$0xff]  }
 0x3b9   : > { %8619 = vmatpush3.bf16.msra.mxu1 %v8618_v52  ;;  %v10054_v52 = vld [vmem:[#allocation5 + $0xde4] ss:$40 sps:$4 sm:$0xff]  }
 0x3ba   : > { %6206 = vmatpush1.bf16.msra.mxu0 %v10037_v45  ;;  %8621 = vmatprep.subr.bf16.mxu1 %v8620_v25  ;;  %v8634_v45 = vpack.c.bf16 %v6417_v8, %v6416_v5  ;;  %v6419_v25 = vld [vmem:[#allocation10 + $0x148] sm:$0xff]  ;;  %v6458_v5 = vld [vmem:[#allocation10 + $0x280] sm:$0xff] }
 0x3bb   : > { %6207 = vmatprep.subr.bf16.mxu0 %v10042_v11  ;;  %v6418_v11 = vld [vmem:[#allocation10 + $0x140] sm:$0xff]  ;;  %v6459_v8 = vld [vmem:[#allocation10 + $0x288] sm:$0xff] }
 0x3bc   : > { %6603 = vmatmul.mubr.f32.vlgmr.msra.gmra.mrb[12].mxu1 %v405_v12  ;;  %v10051_v12 = vld [vmem:[#allocation5 + $0xd94] ss:$40 sps:$4 sm:$0xff]   ;;  %v8638_v32 = vpack.c.bf16 %v6419_v25, %v6418_v11  ;;  %v6460_v11 = vld [vmem:[#allocation10 + $0x290] sm:$0xff]  ;;  %v6461_v25 = vld [vmem:[#allocation10 + $0x298] sm:$0xff] }
 0x3bd   : > { %8623 = vmatpush3.bf16.msra.mxu1 %v8622_v3  ;;  %6672 = vmatprep.mubr.f32.mxu1 %v408_v58  ;;  %v8636_v58 = vpack.c.bf16 %v6435_v15, %v6434_v10  ;;  %v8640_v3 = vpack.c.bf16 %v6437_v28, %v6436_v26  ;;  %v10061_v10 = vld [vmem:[#allocation5 + $0xed0] ss:$40 sps:$4 sm:$0xff]   ;;  %v10064_v26 = vld [vmem:[#allocation5 + $0xf20] ss:$40 sps:$4 sm:$0xff]  }
 0x3be   : > { %6208 = vmatpush1.bf16.msra.mxu0 %v10040_v34  ;;  %8625 = vmatprep.subr.bf16.mxu1 %v8624_v36  ;;  %v10057_v34 = vld [vmem:[#allocation5 + $0xe34] ss:$40 sps:$4 sm:$0xff]   ;;  %v6421_v36 = vld [vmem:[#allocation10 + $0x158] sm:$0xff] }
 0x3bf   : > { %6209 = vmatprep.subr.bf16.mxu0 %v10045_v35  ;;  %v6420_v35 = vld [vmem:[#allocation10 + $0x150] sm:$0xff] }
 0x3c0   : > { %v8642_v46 = vpack.c.bf16 %v6421_v36, %v6420_v35  ;;  %v6462_v35 = vld [vmem:[#allocation10 + $0x2a0] sm:$0xff]  ;;  %v6463_v36 = vld [vmem:[#allocation10 + $0x2a8] sm:$0xff] }
 0x3c1   : > { %8627 = vmatpush3.bf16.msra.mxu1 %v8626_v50  ;;  %v8644_v50 = vpack.c.bf16 %v6439_v40, %v6438_v38  ;;  %v10067_v38 = vld [vmem:[#allocation5 + $0xf70] ss:$40 sps:$4 sm:$0xff]  }
 0x3c2   : > { %6210 = vmatpush1.bf16.msra.mxu0 %v10043_v18  ;;  %8629 = vmatprep.subr.bf16.mxu1 %v8628_v56  ;;  %v10060_v18 = vld [vmem:[#allocation5 + $0xe84] ss:$40 sps:$4 sm:$0xff]   ;;  %v6423_v56 = vld [vmem:[#allocation10 + $0x168] sm:$0xff] }
 0x3c3   : > { %6211 = vmatprep.subr.bf16.mxu0 %v10048_v19  ;;  %v6422_v19 = vld [vmem:[#allocation10 + $0x160] sm:$0xff] }
 0x3c4   : > { %v8646_v61 = vpack.c.bf16 %v6423_v56, %v6422_v19  ;;  %v6464_v19 = vld [vmem:[#allocation10 + $0x2b0] sm:$0xff]  ;;  %v6465_v56 = vld [vmem:[#allocation10 + $0x2b8] sm:$0xff] }
 0x3c5   : > { %8631 = vmatpush3.bf16.msra.mxu1 %v8630_v51  ;;  %v8648_v51 = vpack.c.bf16 %v6441_v60, %v6440_v59  ;;  %v8664_v59 = vpack.c.bf16 %v6465_v56, %v6464_v19  ;;  %v6448_v60 = vld [vmem:[#allocation10 + $0x230] sm:$0xff]  ;;  %v10087_v56 = vld [vmem:[#allocation5 + $0x1154] ss:$40 sps:$4 sm:$0xff]  }
 0x3c6   : > { %6212 = vmatpush1.bf16.msra.mxu0 %v10046_v2  ;;  %8633 = vmatprep.subr.bf16.mxu1 %v8632_v63  ;;  %v10063_v2 = vld [vmem:[#allocation5 + $0xed4] ss:$40 sps:$4 sm:$0xff]   ;;  %v6425_v63 = vld [vmem:[#allocation10 + $0x178] sm:$0xff] }
 0x3c7   : > { %6213 = vmatprep.subr.bf16.mxu0 %v10051_v12  ;;  %v6424_v12 = vld [vmem:[#allocation10 + $0x170] sm:$0xff] }
 0x3c8   : > { %v8650_v15 = vpack.c.bf16 %v6425_v63, %v6424_v12  ;;  %v6450_v63 = vld [vmem:[#allocation10 + $0x240] sm:$0xff] }
 0x3c9   : > { %8635 = vmatpush3.bf16.msra.mxu1 %v8634_v45  ;;  %v8652_v45 = vpack.c.bf16 %v6459_v8, %v6458_v5  ;;  %v6451_v5 = vld [vmem:[#allocation10 + $0x248] sm:$0xff]  ;;  %v6468_v8 = vld [vmem:[#allocation10 + $0x2d0] sm:$0xff] }
 0x3ca   : > { %6214 = vmatpush1.bf16.msra.mxu0 %v10049_v53  ;;  %8637 = vmatprep.subr.bf16.mxu1 %v8636_v58  ;;  %v10066_v53 = vld [vmem:[#allocation5 + $0xf24] ss:$40 sps:$4 sm:$0xff]   ;;  %v6443_v58 = vld [vmem:[#allocation10 + $0x208] sm:$0xff] }
 0x3cb   : > { %6215 = vmatprep.subr.bf16.mxu0 %v10054_v52  ;;  %v6442_v52 = vld [vmem:[#allocation10 + $0x200] sm:$0xff] }
 0x3cc   : > { %v8654_v28 = vpack.c.bf16 %v6443_v58, %v6442_v52  ;;  %v6452_v58 = vld [vmem:[#allocation10 + $0x250] sm:$0xff] }
 0x3cd   : > { %8639 = vmatpush3.bf16.msra.mxu1 %v8638_v32  ;;  %v8656_v32 = vpack.c.bf16 %v6461_v25, %v6460_v11  ;;  %v6453_v11 = vld [vmem:[#allocation10 + $0x258] sm:$0xff]  ;;  %v6470_v25 = vld [vmem:[#allocation10 + $0x2e0] sm:$0xff] }
 0x3ce   : > { %6216 = vmatpush1.bf16.msra.mxu0 %v10052_v30  ;;  %8641 = vmatprep.subr.bf16.mxu1 %v8640_v3  ;;  %v10069_v30 = vld [vmem:[#allocation5 + $0xf74] ss:$40 sps:$4 sm:$0xff]   ;;  %v6445_v3 = vld [vmem:[#allocation10 + $0x218] sm:$0xff] }
 0x3cf   : > { %6217 = vmatprep.subr.bf16.mxu0 %v10057_v34  ;;  %v6444_v34 = vld [vmem:[#allocation10 + $0x210] sm:$0xff] }
 0x3d0   : > { %v8658_v40 = vpack.c.bf16 %v6445_v3, %v6444_v34  ;;  %v6454_v3 = vld [vmem:[#allocation10 + $0x260] sm:$0xff] }
 0x3d1   : > { %8643 = vmatpush3.bf16.msra.mxu1 %v8642_v46  ;;  %v8660_v46 = vpack.c.bf16 %v6463_v36, %v6462_v35  ;;  %v6455_v35 = vld [vmem:[#allocation10 + $0x268] sm:$0xff] }
 0x3d2   : > { %6218 = vmatpush1.bf16.msra.mxu0 %v10055_v43  ;;  %8645 = vmatprep.subr.bf16.mxu1 %v8644_v50  ;;  %v10072_v43 = vld [vmem:[#allocation5 + $0xfc4] ss:$40 sps:$4 sm:$0xff]   ;;  %v6447_v50 = vld [vmem:[#allocation10 + $0x228] sm:$0xff] }
 0x3d3   : > { %6219 = vmatprep.subr.bf16.mxu0 %v10060_v18  ;;  %v6446_v18 = vld [vmem:[#allocation10 + $0x220] sm:$0xff] }
 0x3d5   : > { %8647 = vmatpush3.bf16.msra.mxu1 %v8646_v61  ;;  %v6466_v61 = vld [vmem:[#allocation10 + $0x2c0] sm:$0xff] }
 0x3d6   : > { %6220 = vmatpush1.bf16.msra.mxu0 %v10058_v27  ;;  %8649 = vmatprep.subr.bf16.mxu1 %v8648_v51  ;;  %v6449_v27 = vld [vmem:[#allocation10 + $0x238] sm:$0xff] }
 0x3d7   : > { %6221 = vmatprep.subr.bf16.mxu0 %v10063_v2  ;;  %v6467_v2 = vld [vmem:[#allocation10 + $0x2c8] sm:$0xff]  ;;  %v10073_v51 = vld [vmem:[#allocation5 + $0x1010] ss:$40 sps:$4 sm:$0xff]   ;;  %v8666_v12 = vpack.c.bf16 %v6449_v27, %v6448_v60 }
 0x3d8   : > { %v6491_v60 = vld [vmem:[#allocation10 + $0x388] sm:$0xff]  ;;  %v10085_v27 = vld [vmem:[#allocation5 + $0x1150] ss:$40 sps:$4 sm:$0xff]  }
 0x3d9   : > { %8651 = vmatpush3.bf16.msra.mxu1 %v8650_v15  ;;  %v10076_v15 = vld [vmem:[#allocation5 + $0x1060] ss:$40 sps:$4 sm:$0xff]  }
 0x3da   : > { %6222 = vmatpush1.bf16.msra.mxu0 %v10061_v10  ;;  %8653 = vmatprep.subr.bf16.mxu1 %v8652_v45  ;;  %v6469_v10 = vld [vmem:[#allocation10 + $0x2d8] sm:$0xff]  ;;  %v10081_v45 = vld [vmem:[#allocation5 + $0x10b4] ss:$40 sps:$4 sm:$0xff]  }
 0x3db   : > { %6232 = vmatprep.subr.bf16.mxu0 %v10066_v53  ;;  %v8670_v53 = vpack.c.bf16 %v6451_v5, %v6450_v63  ;;  %v8672_v52 = vpack.c.bf16 %v6469_v10, %v6468_v8  ;;  %v6493_v63 = vld [vmem:[#allocation10 + $0x398] sm:$0xff]  ;;  %v10088_v5 = vld [vmem:[#allocation5 + $0x11a0] ss:$40 sps:$4 sm:$0xff]   ;;  %v10093_v10 = vld [vmem:[#allocation5 + $0x11f4] ss:$40 sps:$4 sm:$0xff]  }
 0x3dc   : > { %6673 = vmatmul.mubr.f32.vlgmr.msra.gmra.mrb[14].mxu1 %v407_v14  ;;  %v8662_v14 = vpack.c.bf16 %v6447_v50, %v6446_v18  ;;  %v10082_v18 = vld [vmem:[#allocation5 + $0x1100] ss:$40 sps:$4 sm:$0xff]   ;;  %v8678_v50 = vpack.c.bf16 %v6455_v35, %v6454_v3  ;;  %v6497_v3 = vld [vmem:[#allocation10 + $0x3b8] sm:$0xff] }
 0x3dd   : > { %6224 = vmatmul.mubr.bf16.vlgmr.msra.gmra.mrb[8].mxu0 %v10868_v9  ;;  %8655 = vmatpush3.bf16.msra.mxu1 %v8654_v28  ;;  %v10075_v9 = vld [vmem:[#allocation5 + $0x1014] ss:$40 sps:$4 sm:$0xff]   ;;  %v10079_v28 = vld [vmem:[#allocation5 + $0x10b0] ss:$40 sps:$4 sm:$0xff]   ;;  %v10094_v35 = vld [vmem:[#allocation5 + $0x1240] ss:$40 sps:$4 sm:$0xff]  }
 0x3de   : > { %6233 = vmatpush1.bf16.msra.mxu0 %v10064_v26  ;;  %8657 = vmatprep.subr.bf16.mxu1 %v8656_v32  ;;  %v6471_v26 = vld [vmem:[#allocation10 + $0x2e8] sm:$0xff]  ;;  %v10084_v32 = vld [vmem:[#allocation5 + $0x1104] ss:$40 sps:$4 sm:$0xff]  }
 0x3df   : > { %6234 = vmatprep.subr.bf16.mxu0 %v10069_v30  ;;  %6742 = vmatprep.mubr.f32.mxu1 %v410_v1  ;;  %v10078_v1 = vld [vmem:[#allocation5 + $0x1064] ss:$40 sps:$4 sm:$0xff]   ;;  %v8674_v30 = vpack.c.bf16 %v6453_v11, %v6452_v58  ;;  %v8676_v34 = vpack.c.bf16 %v6471_v26, %v6470_v25  ;;  %v6495_v58 = vld [vmem:[#allocation10 + $0x3a8] sm:$0xff]  ;;  %v10091_v11 = vld [vmem:[#allocation5 + $0x11f0] ss:$40 sps:$4 sm:$0xff]  }
 0x3e0   : > { %6264 = vmatprep.mubr.bf16.mxu0 %v10881_v22  ;;  %v8668_v22 = vpack.c.bf16 %v6467_v2, %v6466_v61  ;;  %v10090_v2 = vld [vmem:[#allocation5 + $0x11a4] ss:$40 sps:$4 sm:$0xff]  }
 0x3e1   : > { %8659 = vmatpush3.bf16.msra.mxu1 %v8658_v40  ;;  %v6473_v40 = vld [vmem:[#allocation10 + $0x2f8] sm:$0xff] }
 0x3e2   : > { %6235 = vmatpush1.bf16.msra.mxu0 %v10067_v38  ;;  %8661 = vmatprep.subr.bf16.mxu1 %v8660_v46  ;;  %v6472_v38 = vld [vmem:[#allocation10 + $0x2f0] sm:$0xff] }
 0x3e3   : > { %6236 = vmatprep.subr.bf16.mxu0 %v10072_v43  ;;  %v10096_v26 = vld [vmem:[#allocation5 + $0x1244] ss:$40 sps:$4 sm:$0xff]  }
 0x3e5   : > { %8663 = vmatpush3.bf16.msra.mxu1 %v8662_v14  ;;  %v6456_v14 = vld [vmem:[#allocation10 + $0x270] sm:$0xff] }
 0x3e6   : > { %6237 = vmatpush1.bf16.msra.mxu0 %v10070_v54  ;;  %8665 = vmatprep.subr.bf16.mxu1 %v8664_v59  ;;  %v8680_v54 = vpack.c.bf16 %v6473_v40, %v6472_v38  ;;  %v6490_v59 = vld [vmem:[#allocation10 + $0x380] sm:$0xff]  ;;  %v6480_v40 = vld [vmem:[#allocation10 + $0x330] sm:$0xff] }
 0x3e7   : > { %6238 = vmatprep.subr.bf16.mxu0 %v10075_v9  ;;  %v6457_v9 = vld [vmem:[#allocation10 + $0x278] sm:$0xff] }
 0x3e8   : > { %v8682_v61 = vpack.c.bf16 %v6457_v9, %v6456_v14  ;;  %v6482_v14 = vld [vmem:[#allocation10 + $0x340] sm:$0xff]  ;;  %v6483_v9 = vld [vmem:[#allocation10 + $0x348] sm:$0xff] }
 0x3e9   : > { %8667 = vmatpush3.bf16.msra.mxu1 %v8666_v12  ;;  %v6474_v12 = vld [vmem:[#allocation10 + $0x300] sm:$0xff] }
 0x3ea   : > { %6239 = vmatpush1.bf16.msra.mxu0 %v10073_v51  ;;  %8669 = vmatprep.subr.bf16.mxu1 %v8668_v22  ;;  %v8684_v51 = vpack.c.bf16 %v6491_v60, %v6490_v59  ;;  %v6492_v22 = vld [vmem:[#allocation10 + $0x390] sm:$0xff]  ;;  %v6501_v60 = vld [vmem:[#allocation10 + $0x3d8] sm:$0xff] }
 0x3eb   : > { %6240 = vmatprep.subr.bf16.mxu0 %v10078_v1  ;;  %v6475_v1 = vld [vmem:[#allocation10 + $0x308] sm:$0xff]  ;;  %v6500_v59 = vld [vmem:[#allocation10 + $0x3d0] sm:$0xff] }
 0x3ec   : > { %v8686_v8 = vpack.c.bf16 %v6475_v1, %v6474_v12  ;;  %v6484_v12 = vld [vmem:[#allocation10 + $0x350] sm:$0xff]  ;;  %v6485_v1 = vld [vmem:[#allocation10 + $0x358] sm:$0xff] }
 0x3ed   : > { %8671 = vmatpush3.bf16.msra.mxu1 %v8670_v53  ;;  %v6476_v53 = vld [vmem:[#allocation10 + $0x310] sm:$0xff] }
 0x3ee   : > { %6241 = vmatpush1.bf16.msra.mxu0 %v10076_v15  ;;  %8673 = vmatprep.subr.bf16.mxu1 %v8672_v52  ;;  %v8688_v15 = vpack.c.bf16 %v6493_v63, %v6492_v22  ;;  %v6494_v52 = vld [vmem:[#allocation10 + $0x3a0] sm:$0xff]  ;;  %v6503_v63 = vld [vmem:[#allocation10 + $0x3e8] sm:$0xff] }
 0x3ef   : > { %6242 = vmatprep.subr.bf16.mxu0 %v10081_v45  ;;  %v6477_v45 = vld [vmem:[#allocation10 + $0x318] sm:$0xff]  ;;  %v6502_v22 = vld [vmem:[#allocation10 + $0x3e0] sm:$0xff] }
 0x3f0   : > { %v10973_v36 = vpop.f32.mrb[4].mxu0  ;;  %v8690_v25 = vpack.c.bf16 %v6477_v45, %v6476_v53  ;;  %v6486_v53 = vld [vmem:[#allocation10 + $0x360] sm:$0xff]  ;;  %v6487_v45 = vld [vmem:[#allocation10 + $0x368] sm:$0xff] }
 0x3f1   : > { %v10975_v43 = vpop.f32.mrb[5].mxu0  ;;  %8675 = vmatpush3.bf16.msra.mxu1 %v8674_v30  ;;  %v6478_v30 = vld [vmem:[#allocation10 + $0x320] sm:$0xff] }
 0x3f2   : > { %v5901_v46 = vpop.f32.mrb[6].mxu0  ;;  %6243 = vmatpush1.bf16.msra.mxu0 %v10079_v28  ;;  %8677 = vmatprep.subr.bf16.mxu1 %v8676_v34  ;;  %v8692_v28 = vpack.c.bf16 %v6495_v58, %v6494_v52  ;;  %v6496_v34 = vld [vmem:[#allocation10 + $0x3b0] sm:$0xff]  ;;  %v6505_v58 = vld [vmem:[#allocation10 + $0x3f8] sm:$0xff] }
 0x3f3   : > { %v5902_v19 = vpop.f32.mrb[7].mxu0  ;;  %6244 = vmatprep.subr.bf16.mxu0 %v10084_v32  ;;  %v6479_v32 = vld [vmem:[#allocation10 + $0x328] sm:$0xff]  ;;  %v8696_v38 = vpack.c.bf16 %v6497_v3, %v6496_v34  ;;  %v6481_v46 = vld [vmem:[#allocation10 + $0x338] sm:$0xff]  ;;  %v6504_v52 = vld [vmem:[#allocation10 + $0x3f0] sm:$0xff] }
 0x3f4   : > { %v8694_v62 = vpack.c.bf16 %v6479_v32, %v6478_v30  ;;  %v10097_v19 = vld [vmem:[#allocation5 + $0x1290] ss:$40 sps:$4 sm:$0xff]   ;;  %v6488_v30 = vld [vmem:[#allocation10 + $0x370] sm:$0xff]  ;;  %v6523_v3 = vld [vmem:[#allocation10 + $0x488] sm:$0xff] }
 0x3f5   : > { %8679 = vmatpush3.bf16.msra.mxu1 %v8678_v50  ;;  %v6499_v50 = vld [vmem:[#allocation10 + $0x3c8] sm:$0xff]  ;;  %v6489_v32 = vld [vmem:[#allocation10 + $0x378] sm:$0xff]  ;;  %v6522_v34 = vld [vmem:[#allocation10 + $0x480] sm:$0xff] }
 0x3f6   : > { %6245 = vmatpush1.bf16.msra.mxu0 %v10082_v18  ;;  %8681 = vmatprep.subr.bf16.mxu1 %v8680_v54  ;;  %v6498_v18 = vld [vmem:[#allocation10 + $0x3c0] sm:$0xff]  ;;  %v10102_v54 = vld [vmem:[#allocation5 + $0x12e4] ss:$40 sps:$4 sm:$0xff]  }
 0x3f7   : > { %6246 = vmatprep.subr.bf16.mxu0 %v10087_v56  ;;  %v8698_v56 = vpack.c.bf16 %v6481_v46, %v6480_v40  ;;  %v6506_v40 = vld [vmem:[#allocation10 + $0x400] sm:$0xff]  ;;  %v6507_v46 = vld [vmem:[#allocation10 + $0x408] sm:$0xff] }
 0x3f9   : > { %8683 = vmatpush3.bf16.msra.mxu1 %v8682_v61  ;;  %v8702_v61 = vpack.c.bf16 %v6483_v9, %v6482_v14  ;;  %v6508_v14 = vld [vmem:[#allocation10 + $0x410] sm:$0xff]  ;;  %v6509_v9 = vld [vmem:[#allocation10 + $0x418] sm:$0xff] }
 0x3fa   : > { %6247 = vmatpush1.bf16.msra.mxu0 %v10085_v27  ;;  %8685 = vmatprep.subr.bf16.mxu1 %v8684_v51  ;;  %v10100_v27 = vld [vmem:[#allocation5 + $0x12e0] ss:$40 sps:$4 sm:$0xff]   ;;  %v8704_v51 = vpack.c.bf16 %v6501_v60, %v6500_v59  ;;  %v6526_v59 = vld [vmem:[#allocation10 + $0x4a0] sm:$0xff] }
 0x3fb   : > { %6248 = vmatprep.subr.bf16.mxu0 %v10090_v2  ;;  %v10105_v2 = vld [vmem:[#allocation5 + $0x1334] ss:$40 sps:$4 sm:$0xff]  }
 0x3fc   : > { %6743 = vmatmul.mubr.f32.vlgmr.msra.gmra.mrb[16].mxu1 %v409_v49  ;;  %v10099_v49 = vld [vmem:[#allocation5 + $0x1294] ss:$40 sps:$4 sm:$0xff]  }
 0x3fd   : > { %8687 = vmatpush3.bf16.msra.mxu1 %v8686_v8  ;;  %6812 = vmatprep.mubr.f32.mxu1 %v412_v17  ;;  %v8700_v17 = vpack.c.bf16 %v6499_v50, %v6498_v18  ;;  %v8706_v8 = vpack.c.bf16 %v6485_v1, %v6484_v12  ;;  %v6524_v18 = vld [vmem:[#allocation10 + $0x490] sm:$0xff]  ;;  %v6525_v50 = vld [vmem:[#allocation10 + $0x498] sm:$0xff]  ;;  %v6527_v60 = vld [vmem:[#allocation10 + $0x4a8] sm:$0xff] }
 0x3fe   : > { %6249 = vmatpush1.bf16.msra.mxu0 %v10088_v5  ;;  %8689 = vmatprep.subr.bf16.mxu1 %v8688_v15  ;;  %v10103_v5 = vld [vmem:[#allocation5 + $0x1330] ss:$40 sps:$4 sm:$0xff]   ;;  %v8708_v15 = vpack.c.bf16 %v6503_v63, %v6502_v22  ;;  %v6511_v1 = vld [vmem:[#allocation10 + $0x428] sm:$0xff]  ;;  %v6528_v22 = vld [vmem:[#allocation10 + $0x4b0] sm:$0xff] }
 0x3ff   : > { %6250 = vmatprep.subr.bf16.mxu0 %v10093_v10  ;;  %v10108_v10 = vld [vmem:[#allocation5 + $0x1384] ss:$40 sps:$4 sm:$0xff]   ;;  %v6510_v12 = vld [vmem:[#allocation10 + $0x420] sm:$0xff] }
 0x400   : > { %v6529_v63 = vld [vmem:[#allocation10 + $0x4b8] sm:$0xff] }
 0x401   : > { %8691 = vmatpush3.bf16.msra.mxu1 %v8690_v25  ;;  %v8710_v25 = vpack.c.bf16 %v6487_v45, %v6486_v53  ;;  %v6531_v53 = vld [vmem:[#allocation10 + $0x4c8] sm:$0xff]  ;;  %v10121_v45 = vld [vmem:[#allocation5 + $0x1510] ss:$40 sps:$4 sm:$0xff]  }
 0x402   : > { %6251 = vmatpush1.bf16.msra.mxu0 %v10091_v11  ;;  %8693 = vmatprep.subr.bf16.mxu1 %v8692_v28  ;;  %v10106_v11 = vld [vmem:[#allocation5 + $0x1380] ss:$40 sps:$4 sm:$0xff]   ;;  %v8712_v28 = vpack.c.bf16 %v6505_v58, %v6504_v52  ;;  %v6514_v58 = vld [vmem:[#allocation10 + $0x440] sm:$0xff] }
 0x403   : > { %6252 = vmatprep.subr.bf16.mxu0 %v10096_v26  ;;  %v10111_v26 = vld [vmem:[#allocation5 + $0x13d4] ss:$40 sps:$4 sm:$0xff]  }
 0x405   : > { %8695 = vmatpush3.bf16.msra.mxu1 %v8694_v62  ;;  %v8714_v62 = vpack.c.bf16 %v6489_v32, %v6488_v30  ;;  %v10129_v32 = vld [vmem:[#allocation5 + $0x15b4] ss:$40 sps:$4 sm:$0xff]  }
 0x406   : > { %6253 = vmatpush1.bf16.msra.mxu0 %v10094_v35  ;;  %8697 = vmatprep.subr.bf16.mxu1 %v8696_v38  ;;  %v10109_v35 = vld [vmem:[#allocation5 + $0x13d0] ss:$40 sps:$4 sm:$0xff]   ;;  %v8716_v38 = vpack.c.bf16 %v6523_v3, %v6522_v34  ;;  %v6516_v3 = vld [vmem:[#allocation10 + $0x450] sm:$0xff] }
 0x407   : > { %6254 = vmatprep.subr.bf16.mxu0 %v10099_v49  ;;  %v10114_v49 = vld [vmem:[#allocation5 + $0x1424] ss:$40 sps:$4 sm:$0xff]  }
 0x409   : > { %8699 = vmatpush3.bf16.msra.mxu1 %v8698_v56  ;;  %v8718_v56 = vpack.c.bf16 %v6507_v46, %v6506_v40  ;;  %v10132_v46 = vld [vmem:[#allocation5 + $0x1604] ss:$40 sps:$4 sm:$0xff]  }
 0x40a   : > { %6255 = vmatpush1.bf16.msra.mxu0 %v10097_v19  ;;  %8701 = vmatprep.subr.bf16.mxu1 %v8700_v17  ;;  %v10112_v19 = vld [vmem:[#allocation5 + $0x1420] ss:$40 sps:$4 sm:$0xff]   ;;  %v8720_v17 = vpack.c.bf16 %v6525_v50, %v6524_v18  ;;  %v6518_v50 = vld [vmem:[#allocation10 + $0x460] sm:$0xff] }
 0x40b   : > { %6256 = vmatprep.subr.bf16.mxu0 %v10102_v54  ;;  %v10117_v54 = vld [vmem:[#allocation5 + $0x1474] ss:$40 sps:$4 sm:$0xff]  }
 0x40d   : > { %8703 = vmatpush3.bf16.msra.mxu1 %v8702_v61  ;;  %v8722_v61 = vpack.c.bf16 %v6509_v9, %v6508_v14  ;;  %v10135_v9 = vld [vmem:[#allocation5 + $0x1654] ss:$40 sps:$4 sm:$0xff]  }
 0x40e   : > { %6257 = vmatpush1.bf16.msra.mxu0 %v10100_v27  ;;  %8705 = vmatprep.subr.bf16.mxu1 %v8704_v51  ;;  %v10115_v27 = vld [vmem:[#allocation5 + $0x1470] ss:$40 sps:$4 sm:$0xff]   ;;  %v8724_v51 = vpack.c.bf16 %v6527_v60, %v6526_v59  ;;  %v6520_v60 = vld [vmem:[#allocation10 + $0x470] sm:$0xff] }
 0x40f   : > { %6258 = vmatprep.subr.bf16.mxu0 %v10105_v2  ;;  %v10120_v2 = vld [vmem:[#allocation5 + $0x14c4] ss:$40 sps:$4 sm:$0xff]  }
 0x411   : > { %8707 = vmatpush3.bf16.msra.mxu1 %v8706_v8  ;;  %v6512_v8 = vld [vmem:[#allocation10 + $0x430] sm:$0xff] }
 0x412   : > { %6259 = vmatpush1.bf16.msra.mxu0 %v10103_v5  ;;  %8709 = vmatprep.subr.bf16.mxu1 %v8708_v15  ;;  %v8728_v5 = vpack.c.bf16 %v6529_v63, %v6528_v22  ;;  %v6530_v15 = vld [vmem:[#allocation10 + $0x4c0] sm:$0xff]  ;;  %v10144_v63 = vld [vmem:[#allocation5 + $0x1744] ss:$40 sps:$4 sm:$0xff]  }
 0x413   : > { %6260 = vmatprep.subr.bf16.mxu0 %v10108_v10  ;;  %v6513_v10 = vld [vmem:[#allocation10 + $0x438] sm:$0xff] }
 0x414   : > { %v8730_v52 = vpack.c.bf16 %v6513_v10, %v6512_v8  ;;  %v10139_v22 = vld [vmem:[#allocation5 + $0x16f0] ss:$40 sps:$4 sm:$0xff]   ;;  %v10148_v8 = vld [vmem:[#allocation5 + $0x17e0] ss:$40 sps:$4 sm:$0xff]   ;;  %v10153_v10 = vld [vmem:[#allocation5 + $0x1834] ss:$40 sps:$4 sm:$0xff]  }
 0x415   : > { %8711 = vmatpush3.bf16.msra.mxu1 %v8710_v25  ;;  %v6532_v25 = vld [vmem:[#allocation10 + $0x4d0] sm:$0xff] }
 0x416   : > { %6261 = vmatpush1.bf16.msra.mxu0 %v10106_v11  ;;  %8713 = vmatprep.subr.bf16.mxu1 %v8712_v28  ;;  %v6515_v11 = vld [vmem:[#allocation10 + $0x448] sm:$0xff] }
 0x417   : > { %6262 = vmatprep.subr.bf16.mxu0 %v10111_v26  ;;  %v6533_v26 = vld [vmem:[#allocation10 + $0x4d8] sm:$0xff]  ;;  %v10124_v28 = vld [vmem:[#allocation5 + $0x1560] ss:$40 sps:$4 sm:$0xff]   ;;  %v8734_v30 = vpack.c.bf16 %v6515_v11, %v6514_v58 }
 0x418   : > { %v8736_v34 = vpack.c.bf16 %v6533_v26, %v6532_v25 }
 0x419   : > { %8715 = vmatpush3.bf16.msra.mxu1 %v8714_v62  ;;  %v6534_v62 = vld [vmem:[#allocation10 + $0x4e0] sm:$0xff] }
 0x41a   : > { %6263 = vmatpush1.bf16.msra.mxu0 %v10109_v35  ;;  %8717 = vmatprep.subr.bf16.mxu1 %v8716_v38  ;;  %v6517_v35 = vld [vmem:[#allocation10 + $0x458] sm:$0xff] }
 0x41b   : > { %6273 = vmatprep.subr.bf16.mxu0 %v10114_v49  ;;  %v6535_v49 = vld [vmem:[#allocation10 + $0x4e8] sm:$0xff]  ;;  %v10127_v38 = vld [vmem:[#allocation5 + $0x15b0] ss:$40 sps:$4 sm:$0xff]   ;;  %v8738_v40 = vpack.c.bf16 %v6517_v35, %v6516_v3 }
 0x41c   : > { %6813 = vmatmul.mubr.f32.vlgmr.msra.gmra.mrb[18].mxu1 %v411_v39  ;;  %v8726_v39 = vpack.c.bf16 %v6511_v1, %v6510_v12  ;;  %v8740_v18 = vpack.c.bf16 %v6535_v49, %v6534_v62  ;;  %v10136_v12 = vld [vmem:[#allocation5 + $0x16a0] ss:$40 sps:$4 sm:$0xff]   ;;  %v10141_v1 = vld [vmem:[#allocation5 + $0x16f4] ss:$40 sps:$4 sm:$0xff]  }
 0x41d   : > { %6265 = vmatmul.mubr.bf16.vlgmr.msra.gmra.mrb[8].mxu0 %v10901_v13  ;;  %8719 = vmatpush3.bf16.msra.mxu1 %v8718_v56  ;;  %v10123_v13 = vld [vmem:[#allocation5 + $0x1514] ss:$40 sps:$4 sm:$0xff]   ;;  %v6536_v56 = vld [vmem:[#allocation10 + $0x4f0] sm:$0xff] }
 0x41e   : > { %6274 = vmatpush1.bf16.msra.mxu0 %v10112_v19  ;;  %8721 = vmatprep.subr.bf16.mxu1 %v8720_v17  ;;  %v6519_v19 = vld [vmem:[#allocation10 + $0x468] sm:$0xff] }
 0x41f   : > { %6275 = vmatprep.subr.bf16.mxu0 %v10117_v54  ;;  %6882 = vmatprep.mubr.f32.mxu1 %v414_v57  ;;  %v10126_v57 = vld [vmem:[#allocation5 + $0x1564] ss:$40 sps:$4 sm:$0xff]   ;;  %v10130_v17 = vld [vmem:[#allocation5 + $0x1600] ss:$40 sps:$4 sm:$0xff]   ;;  %v8742_v14 = vpack.c.bf16 %v6519_v19, %v6518_v50 }
 0x420   : > { %6305 = vmatprep.mubr.bf16.mxu0 %v10903_v20  ;;  %v8732_v20 = vpack.c.bf16 %v6531_v53, %v6530_v15  ;;  %v6537_v54 = vld [vmem:[#allocation10 + $0x4f8] sm:$0xff]  ;;  %v10159_v53 = vld [vmem:[#allocation5 + $0x18d4] ss:$40 sps:$4 sm:$0xff]  }
 0x421   : > { %8723 = vmatpush3.bf16.msra.mxu1 %v8722_v61  ;;  %v8744_v59 = vpack.c.bf16 %v6537_v54, %v6536_v56  ;;  %v10133_v61 = vld [vmem:[#allocation5 + $0x1650] ss:$40 sps:$4 sm:$0xff]  }
 0x422   : > { %6276 = vmatpush1.bf16.msra.mxu0 %v10115_v27  ;;  %8725 = vmatprep.subr.bf16.mxu1 %v8724_v51  ;;  %v6521_v27 = vld [vmem:[#allocation10 + $0x478] sm:$0xff] }
 0x423   : > { %6277 = vmatprep.subr.bf16.mxu0 %v10120_v2  ;;  %v8746_v2 = vpack.c.bf16 %v6521_v27, %v6520_v60  ;;  %v10138_v51 = vld [vmem:[#allocation5 + $0x16a4] ss:$40 sps:$4 sm:$0xff]   ;;  %v10151_v15 = vld [vmem:[#allocation5 + $0x1830] ss:$40 sps:$4 sm:$0xff]   ;;  %v6893_v60 = vld [vmem:[#allocation11 + $0x28] sm:$0xff] }
 0x424   : > { %v6892_v27 = vld [vmem:[#allocation11 + $0x20] sm:$0xff] }
 0x425   : > { %8727 = vmatpush3.bf16.msra.mxu1 %v8726_v39  ;;  %v10147_v39 = vld [vmem:[#allocation5 + $0x1794] ss:$40 sps:$4 sm:$0xff]  }
 0x426   : > { %6278 = vmatpush1.bf16.msra.mxu0 %v10118_v16  ;;  %8729 = vmatprep.subr.bf16.mxu1 %v8728_v5  ;;  %v10142_v16 = vld [vmem:[#allocation5 + $0x1740] ss:$40 sps:$4 sm:$0xff]   ;;  %v10150_v5 = vld [vmem:[#allocation5 + $0x17e4] ss:$40 sps:$4 sm:$0xff]  }
 0x427   : > { %6279 = vmatprep.subr.bf16.mxu0 %v10123_v13  ;;  %v10145_v13 = vld [vmem:[#allocation5 + $0x1790] ss:$40 sps:$4 sm:$0xff]  }
 0x429   : > { %8731 = vmatpush3.bf16.msra.mxu1 %v8730_v52 }
 0x42a   : > { %6280 = vmatpush1.bf16.msra.mxu0 %v10121_v45  ;;  %8733 = vmatprep.subr.bf16.mxu1 %v8732_v20  ;;  %v10157_v45 = vld [vmem:[#allocation5 + $0x18d0] ss:$40 sps:$4 sm:$0xff]  }
 0x42b   : > { %6281 = vmatprep.subr.bf16.mxu0 %v10126_v57 }
 0x42d   : > { %8735 = vmatpush3.bf16.msra.mxu1 %v8734_v30  ;;  %v6888_v30 = vld [vmem:[#allocation11] sm:$0xff] }
 0x42e   : > { %6282 = vmatpush1.bf16.msra.mxu0 %v10124_v28  ;;  %8737 = vmatprep.subr.bf16.mxu1 %v8736_v34  ;;  %v6889_v28 = vld [vmem:[#allocation11 + $0x8] sm:$0xff]  ;;  %v10466_v34 = vmov 0.0  }
 0x42f   : > { %6283 = vmatprep.subr.bf16.mxu0 %v10129_v32  ;;  %v6891_v32 = vld [vmem:[#allocation11 + $0x18] sm:$0xff]  ;;  %399 = vst.msk [vmem:[%s11005_s9 + $0x8] sm:$0x3] %vm11001_vm1, %v10466_v34 }
 0x431   : > { %8739 = vmatpush3.bf16.msra.mxu1 %v8738_v40 }
 0x432   : > { %6284 = vmatpush1.bf16.msra.mxu0 %v10127_v38  ;;  %8741 = vmatprep.subr.bf16.mxu1 %v8740_v18 }
 0x433   : > { %6285 = vmatprep.subr.bf16.mxu0 %v10132_v46 }
 0x435   : > { %8743 = vmatpush3.bf16.msra.mxu1 %v8742_v14 }
 0x436   : > { %6286 = vmatpush1.bf16.msra.mxu0 %v10130_v17  ;;  %8745 = vmatprep.subr.bf16.mxu1 %v8744_v59  ;;  %v6890_v59 = vld [vmem:[#allocation11 + $0x10] sm:$0xff] }
 0x437   : > { %6287 = vmatprep.subr.bf16.mxu0 %v10135_v9 }
 0x439   : > { %8747 = vmatpush3.bf16.msra.mxu1 %v8746_v2  ;;  %v6894_v2 = vld [vmem:[#allocation11 + $0x30] sm:$0xff] }
 0x43a   : > { %6288 = vmatpush1.bf16.msra.mxu0 %v10133_v61  ;;  %6902 = vmatprep.subr.mxu1 %v6889_v28  ;;  %v6895_v61 = vld [vmem:[#allocation11 + $0x38] sm:$0xff] }
 0x43b   : > { %6289 = vmatprep.subr.bf16.mxu0 %v10138_v51  ;;  %v6897_v51 = vld [vmem:[#allocation11 + $0x48] sm:$0xff] }
 0x43c   : > { %6883 = vmatmul.mubr.f32.vlgmr.msra.gmra.mrb[20].mxu1 %v413_v4  ;;  %v10154_v4 = vld [vmem:[#allocation5 + $0x1880] ss:$40 sps:$4 sm:$0xff]  }
 0x43d   : > { %6903 = vmatpush1.msra.mxu1 %v6888_v30  ;;  %6966 = vmatprep.mubr.f32.mxu1 %v10466_v34 }
 0x43e   : > { %6290 = vmatpush1.bf16.msra.mxu0 %v10136_v12  ;;  %6973 = vmatprep.subr.mxu1 %v6891_v32  ;;  %v6896_v12 = vld [vmem:[#allocation11 + $0x40] sm:$0xff] }
 0x43f   : > { %6291 = vmatprep.subr.bf16.mxu0 %v10141_v1 }
 0x442   : > { %6292 = vmatpush1.bf16.msra.mxu0 %v10139_v22 }
 0x443   : > { %6293 = vmatprep.subr.bf16.mxu0 %v10144_v63 }
 0x446   : > { %6294 = vmatpush1.bf16.msra.mxu0 %v10142_v16 }
 0x447   : > { %6295 = vmatprep.subr.bf16.mxu0 %v10147_v39 }
 0x44a   : > { %6296 = vmatpush1.bf16.msra.mxu0 %v10145_v13  ;;  %v6314_v13 = vld [vmem:[#allocation8] sm:$0xff] }
 0x44b   : > { %6297 = vmatprep.subr.bf16.mxu0 %v10150_v5  ;;  %v6321_v5 = vrot.slane %v6314_v13, %v10826_v6  ;;  %v6333_v37 = vrot.slane %v6314_v13, %v433_v48  ;;  %v6345_v48 = vrot.slane %v6314_v13, %v445_v33  ;;  %v6349_v30 = vrot.slane %v6314_v13, %v449_v0 }
 0x44e   : > { %6298 = vmatpush1.bf16.msra.mxu0 %v10148_v8  ;;  %v6325_v8 = vrot.slane %v6314_v13, %v10797_v47 }
 0x44f   : > { %6299 = vmatprep.subr.bf16.mxu0 %v10153_v10  ;;  %v6329_v10 = vrot.slane %v6314_v13, %v429_v7  ;;  %v6315_v7 = vld [vmem:[#allocation8 + $0x8] sm:$0x3] }
 0x452   : > { %6300 = vmatpush1.bf16.msra.mxu0 %v10151_v15  ;;  %v6368_v15 = vmul.f32 %v10937_v29, %v6321_v5  ;;  %v6371_v29 = vmul.f32 %v6333_v37, %v10952_v23  ;;  %v6357_v23 = vrot.slane %v6315_v7, %v10797_v47 }
 0x453   : > { %6301 = vmatprep.subr.bf16.mxu0 %v10156_v44 }
 0x456   : > { %6302 = vmatpush1.bf16.msra.mxu0 %v10154_v4  ;;  %v6369_v4 = vmul.f32 %v10940_v31, %v6325_v8 }
 0x457   : > { %6303 = vmatprep.subr.bf16.mxu0 %v10159_v53 }
 0x45a   : > { %6304 = vmatpush1.bf16.msra.mxu0 %v10157_v45 }
 0x45d   : > { %6306 = vmatmul.mubr.bf16.vlgmr.msra.gmra.mrb[8].mxu0 %v10914_v24 }
 0x46f   : > { %v10990_v52 = vpop.f32.mrb[8].mxu1 }
 0x470   : > { %v10992_v57 = vpop.f32.mrb[9].mxu1 }
 0x471   : > { %v6106_v20 = vpop.f32.mrb[10].mxu1 }
 0x472   : > { %v6107_v58 = vpop.f32.mrb[11].mxu1  ;;  %v6337_v20 = vrot.slane %v6314_v13, %v437_v41 }
 0x48f   : > { %v8445_v11 = vpop.f32.mrb[12].mxu1 }
 0x490   : > { %v8446_v25 = vpop.f32.mrb[13].mxu1 }
 0x491   : > { %v8447_v26 = vadd.f32 %v8446_v25, %v8445_v11  ;;  %v6370_v11 = vmul.f32 %v6329_v10, %v10950_v21  ;;  %v6341_v25 = vrot.slane %v6314_v13, %v441_v55  ;;  %v6372_v21 = vmul.f32 %v6337_v20, %v10973_v36 }
 0x4af   : > { %v8480_v3 = vpop.f32.mrb[14].mxu1 }
 0x4b0   : > { %v8481_v35 = vpop.f32.mrb[15].mxu1 }
 0x4b1   : > { %v8482_v24 = vadd.f32 %v8481_v35, %v8480_v3  ;;  %v6353_v3 = vrot.slane %v6315_v7, %v10826_v6 }
 0x4b3   : > { %v6675_v62 = vadd.f32 %v8482_v24, %v8447_v26  ;;  %v6373_v24 = vmul.f32 %v6341_v25, %v10975_v43 }
 0x4cf   : > { %v8515_v49 = vpop.f32.mrb[16].mxu1 }
 0x4d0   : > { %v8516_v38 = vpop.f32.mrb[17].mxu1 }
 0x4d1   : > { %v8517_v40 = vadd.f32 %v8516_v38, %v8515_v49  ;;  %v6374_v49 = vmul.f32 %v6345_v48, %v10990_v52 }
 0x4d3   : > { %v6745_v46 = vadd.f32 %v8517_v40, %v6675_v62  ;;  %v10467_v40 = vmov 1966171168  }
 0x4d4   : > { %v7354_v0 = vunpack.c.l.s4 %v10467_v40 }
 0x4ef   : > { %v8550_v18 = vpop.f32.mrb[18].mxu1 }
 0x4f0   : > { %v8551_v50 = vpop.f32.mrb[19].mxu1 }
 0x4f1   : > { %v8552_v19 = vadd.f32 %v8551_v50, %v8550_v18  ;;  %v6375_v50 = vmul.f32 %v6349_v30, %v10992_v57 }
 0x4f3   : > { %v6815_v56 = vadd.f32 %v8552_v19, %v6745_v46 }
 0x50f   : > { %v8585_v54 = vpop.f32.mrb[20].mxu1 }
 0x510   : > { %v8586_v17 = vpop.f32.mrb[21].mxu1 }
 0x511   : > { %v8587_v14 = vadd.f32 %v8586_v17, %v8585_v54 }
 0x513   : > { %v6885_v9 = vadd.f32 %v8587_v14, %v6815_v56 }
 0x515   : > { %8405 = vmatmul.mubr.msk.f32.vlgmr.msra.gmra.mrb[22].mxu1 %vm6898_vm0, %v6885_v9 }
 0x516   : > { %6974 = vmatpush1.msra.mxu1 %v6890_v59  ;;  %7037 = vmatprep.mubr.f32.mxu1 %v10466_v34 }
 0x517   : > { %7044 = vmatprep.subr.mxu1 %v6893_v60 }
 0x519   : > { %8406 = vmatmul.mubr.msk.f32.vlgmr.msra.gmra.mrb[24].mxu1 %vm6898_vm0, %v6885_v9 }
 0x51a   : > { %7045 = vmatpush1.msra.mxu1 %v6892_v27  ;;  %7108 = vmatprep.mubr.f32.mxu1 %v10466_v34  ;;  %v7355_v27 = vunpack.c.0.s8 %v7354_v0 }
 0x51b   : > { %7115 = vmatprep.subr.mxu1 %v6895_v61 }
 0x51d   : > { %8407 = vmatmul.mubr.msk.f32.vlgmr.msra.gmra.mrb[26].mxu1 %vm6898_vm0, %v6885_v9 }
 0x51e   : > { %7116 = vmatpush1.msra.mxu1 %v6894_v2  ;;  %7179 = vmatprep.mubr.f32.mxu1 %v10466_v34 }
 0x51f   : > { %7186 = vmatprep.subr.mxu1 %v6897_v51 }
 0x521   : > { %8408 = vmatmul.mubr.msk.f32.vlgmr.msra.gmra.mrb[28].mxu1 %vm6898_vm0, %v6885_v9 }
 0x522   : > { %7187 = vmatpush1.msra.mxu1 %v6896_v12  ;;  %7250 = vmatprep.mubr.f32.mxu1 %v10466_v34 }
 0x525   : > { %8409 = vmatmul.mubr.msk.f32.vlgmr.msra.gmra.mrb[30].mxu1 %vm6898_vm0, %v6885_v9 }
 0x530   : > { %v6307_v1 = vpop.f32.mrb[8].mxu0 }
 0x531   : > { %v6309_v22 = vpop.f32.mrb[9].mxu0  ;;  %v6376_v54 = vmul.f32 %v6353_v3, %v6307_v1  ;;  %v7358_v3 = vsub.s32 %v7355_v27, %v10794_v42 }
 0x532   : > { %v6311_v63 = vpop.f32.mrb[10].mxu0  ;;  %v6377_v47 = vmul.f32 %v6357_v23, %v6309_v22 }
 0x533   : > { %v6312_v16 = vpop.f32.mrb[11].mxu0 }
 0x5e8   : > { %v6968_v44 = vpop.f32.mrb[22].mxu1 }
 0x5e9   : > { %v7257_v53 = vadd.f32 %v6968_v44, %v6368_v15  ;;  %v6970_v45 = vpop.f32.mrb[23].mxu1 }
 0x5ea   : > { %v7258_v58 = vadd.f32 %v6970_v45, %v6369_v4 }
 0x5eb   : > { %v7269_v26 = vrot.slane %v7257_v53, 4 }
 0x5ec   : > { %v7275_v28 = vrot.slane %v7258_v58, 4  ;;  %v7039_v31 = vpop.f32.mrb[24].mxu1 }
 0x5ed   : > { %v7270_v32 = vadd.f32 %v7269_v26, %v7257_v53  ;;  %v7259_v41 = vadd.f32 %v7039_v31, %v6370_v11  ;;  %v7041_v34 = vpop.f32.mrb[25].mxu1 }
 0x5ee   : > { %v7276_v55 = vadd.f32 %v7275_v28, %v7258_v58  ;;  %v7260_v35 = vadd.f32 %v7041_v34, %v6371_v29 }
 0x5ef   : > { %v7271_v62 = vrot.slane %v7270_v32, 2  ;;  %v7281_v33 = vrot.slane %v7259_v41, 4 }
 0x5f0   : > { %v7277_v38 = vrot.slane %v7276_v55, 2  ;;  %v7287_v46 = vrot.slane %v7260_v35, 4  ;;  %v7110_v18 = vpop.f32.mrb[26].mxu1 }
 0x5f1   : > { %v7272_v36 = vadd.f32 %v7271_v62, %v7270_v32  ;;  %v7282_v19 = vadd.f32 %v7281_v33, %v7259_v41  ;;  %v7261_v6 = vadd.f32 %v7110_v18, %v6372_v21  ;;  %v7112_v56 = vpop.f32.mrb[27].mxu1 }
 0x5f2   : > { %v7278_v17 = vadd.f32 %v7277_v38, %v7276_v55  ;;  %v7288_v43 = vadd.f32 %v7287_v46, %v7260_v35  ;;  %v7262_v14 = vadd.f32 %v7112_v56, %v6373_v24 }
 0x5f3   : > { %v7273_v9 = vrot.slane %v7272_v36, 1  ;;  %v7283_v59 = vrot.slane %v7282_v19, 2  ;;  %v7293_v60 = vrot.slane %v7261_v6, 4 }
 0x5f4   : > { %v7279_v52 = vrot.slane %v7278_v17, 1  ;;  %v7289_v61 = vrot.slane %v7288_v43, 2  ;;  %v7299_v2 = vrot.slane %v7262_v14, 4  ;;  %v7181_v51 = vpop.f32.mrb[28].mxu1 }
 0x5f5   : > { %v7274_v12 = vadd.f32 %v7273_v9, %v7272_v36  ;;  %v7284_v63 = vadd.f32 %v7283_v59, %v7282_v19  ;;  %v7294_v57 = vadd.f32 %v7293_v60, %v7261_v6  ;;  %v7263_v16 = vadd.f32 %v7181_v51, %v6374_v49  ;;  %v7183_v13 = vpop.f32.mrb[29].mxu1 }
 0x5f6   : > { %v7280_v5 = vadd.f32 %v7279_v52, %v7278_v17  ;;  %v7290_v8 = vadd.f32 %v7289_v61, %v7288_v43  ;;  %v7300_v1 = vadd.f32 %v7299_v2, %v7262_v14  ;;  %v7264_v10 = vadd.f32 %v7183_v13, %v6375_v50 }
 0x5f7   : > { %v7329_v15 = vmul.f32 0.125, %v7274_v12  ;;  %v7285_v37 = vrot.slane %v7284_v63, 1  ;;  %v7295_v22 = vrot.slane %v7294_v57, 2  ;;  %v7305_v44 = vrot.slane %v7263_v16, 4 }
 0x5f8   : > { %v7330_v4 = vmul.f32 0.125, %v7280_v5  ;;  %v7291_v53 = vrot.slane %v7290_v8, 1  ;;  %v7301_v45 = vrot.slane %v7300_v1, 2  ;;  %v7311_v20 = vrot.slane %v7264_v10, 4  ;;  %v7252_v58 = vpop.f32.mrb[30].mxu1 }
 0x5f9   : > { %v7286_v11 = vadd.f32 %v7285_v37, %v7284_v63  ;;  %v7296_v25 = vadd.f32 %v7295_v22, %v7294_v57  ;;  %v7306_v7 = vadd.f32 %v7305_v44, %v7263_v16  ;;  %v7265_v26 = vadd.f32 %v7252_v58, %v6376_v54  ;;  %v7254_v29 = vpop.f32.mrb[31].mxu1  ;;  %v7428_v44 = vld [vmem:[#allocation13] sm:$0xff]  ;;  %v7429_v58 = vld [vmem:[#allocation13 + $0x8] sm:$0x3] }
 0x5fa   : > { %v7349_v48 = vcombine.low %v7329_v15, %v7330_v4  ;;  %v7292_v28 = vadd.f32 %v7291_v53, %v7290_v8  ;;  %v7302_v31 = vadd.f32 %v7301_v45, %v7300_v1  ;;  %v7312_v30 = vadd.f32 %v7311_v20, %v7264_v10  ;;  %v7268_v4 = vld [vmem:[%s11005_s9 + $0x8] sm:$0x3] }
 0x5fb   : > { %v7331_v32 = vmul.f32 0.125, %v7286_v11  ;;  %v7297_v41 = vrot.slane %v7296_v25, 1  ;;  %v7307_v34 = vrot.slane %v7306_v7, 2  ;;  %v7317_v21 = vrot.slane %v7265_v26, 4 }
 0x5fc   : > { %v7332_v55 = vmul.f32 0.125, %v7292_v28  ;;  %v7303_v35 = vrot.slane %v7302_v31, 1  ;;  %v7313_v24 = vrot.slane %v7312_v30, 2  ;;  %v7266_v49 = vadd.f32 %v7254_v29, %v6377_v47 }
 0x5fd   : > { %v7298_v23 = vadd.f32 %v7297_v41, %v7296_v25  ;;  %v7308_v62 = vadd.f32 %v7307_v34, %v7306_v7  ;;  %v7318_v33 = vadd.f32 %v7317_v21, %v7265_v26  ;;  %v7359_v19 = vrot.slane %v7349_v48, %v7358_v3 }
 0x5fe   : > { %v7350_v38 = vcombine.low %v7331_v32, %v7332_v55  ;;  %v7304_v40 = vadd.f32 %v7303_v35, %v7302_v31  ;;  %v7314_v0 = vadd.f32 %v7313_v24, %v7312_v30  ;;  %v7323_v36 = vrot.slane %v7266_v49, 4 }
 0x5ff   : > { %v7333_v46 = vmul.f32 0.125, %v7298_v23  ;;  %v7309_v18 = vrot.slane %v7308_v62, 1  ;;  %v7319_v50 = vrot.slane %v7318_v33, 2 }
 0x600   : > { %v7366_v6 = vrot.slane %v7350_v38, %v7358_v3  ;;  %v7334_v56 = vmul.f32 0.125, %v7304_v40  ;;  %v7315_v54 = vrot.slane %v7314_v0, 1  ;;  %v7324_v43 = vadd.f32 %v7323_v36, %v7266_v49 }
 0x601   : > { %v7310_v17 = vadd.f32 %v7309_v18, %v7308_v62  ;;  %v7320_v42 = vadd.f32 %v7319_v50, %v7318_v33 }
 0x602   : > { %v7381_v14 = vcombine.low %v7359_v19, %v7366_v6  ;;  %v7351_v9 = vcombine.low %v7333_v46, %v7334_v56  ;;  %v7316_v59 = vadd.f32 %v7315_v54, %v7314_v0  ;;  %v7325_v47 = vrot.slane %v7324_v43, 2 }
 0x603   : > { %v7335_v60 = vmul.f32 0.125, %v7310_v17  ;;  %v7321_v52 = vrot.slane %v7320_v42, 1 }
 0x604   : > { %v7336_v27 = vmul.f32 0.125, %v7316_v59  ;;  %v7326_v2 = vadd.f32 %v7325_v47, %v7324_v43  ;;  %v7373_v63 = vrot.slane %v7351_v9, %v7358_v3  ;;  %v7389_v1 = vrot.slane %v7381_v14, %v7358_v3 }
 0x605   : > { %v7322_v61 = vadd.f32 %v7321_v52, %v7320_v42 }
 0x606   : > { %v7352_v51 = vcombine.low %v7335_v60, %v7336_v27  ;;  %v7327_v12 = vrot.slane %v7326_v2, 1 }
 0x607   : > { %v7337_v16 = vmul.f32 0.125, %v7322_v61 }
 0x608   : > { %v7380_v57 = vrot.slane %v7352_v51, %v7358_v3  ;;  %v7328_v13 = vadd.f32 %v7327_v12, %v7326_v2 }
 0x60a   : > { %v7382_v5 = vcombine.low %v7373_v63, %v7380_v57  ;;  %v7338_v8 = vmul.f32 0.125, %v7328_v13 }
 0x60c   : > { %v7396_v10 = vrot.slane %v7382_v5, %v7358_v3  ;;  %v7398_v15 = vcombine.low %v7337_v16, %v7338_v8 }
 0x60e   : > { %v7397_v37 = vcombine.low %v7389_v1, %v7396_v10  ;;  %v7405_v22 = vrot.slane %v7398_v15, %v7358_v3 }
 0x610   : > { %v7412_v53 = vrot.slane %v7405_v22, %v7358_v3  ;;  %v7430_v45 = vadd.f32 %v7428_v44, %v7397_v37 }
 0x612   : > { %v7416_v20 = vadd.f32 %v7412_v53, %v7268_v4  ;;  %7432 = vst [vmem:[%s11005_s9] sm:$0xff] %v7430_v45 }
 0x614   : > { %7422 = vst.msk [vmem:[%s11005_s9 + $0x8] sm:$0x3] %vm11001_vm1, %v7416_v20 }
 0x61b   : > { %v7427_v11 = vld [vmem:[%s11005_s9 + $0x8] sm:$0x3] }
 0x61c   : > { %v7431_v25 = vadd.f32 %v7429_v58, %v7427_v11 }
 0x61e   : > { %7433 = vst.msk [vmem:[%s11005_s9 + $0x8] sm:$0x3] %vm11001_vm1, %v7431_v25 }
 0x61f   : > { %10372 = shalt.err (!%p10369_p8)
}
 0x620   : > { %s10373_s2 = scalar_lea.hbm %s11046_s10, 160  ;;  %s10377_s21 = scalar_lea.hbm %s11132_s14, 320 }
 0x621   : > { %p10374_p3 = scmp.ne.s32.totalorder %s11046_s10, %s10373_s2  ;;  %p10378_p13 = scmp.lt.u32.totalorder %s11046_s10, %s11132_s14 }
 0x622   : > { %p10379_p11 = scmp.lt.u32.totalorder %s10377_s21, %s10373_s2  ;;  %p10381_p2 = scmp.lt.u32.totalorder %s10373_s2, %s11046_s10 }
 0x623   : > { %p10375_p12 = pnand %p10374_p3, %p11133_p9 }
 0x624   : > { %p10380_p4 = por %p10379_p11, %p10378_p13 }
 0x625   : > { %p10376_p6 = pneg %p10375_p12 }
 0x626   : > { %p10382_p10 = por %p10381_p2, %p10380_p4 }
 0x628   : > { %p10383_p1 = pnand %p10382_p10, %p10376_p6 }
 0x62a   : > { %10386 = shalt.err (!%p10383_p1)
}
 0x62b   : > { %8857 = dma.vmem_to_hbm [thread:$0]  (%p11133_p9), %s11048_s15, 160, %s11046_s10, %s7435_s20  }
 0x62c PF: > { %s7461_s30 = sand.u32 1, %s10433_s24   ;;  %p11134_p0 = scmp.ne.s32.totalorder %s11126_s19, 0 }
 0x62d   : > { %p11135_p7 = scmp.ge.s32.totalorder %s10453_s29, 2  ;;  %s7462_s22 = scalar_lea.sflag [#allocation4], %s7461_s30 }
 0x62f   : > { %p8883_p5 = pnand %p11135_p7, %p11134_p0 }
 0x631   : > { %10428 = dma.done.wait (!%p8883_p5), %s7462_s22, 160  }
 0x632   : > { %10430 = vsyncadd (!%p8883_p5), %s7462_s22, 4294967136  ;;  %s26_s29 = sadd.s32 1, %s10453_s29   ;;  %s11136_s24 = smov %s10437_s25 }
 0x633   : > { %p23_p8 = scmp.ge.s32.totalorder %s26_s29, 4   ;;  %s11137_s25 = smov %s10441_s26 }
 0x634   : > { %s11138_s26 = smov %s10721_s18  ;;  %s11139_s27 = smov %s10449_s28 }
 0x635   : > { %s11140_s28 = smov %s11142_s16  ;;  %25 = sbr.rel (!%p23_p8) target bundleno = 13 (0xd), region = 125 }
 0x63c   :  { %7467 = vsyncpa [#allocation3], 1 }
 0x63d   :  { %7469 = vsyncpa [#allocation3 + $0x1], 1 }
 0x63e   :  { %7470 = vsyncpa [#allocation6], 1 }
 0x63f   :  { %7471 = vsyncpa [#allocation9], 1 }
 0x640   :  { %7472 = vsyncpa [#allocation12], 1 }
 0x641   :  { %7473 = vsyncpa [#allocation4], 1 }
 0x642   :  { %7475 = vsyncpa [#allocation4 + $0x1], 1 }

</bundles_post_ra>
